<compile_context>
chip_gen: v5e
topology: v5e:2x2
jax: 0.10.0
libtpu: 0.0.40
codegen_flags: <defaults>
</compile_context>

<pallas_src>
import math

import jax
import jax.numpy as jnp
from jax import lax
from jax.experimental import pallas as pl
from jax.experimental.pallas import tpu as pltpu


def encoder_lstm_kernel(tok_ref, lens_ref, table_ref,
                        w0_ih_ref, b0_ref, w0f_hh_ref, w0b_hh_ref,
                        w1_top_ref, w1_bot_ref, b1_ref, w1f_hh_ref, w1b_hh_ref,
                        h_out_ref,
                        out0f_ref, out0b_ref):
    LB = tok_ref.shape[0]            # L * B_pad (time-major rows)
    B = lens_ref.shape[0]            # padded batch (multiple of 8)
    H = table_ref.shape[1]
    V = table_ref.shape[0]           # padded vocab (multiple of 128)
    L = LB // B

    # ---- hoisted loads (weights / biases / lengths read exactly once) ----
    lens = lens_ref[...]             # (B, 1) int32 (0 for pad rows)
    w0_ih = w0_ih_ref[...]           # (H,  8H)  [fwd gates | bwd gates]
    b0 = b0_ref[...]                 # (1,  8H)
    w0f_hh = w0f_hh_ref[...]         # (H,  4H)
    w0b_hh = w0b_hh_ref[...]         # (H,  4H)
    w1_top = w1_top_ref[...]         # (H,  8H)  multiplies layer-0 fwd output
    w1_bot = w1_bot_ref[...]         # (H,  8H)  multiplies layer-0 bwd output
    b1 = b1_ref[...]                 # (1,  8H)
    w1f_hh = w1f_hh_ref[...]         # (H,  4H)
    w1b_hh = w1b_hh_ref[...]         # (H,  4H)

    # ---- in-kernel embedding gather (one-hot MXU matmul) + relu ----------
    tok = tok_ref[...]                                              # (L*B, 1) int32
    vocab_iota = lax.broadcasted_iota(jnp.int32, (LB, V), 1)
    onehot = (tok == vocab_iota).astype(jnp.float32)                # (L*B, V)
    x_all = jnp.maximum(
        jnp.dot(onehot, table_ref[...], preferred_element_type=jnp.float32), 0.0)

    # ---- layer-0 input projection: one (L*B, H) @ (H, 8H) MXU matmul -----
    gx0 = jnp.dot(x_all, w0_ih, preferred_element_type=jnp.float32) + b0    # (L*B, 8H)

    # ---- hoisted masks (no per-where broadcast on the serial chain) ------
    masks = [jnp.broadcast_to(lens > t, (B, H)) for t in range(L)]          # (B, H) bool
    lane_idx = lax.broadcasted_iota(jnp.int32, (B, 4 * H), 1)
    g_lanes = (lane_idx >= 2 * H) & (lane_idx < 3 * H)              # "g" block of [i|f|g|o]

    zeros = jnp.zeros((B, H), jnp.float32)

    def cell(gx, h, c, w_hh):
        # gx already holds x_t @ W_ih + b ; only the recurrent matmul is here.
        gates = gx + jnp.dot(h, w_hh, preferred_element_type=jnp.float32)   # (B, 4H)
        # one full-vreg sigmoid + one full-vreg tanh + one select
        act = jnp.where(g_lanes, jnp.tanh(gates), jax.nn.sigmoid(gates))
        i = act[:, 0 * H:1 * H]
        f = act[:, 1 * H:2 * H]
        g = act[:, 2 * H:3 * H]
        o = act[:, 3 * H:4 * H]
        c_new = f * c + i * g
        h_new = o * jnp.tanh(c_new)
        return h_new, c_new

    # ---- layer 0: fused fwd+bwd recurrence, fully unrolled ---------------
    h0f, c0f = zeros, zeros
    h0b, c0b = zeros, zeros
    for s in range(L):
        tf = s
        tb = L - 1 - s
        gxf = gx0[tf * B:(tf + 1) * B, 0 * H:4 * H]
        gxb = gx0[tb * B:(tb + 1) * B, 4 * H:8 * H]
        hf_new, cf_new = cell(gxf, h0f, c0f, w0f_hh)
        hb_new, cb_new = cell(gxb, h0b, c0b, w0b_hh)
        vf, vb = masks[tf], masks[tb]
        h0f = jnp.where(vf, hf_new, h0f)
        c0f = jnp.where(vf, cf_new, c0f)
        h0b = jnp.where(vb, hb_new, h0b)
        c0b = jnp.where(vb, cb_new, c0b)
        # stream layer-0 outputs into VMEM slabs (sublane-aligned static stores)
        out0f_ref[tf * B:(tf + 1) * B, :] = h0f
        out0b_ref[tb * B:(tb + 1) * B, :] = h0b
    # NOTE: padded timesteps carry the last valid h (PyTorch pads packed outputs
    # with zeros), but layer 1 masks those steps so the returned h is unaffected.

    # ---- layer-1 input projection: two batched MXU matmuls ---------------
    gx1 = (jnp.dot(out0f_ref[...], w1_top, preferred_element_type=jnp.float32)
           + jnp.dot(out0b_ref[...], w1_bot, preferred_element_type=jnp.float32)
           + b1)                                                            # (L*B, 8H)

    # ---- layer 1: fused fwd+bwd recurrence, fully unrolled ---------------
    h1f, c1f = zeros, zeros
    h1b, c1b = zeros, zeros
    for s in range(L):
        tf = s
        tb = L - 1 - s
        hf_new, cf_new = cell(gx1[tf * B:(tf + 1) * B, 0 * H:4 * H], h1f, c1f, w1f_hh)
        hb_new, cb_new = cell(gx1[tb * B:(tb + 1) * B, 4 * H:8 * H], h1b, c1b, w1b_hh)
        vf, vb = masks[tf], masks[tb]
        h1f = jnp.where(vf, hf_new, h1f)
        c1f = jnp.where(vf, cf_new, c1f)
        h1b = jnp.where(vb, hb_new, h1b)
        c1b = jnp.where(vb, cb_new, c1b)

    # single contiguous output slab, PyTorch order [l0_fwd, l0_bwd, l1_fwd, l1_bwd]
    h_out_ref[0 * B:1 * B, :] = h0f
    h_out_ref[1 * B:2 * B, :] = h0b
    h_out_ref[2 * B:3 * B, :] = h1f
    h_out_ref[3 * B:4 * B, :] = h1b


def prepare_params(emb_table, layers):
    """One-time parameter fusion / padding (kept off the per-call path)."""
    (w0f_ih, w0f_hh, b0f), (w0b_ih, w0b_hh, b0b), \
        (w1f_ih, w1f_hh, b1f), (w1b_ih, w1b_hh, b1b) = layers
    V, H = emb_table.shape
    V_pad = max(128, int(pl.cdiv(V, 128)) * 128)
    table = jnp.zeros((V_pad, H), jnp.float32).at[:V, :].set(emb_table.astype(jnp.float32))

    # column-concatenate fwd|bwd input-gate weights so each layer's input
    # projection is a single (.., 8H) matmul that fills the MXU.
    w0_ih = jnp.concatenate([w0f_ih, w0b_ih], axis=1)          # (H,  8H)
    b0 = jnp.concatenate([b0f, b0b], axis=1)                   # (1,  8H)
    w1_top = jnp.concatenate([w1f_ih[:H], w1b_ih[:H]], axis=1) # (H,  8H)
    w1_bot = jnp.concatenate([w1f_ih[H:], w1b_ih[H:]], axis=1) # (H,  8H)
    b1 = jnp.concatenate([b1f, b1b], axis=1)                   # (1,  8H)

    return dict(table=table, w0_ih=w0_ih, b0=b0, w0f_hh=w0f_hh, w0b_hh=w0b_hh,
                w1_top=w1_top, w1_bot=w1_bot, b1=b1, w1f_hh=w1f_hh, w1b_hh=w1b_hh)


def encoder_lstm_forward(x_tokens, params):
    """x_tokens: (B, L) int32 token ids, 0 == pad.  Returns h of shape (4, B, H)."""
    B, L = x_tokens.shape
    H = params["table"].shape[1]
    V_pad = params["table"].shape[0]
    B_pad = max(8, ((B + 7) // 8) * 8)    # pad batch to a full sublane tile

    # tiny int-only glue: lengths + time-major token layout (pad rows: len=0, tok=0)
    lens = jnp.sum((x_tokens != 0).astype(jnp.int32), axis=1)
    lens_pad = jnp.zeros((B_pad, 1), jnp.int32).at[:B, 0].set(lens)
    tok_pad = jnp.zeros((B_pad, L), jnp.int32).at[:B, :].set(x_tokens.astype(jnp.int32))
    tok_tm = jnp.transpose(tok_pad, (1, 0)).reshape(L * B_pad, 1)   # row = t*B_pad + b

    inputs = (tok_tm, lens_pad, params["table"], params["w0_ih"], params["b0"],
              params["w0f_hh"], params["w0b_hh"], params["w1_top"], params["w1_bot"],
              params["b1"], params["w1f_hh"], params["w1b_hh"])
    vmem_spec = pl.BlockSpec(memory_space=pltpu.MemorySpace.VMEM)

    LB = L * B_pad
    flops = int(2 * LB * V_pad * H             # embedding one-hot matmul
                + 2 * LB * H * 8 * H           # layer-0 input projection
                + 2 * 2 * LB * H * 8 * H       # layer-1 input projection (2 matmuls)
                + 4 * L * 2 * B_pad * H * 4 * H)   # recurrent h @ W_hh
    transcendentals = int(4 * L * (2 * B_pad * 4 * H + B_pad * H))
    bytes_accessed = int(4 * (sum(int(a.size) for a in inputs) + 4 * B_pad * H))

    h2d = pl.pallas_call(
        encoder_lstm_kernel,
        out_shape=jax.ShapeDtypeStruct((4 * B_pad, H), jnp.float32),
        in_specs=[vmem_spec] * len(inputs),
        out_specs=vmem_spec,
        scratch_shapes=[pltpu.VMEM((LB, H), jnp.float32),   # layer-0 fwd outputs
                        pltpu.VMEM((LB, H), jnp.float32)],  # layer-0 bwd outputs
        cost_estimate=pl.CostEstimate(flops=flops,
                                      transcendentals=transcendentals,
                                      bytes_accessed=bytes_accessed),
    )(*inputs)
    return h2d.reshape(4, B_pad, H)[:, :B, :]


def reference_forward(x_tokens, emb_table, layers):
    """Pure-JAX reference with identical masked packed-LSTM semantics."""
    B, L = x_tokens.shape
    H = emb_table.shape[1]
    emb = jnp.maximum(jnp.take(emb_table, x_tokens, axis=0), 0.0)  # (B, L, H)
    lens = jnp.sum((x_tokens != 0).astype(jnp.int32), axis=1)[:, None]

    def cell(x_t, h, c, w_ih, w_hh, b):
        g = (jnp.dot(x_t, w_ih, precision=lax.Precision.HIGHEST)
             + jnp.dot(h, w_hh, precision=lax.Precision.HIGHEST) + b)
        i = jax.nn.sigmoid(g[:, :H])
        f = jax.nn.sigmoid(g[:, H:2 * H])
        gg = jnp.tanh(g[:, 2 * H:3 * H])
        o = jax.nn.sigmoid(g[:, 3 * H:])
        c_new = f * c + i * gg
        h_new = o * jnp.tanh(c_new)
        return h_new, c_new

    def run_dir(inputs, w_ih, w_hh, b, reverse):
        h = jnp.zeros((B, H), jnp.float32)
        c = jnp.zeros((B, H), jnp.float32)
        outs = [None] * L
        ts = range(L - 1, -1, -1) if reverse else range(L)
        for t in ts:
            h_new, c_new = cell(inputs[t], h, c, w_ih, w_hh, b)
            valid = t < lens
            h = jnp.where(valid, h_new, h)
            c = jnp.where(valid, c_new, c)
            outs[t] = h
        return h, outs

    inputs0 = [emb[:, t, :] for t in range(L)]
    h0f, o0f = run_dir(inputs0, *layers[0], reverse=False)
    h0b, o0b = run_dir(inputs0, *layers[1], reverse=True)
    inputs1 = [jnp.concatenate([o0f[t], o0b[t]], axis=-1) for t in range(L)]
    h1f, _ = run_dir(inputs1, *layers[2], reverse=False)
    h1b, _ = run_dir(inputs1, *layers[3], reverse=True)
    return jnp.stack([h0f, h0b, h1f, h1b], axis=0)


def init_params(key, vocab_size, hidden_dim, num_layers=2, bidir=True):
    """Deterministic synthetic parameters matching nn.Embedding + nn.LSTM shapes."""
    H = hidden_dim
    n_dirs = 2 if bidir else 1
    keys = jax.random.split(key, 1 + 3 * num_layers * n_dirs)

    emb = jax.random.normal(keys[0], (vocab_size, H), jnp.float32)
    emb = emb.at[0].set(0.0)                       # padding_idx = 0

    bound = 1.0 / math.sqrt(H)
    layers = []
    k = 1
    for layer in range(num_layers):
        in_dim = H if layer == 0 else n_dirs * H
        for _ in range(n_dirs):
            # pre-transposed: (in_dim, 4H) and (H, 4H); bias = b_ih + b_hh combined.
            w_ih = jax.random.uniform(keys[k], (in_dim, 4 * H), jnp.float32, -bound, bound); k += 1
            w_hh = jax.random.uniform(keys[k], (H, 4 * H), jnp.float32, -bound, bound); k += 1
            b = jax.random.uniform(keys[k], (1, 4 * H), jnp.float32, -bound, bound); k += 1
            layers.append((w_ih, w_hh, b))
    return emb, layers


if __name__ == "__main__":
    vocab_size, hidden_dim = 50, 32
    B, L = 2, 8

    emb_table, layers = init_params(jax.random.PRNGKey(0), vocab_size, hidden_dim)
    params = prepare_params(emb_table, layers)     # one-time fusion, off the per-call path

    # Tokens with trailing padding (pad token = 0), lengths = [8, 5].
    raw = jax.random.randint(jax.random.PRNGKey(1), (B, L), 1, vocab_size, dtype=jnp.int32)
    true_lens = jnp.array([8, 5], dtype=jnp.int32)
    valid_mask = jnp.arange(L)[None, :] < true_lens[:, None]
    x_tokens = jnp.where(valid_mask, raw, 0)

    h = encoder_lstm_forward(x_tokens, params)
    h = jax.block_until_ready(h)

    h_ref = reference_forward(x_tokens, emb_table, layers)
    assert h.shape == (4, B, hidden_dim), h.shape
    max_err = float(jnp.max(jnp.abs(h - h_ref)))
    assert jnp.allclose(h, h_ref, rtol=5e-3, atol=5e-3), max_err

    print("KERNEL_OK")
</pallas_src>

<mosaic_0001>
module attributes {stable_mosaic.version = 11 : i64} {
  func.func @encoder_lstm_kernel(%arg0: memref<64x1xi32, #tpu.memory_space<vmem>>, %arg1: memref<8x1xi32, #tpu.memory_space<vmem>>, %arg2: memref<128x32xf32, #tpu.memory_space<vmem>>, %arg3: memref<32x256xf32, #tpu.memory_space<vmem>>, %arg4: memref<1x256xf32, #tpu.memory_space<vmem>>, %arg5: memref<32x128xf32, #tpu.memory_space<vmem>>, %arg6: memref<32x128xf32, #tpu.memory_space<vmem>>, %arg7: memref<32x256xf32, #tpu.memory_space<vmem>>, %arg8: memref<32x256xf32, #tpu.memory_space<vmem>>, %arg9: memref<1x256xf32, #tpu.memory_space<vmem>>, %arg10: memref<32x128xf32, #tpu.memory_space<vmem>>, %arg11: memref<32x128xf32, #tpu.memory_space<vmem>>, %arg12: memref<32x32xf32, #tpu.memory_space<vmem>>, %arg13: memref<64x32xf32, #tpu.memory_space<vmem>>, %arg14: memref<64x32xf32, #tpu.memory_space<vmem>>) attributes {dimension_semantics = [], scalar_prefetch = 0 : i64, scratch_operands = 2 : i64, tpu.core_type = #tpu.core_type<tc>} {
    %c0 = arith.constant 0 : index
    %c0_0 = arith.constant 0 : index
    %0 = vector.load %arg1[%c0, %c0_0] : memref<8x1xi32, #tpu.memory_space<vmem>>, vector<8x1xi32>
    %c0_1 = arith.constant 0 : index
    %c0_2 = arith.constant 0 : index
    %1 = vector.load %arg3[%c0_1, %c0_2] : memref<32x256xf32, #tpu.memory_space<vmem>>, vector<32x256xf32>
    %c0_3 = arith.constant 0 : index
    %c0_4 = arith.constant 0 : index
    %2 = vector.load %arg4[%c0_3, %c0_4] : memref<1x256xf32, #tpu.memory_space<vmem>>, vector<1x256xf32>
    %c0_5 = arith.constant 0 : index
    %c0_6 = arith.constant 0 : index
    %3 = vector.load %arg5[%c0_5, %c0_6] : memref<32x128xf32, #tpu.memory_space<vmem>>, vector<32x128xf32>
    %c0_7 = arith.constant 0 : index
    %c0_8 = arith.constant 0 : index
    %4 = vector.load %arg6[%c0_7, %c0_8] : memref<32x128xf32, #tpu.memory_space<vmem>>, vector<32x128xf32>
    %c0_9 = arith.constant 0 : index
    %c0_10 = arith.constant 0 : index
    %5 = vector.load %arg7[%c0_9, %c0_10] : memref<32x256xf32, #tpu.memory_space<vmem>>, vector<32x256xf32>
    %c0_11 = arith.constant 0 : index
    %c0_12 = arith.constant 0 : index
    %6 = vector.load %arg8[%c0_11, %c0_12] : memref<32x256xf32, #tpu.memory_space<vmem>>, vector<32x256xf32>
    %c0_13 = arith.constant 0 : index
    %c0_14 = arith.constant 0 : index
    %7 = vector.load %arg9[%c0_13, %c0_14] : memref<1x256xf32, #tpu.memory_space<vmem>>, vector<1x256xf32>
    %c0_15 = arith.constant 0 : index
    %c0_16 = arith.constant 0 : index
    %8 = vector.load %arg10[%c0_15, %c0_16] : memref<32x128xf32, #tpu.memory_space<vmem>>, vector<32x128xf32>
    %c0_17 = arith.constant 0 : index
    %c0_18 = arith.constant 0 : index
    %9 = vector.load %arg11[%c0_17, %c0_18] : memref<32x128xf32, #tpu.memory_space<vmem>>, vector<32x128xf32>
    %c0_19 = arith.constant 0 : index
    %c0_20 = arith.constant 0 : index
    %10 = vector.load %arg0[%c0_19, %c0_20] : memref<64x1xi32, #tpu.memory_space<vmem>>, vector<64x1xi32>
    %11 = tpu.iota {dimensions = array<i32: 1>} : vector<64x128xi32>
    %12 = vector.broadcast %10 : vector<64x1xi32> to vector<64x128xi32>
    %13 = arith.cmpi eq, %12, %11 : vector<64x128xi32>
    %14 = arith.extui %13 : vector<64x128xi1> to vector<64x128xi32>
    %15 = arith.sitofp %14 : vector<64x128xi32> to vector<64x128xf32>
    %c0_21 = arith.constant 0 : index
    %c0_22 = arith.constant 0 : index
    %16 = vector.load %arg2[%c0_21, %c0_22] : memref<128x32xf32, #tpu.memory_space<vmem>>, vector<128x32xf32>
    %cst = arith.constant dense<0.000000e+00> : vector<64x32xf32>
    %17 = tpu.matmul %15, %16, %cst {dimension_numbers = #tpu.dot_dimension_numbers<[1], [0], [0], [1], [0, 0, 1, 1], [], []>} : vector<64x128xf32>, vector<128x32xf32>, vector<64x32xf32> -> vector<64x32xf32>
    %cst_23 = arith.constant 0.000000e+00 : f32
    %18 = vector.broadcast %cst_23 : f32 to vector<64x32xf32>
    %19 = arith.maximumf %17, %18 : vector<64x32xf32>
    %cst_24 = arith.constant dense<0.000000e+00> : vector<64x256xf32>
    %20 = tpu.matmul %19, %1, %cst_24 {dimension_numbers = #tpu.dot_dimension_numbers<[1], [0], [0], [1], [0, 0, 1, 1], [], []>} : vector<64x32xf32>, vector<32x256xf32>, vector<64x256xf32> -> vector<64x256xf32>
    %21 = vector.broadcast %2 : vector<1x256xf32> to vector<64x256xf32>
    %22 = arith.addf %20, %21 : vector<64x256xf32>
    %c0_i32 = arith.constant 0 : i32
    %23 = vector.broadcast %c0_i32 : i32 to vector<8x1xi32>
    %24 = arith.cmpi sgt, %0, %23 : vector<8x1xi32>
    %25 = vector.shape_cast %24 : vector<8x1xi1> to vector<8x1xi1>
    %26 = vector.broadcast %25 : vector<8x1xi1> to vector<8x32xi1>
    %c1_i32 = arith.constant 1 : i32
    %27 = vector.broadcast %c1_i32 : i32 to vector<8x1xi32>
    %28 = arith.cmpi sgt, %0, %27 : vector<8x1xi32>
    %29 = vector.shape_cast %28 : vector<8x1xi1> to vector<8x1xi1>
    %30 = vector.broadcast %29 : vector<8x1xi1> to vector<8x32xi1>
    %c2_i32 = arith.constant 2 : i32
    %31 = vector.broadcast %c2_i32 : i32 to vector<8x1xi32>
    %32 = arith.cmpi sgt, %0, %31 : vector<8x1xi32>
    %33 = vector.shape_cast %32 : vector<8x1xi1> to vector<8x1xi1>
    %34 = vector.broadcast %33 : vector<8x1xi1> to vector<8x32xi1>
    %c3_i32 = arith.constant 3 : i32
    %35 = vector.broadcast %c3_i32 : i32 to vector<8x1xi32>
    %36 = arith.cmpi sgt, %0, %35 : vector<8x1xi32>
    %37 = vector.shape_cast %36 : vector<8x1xi1> to vector<8x1xi1>
    %38 = vector.broadcast %37 : vector<8x1xi1> to vector<8x32xi1>
    %c4_i32 = arith.constant 4 : i32
    %39 = vector.broadcast %c4_i32 : i32 to vector<8x1xi32>
    %40 = arith.cmpi sgt, %0, %39 : vector<8x1xi32>
    %41 = vector.shape_cast %40 : vector<8x1xi1> to vector<8x1xi1>
    %42 = vector.broadcast %41 : vector<8x1xi1> to vector<8x32xi1>
    %c5_i32 = arith.constant 5 : i32
    %43 = vector.broadcast %c5_i32 : i32 to vector<8x1xi32>
    %44 = arith.cmpi sgt, %0, %43 : vector<8x1xi32>
    %45 = vector.shape_cast %44 : vector<8x1xi1> to vector<8x1xi1>
    %46 = vector.broadcast %45 : vector<8x1xi1> to vector<8x32xi1>
    %c6_i32 = arith.constant 6 : i32
    %47 = vector.broadcast %c6_i32 : i32 to vector<8x1xi32>
    %48 = arith.cmpi sgt, %0, %47 : vector<8x1xi32>
    %49 = vector.shape_cast %48 : vector<8x1xi1> to vector<8x1xi1>
    %50 = vector.broadcast %49 : vector<8x1xi1> to vector<8x32xi1>
    %c7_i32 = arith.constant 7 : i32
    %51 = vector.broadcast %c7_i32 : i32 to vector<8x1xi32>
    %52 = arith.cmpi sgt, %0, %51 : vector<8x1xi32>
    %53 = vector.shape_cast %52 : vector<8x1xi1> to vector<8x1xi1>
    %54 = vector.broadcast %53 : vector<8x1xi1> to vector<8x32xi1>
    %55 = tpu.iota {dimensions = array<i32: 1>} : vector<8x128xi32>
    %c64_i32 = arith.constant 64 : i32
    %56 = vector.broadcast %c64_i32 : i32 to vector<8x128xi32>
    %57 = arith.cmpi sge, %55, %56 : vector<8x128xi32>
    %c96_i32 = arith.constant 96 : i32
    %58 = vector.broadcast %c96_i32 : i32 to vector<8x128xi32>
    %59 = arith.cmpi slt, %55, %58 : vector<8x128xi32>
    %60 = arith.andi %57, %59 : vector<8x128xi1>
    %cst_25 = arith.constant 0.000000e+00 : f32
    %61 = vector.broadcast %cst_25 : f32 to vector<8x32xf32>
    %62 = vector.extract_strided_slice %22 {offsets = [0, 0], sizes = [8, 128], strides = [1, 1]} : vector<64x256xf32> to vector<8x128xf32>
    %63 = vector.extract_strided_slice %22 {offsets = [56, 128], sizes = [8, 128], strides = [1, 1]} : vector<64x256xf32> to vector<8x128xf32>
    %cst_26 = arith.constant dense<0.000000e+00> : vector<8x128xf32>
    %64 = tpu.matmul %61, %3, %cst_26 {dimension_numbers = #tpu.dot_dimension_numbers<[1], [0], [0], [1], [0, 0, 1, 1], [], []>} : vector<8x32xf32>, vector<32x128xf32>, vector<8x128xf32> -> vector<8x128xf32>
    %65 = arith.addf %62, %64 : vector<8x128xf32>
    %66 = math.tanh %65 : vector<8x128xf32>
    %67 = arith.negf %65 : vector<8x128xf32>
    %68 = math.exp %67 : vector<8x128xf32>
    %cst_27 = arith.constant 1.000000e+00 : f32
    %69 = vector.broadcast %cst_27 : f32 to vector<8x128xf32>
    %70 = arith.addf %69, %68 : vector<8x128xf32>
    %71 = arith.divf %69, %70 : vector<8x128xf32>
    %72 = arith.select %60, %66, %71 : vector<8x128xi1>, vector<8x128xf32>
    %73 = vector.extract_strided_slice %72 {offsets = [0, 0], sizes = [8, 32], strides = [1, 1]} : vector<8x128xf32> to vector<8x32xf32>
    %74 = vector.extract_strided_slice %72 {offsets = [0, 32], sizes = [8, 32], strides = [1, 1]} : vector<8x128xf32> to vector<8x32xf32>
    %75 = vector.extract_strided_slice %72 {offsets = [0, 64], sizes = [8, 32], strides = [1, 1]} : vector<8x128xf32> to vector<8x32xf32>
    %76 = vector.extract_strided_slice %72 {offsets = [0, 96], sizes = [8, 32], strides = [1, 1]} : vector<8x128xf32> to vector<8x32xf32>
    %77 = arith.mulf %74, %61 : vector<8x32xf32>
    %78 = arith.mulf %73, %75 : vector<8x32xf32>
    %79 = arith.addf %77, %78 : vector<8x32xf32>
    %80 = math.tanh %79 : vector<8x32xf32>
    %81 = arith.mulf %76, %80 : vector<8x32xf32>
    %cst_28 = arith.constant dense<0.000000e+00> : vector<8x128xf32>
    %82 = tpu.matmul %61, %4, %cst_28 {dimension_numbers = #tpu.dot_dimension_numbers<[1], [0], [0], [1], [0, 0, 1, 1], [], []>} : vector<8x32xf32>, vector<32x128xf32>, vector<8x128xf32> -> vector<8x128xf32>
    %83 = arith.addf %63, %82 : vector<8x128xf32>
    %84 = math.tanh %83 : vector<8x128xf32>
    %85 = arith.negf %83 : vector<8x128xf32>
    %86 = math.exp %85 : vector<8x128xf32>
    %cst_29 = arith.constant 1.000000e+00 : f32
    %87 = vector.broadcast %cst_29 : f32 to vector<8x128xf32>
    %88 = arith.addf %87, %86 : vector<8x128xf32>
    %89 = arith.divf %87, %88 : vector<8x128xf32>
    %90 = arith.select %60, %84, %89 : vector<8x128xi1>, vector<8x128xf32>
    %91 = vector.extract_strided_slice %90 {offsets = [0, 0], sizes = [8, 32], strides = [1, 1]} : vector<8x128xf32> to vector<8x32xf32>
    %92 = vector.extract_strided_slice %90 {offsets = [0, 32], sizes = [8, 32], strides = [1, 1]} : vector<8x128xf32> to vector<8x32xf32>
    %93 = vector.extract_strided_slice %90 {offsets = [0, 64], sizes = [8, 32], strides = [1, 1]} : vector<8x128xf32> to vector<8x32xf32>
    %94 = vector.extract_strided_slice %90 {offsets = [0, 96], sizes = [8, 32], strides = [1, 1]} : vector<8x128xf32> to vector<8x32xf32>
    %95 = arith.mulf %92, %61 : vector<8x32xf32>
    %96 = arith.mulf %91, %93 : vector<8x32xf32>
    %97 = arith.addf %95, %96 : vector<8x32xf32>
    %98 = math.tanh %97 : vector<8x32xf32>
    %99 = arith.mulf %94, %98 : vector<8x32xf32>
    %100 = arith.select %26, %81, %61 : vector<8x32xi1>, vector<8x32xf32>
    %101 = arith.select %26, %79, %61 : vector<8x32xi1>, vector<8x32xf32>
    %102 = arith.select %54, %99, %61 : vector<8x32xi1>, vector<8x32xf32>
    %103 = arith.select %54, %97, %61 : vector<8x32xi1>, vector<8x32xf32>
    %c0_30 = arith.constant 0 : index
    %c0_31 = arith.constant 0 : index
    %104 = vector.load %arg13[%c0_30, %c0_31] : memref<64x32xf32, #tpu.memory_space<vmem>>, vector<8x32xf32>
    tpu.vector_store %arg13[%c0_30, %c0_31], %100 {strides = array<i32>} : memref<64x32xf32, #tpu.memory_space<vmem>>, vector<8x32xf32>,
    %c56 = arith.constant 56 : index
    %c0_32 = arith.constant 0 : index
    %105 = vector.load %arg14[%c56, %c0_32] : memref<64x32xf32, #tpu.memory_space<vmem>>, vector<8x32xf32>
    tpu.vector_store %arg14[%c56, %c0_32], %102 {strides = array<i32>} : memref<64x32xf32, #tpu.memory_space<vmem>>, vector<8x32xf32>,
    %106 = vector.extract_strided_slice %22 {offsets = [8, 0], sizes = [8, 128], strides = [1, 1]} : vector<64x256xf32> to vector<8x128xf32>
    %107 = vector.extract_strided_slice %22 {offsets = [48, 128], sizes = [8, 128], strides = [1, 1]} : vector<64x256xf32> to vector<8x128xf32>
    %cst_33 = arith.constant dense<0.000000e+00> : vector<8x128xf32>
    %108 = tpu.matmul %100, %3, %cst_33 {dimension_numbers = #tpu.dot_dimension_numbers<[1], [0], [0], [1], [0, 0, 1, 1], [], []>} : vector<8x32xf32>, vector<32x128xf32>, vector<8x128xf32> -> vector<8x128xf32>
    %109 = arith.addf %106, %108 : vector<8x128xf32>
    %110 = math.tanh %109 : vector<8x128xf32>
    %111 = arith.negf %109 : vector<8x128xf32>
    %112 = math.exp %111 : vector<8x128xf32>
    %cst_34 = arith.constant 1.000000e+00 : f32
    %113 = vector.broadcast %cst_34 : f32 to vector<8x128xf32>
    %114 = arith.addf %113, %112 : vector<8x128xf32>
    %115 = arith.divf %113, %114 : vector<8x128xf32>
    %116 = arith.select %60, %110, %115 : vector<8x128xi1>, vector<8x128xf32>
    %117 = vector.extract_strided_slice %116 {offsets = [0, 0], sizes = [8, 32], strides = [1, 1]} : vector<8x128xf32> to vector<8x32xf32>
    %118 = vector.extract_strided_slice %116 {offsets = [0, 32], sizes = [8, 32], strides = [1, 1]} : vector<8x128xf32> to vector<8x32xf32>
    %119 = vector.extract_strided_slice %116 {offsets = [0, 64], sizes = [8, 32], strides = [1, 1]} : vector<8x128xf32> to vector<8x32xf32>
    %120 = vector.extract_strided_slice %116 {offsets = [0, 96], sizes = [8, 32], strides = [1, 1]} : vector<8x128xf32> to vector<8x32xf32>
    %121 = arith.mulf %118, %101 : vector<8x32xf32>
    %122 = arith.mulf %117, %119 : vector<8x32xf32>
    %123 = arith.addf %121, %122 : vector<8x32xf32>
    %124 = math.tanh %123 : vector<8x32xf32>
    %125 = arith.mulf %120, %124 : vector<8x32xf32>
    %cst_35 = arith.constant dense<0.000000e+00> : vector<8x128xf32>
    %126 = tpu.matmul %102, %4, %cst_35 {dimension_numbers = #tpu.dot_dimension_numbers<[1], [0], [0], [1], [0, 0, 1, 1], [], []>} : vector<8x32xf32>, vector<32x128xf32>, vector<8x128xf32> -> vector<8x128xf32>
    %127 = arith.addf %107, %126 : vector<8x128xf32>
    %128 = math.tanh %127 : vector<8x128xf32>
    %129 = arith.negf %127 : vector<8x128xf32>
    %130 = math.exp %129 : vector<8x128xf32>
    %cst_36 = arith.constant 1.000000e+00 : f32
    %131 = vector.broadcast %cst_36 : f32 to vector<8x128xf32>
    %132 = arith.addf %131, %130 : vector<8x128xf32>
    %133 = arith.divf %131, %132 : vector<8x128xf32>
    %134 = arith.select %60, %128, %133 : vector<8x128xi1>, vector<8x128xf32>
    %135 = vector.extract_strided_slice %134 {offsets = [0, 0], sizes = [8, 32], strides = [1, 1]} : vector<8x128xf32> to vector<8x32xf32>
    %136 = vector.extract_strided_slice %134 {offsets = [0, 32], sizes = [8, 32], strides = [1, 1]} : vector<8x128xf32> to vector<8x32xf32>
    %137 = vector.extract_strided_slice %134 {offsets = [0, 64], sizes = [8, 32], strides = [1, 1]} : vector<8x128xf32> to vector<8x32xf32>
    %138 = vector.extract_strided_slice %134 {offsets = [0, 96], sizes = [8, 32], strides = [1, 1]} : vector<8x128xf32> to vector<8x32xf32>
    %139 = arith.mulf %136, %103 : vector<8x32xf32>
    %140 = arith.mulf %135, %137 : vector<8x32xf32>
    %141 = arith.addf %139, %140 : vector<8x32xf32>
    %142 = math.tanh %141 : vector<8x32xf32>
    %143 = arith.mulf %138, %142 : vector<8x32xf32>
    %144 = arith.select %30, %125, %100 : vector<8x32xi1>, vector<8x32xf32>
    %145 = arith.select %30, %123, %101 : vector<8x32xi1>, vector<8x32xf32>
    %146 = arith.select %50, %143, %102 : vector<8x32xi1>, vector<8x32xf32>
    %147 = arith.select %50, %141, %103 : vector<8x32xi1>, vector<8x32xf32>
    %c8 = arith.constant 8 : index
    %c0_37 = arith.constant 0 : index
    %148 = vector.load %arg13[%c8, %c0_37] : memref<64x32xf32, #tpu.memory_space<vmem>>, vector<8x32xf32>
    tpu.vector_store %arg13[%c8, %c0_37], %144 {strides = array<i32>} : memref<64x32xf32, #tpu.memory_space<vmem>>, vector<8x32xf32>,
    %c48 = arith.constant 48 : index
    %c0_38 = arith.constant 0 : index
    %149 = vector.load %arg14[%c48, %c0_38] : memref<64x32xf32, #tpu.memory_space<vmem>>, vector<8x32xf32>
    tpu.vector_store %arg14[%c48, %c0_38], %146 {strides = array<i32>} : memref<64x32xf32, #tpu.memory_space<vmem>>, vector<8x32xf32>,
    %150 = vector.extract_strided_slice %22 {offsets = [16, 0], sizes = [8, 128], strides = [1, 1]} : vector<64x256xf32> to vector<8x128xf32>
    %151 = vector.extract_strided_slice %22 {offsets = [40, 128], sizes = [8, 128], strides = [1, 1]} : vector<64x256xf32> to vector<8x128xf32>
    %cst_39 = arith.constant dense<0.000000e+00> : vector<8x128xf32>
    %152 = tpu.matmul %144, %3, %cst_39 {dimension_numbers = #tpu.dot_dimension_numbers<[1], [0], [0], [1], [0, 0, 1, 1], [], []>} : vector<8x32xf32>, vector<32x128xf32>, vector<8x128xf32> -> vector<8x128xf32>
    %153 = arith.addf %150, %152 : vector<8x128xf32>
    %154 = math.tanh %153 : vector<8x128xf32>
    %155 = arith.negf %153 : vector<8x128xf32>
    %156 = math.exp %155 : vector<8x128xf32>
    %cst_40 = arith.constant 1.000000e+00 : f32
    %157 = vector.broadcast %cst_40 : f32 to vector<8x128xf32>
    %158 = arith.addf %157, %156 : vector<8x128xf32>
    %159 = arith.divf %157, %158 : vector<8x128xf32>
    %160 = arith.select %60, %154, %159 : vector<8x128xi1>, vector<8x128xf32>
    %161 = vector.extract_strided_slice %160 {offsets = [0, 0], sizes = [8, 32], strides = [1, 1]} : vector<8x128xf32> to vector<8x32xf32>
    %162 = vector.extract_strided_slice %160 {offsets = [0, 32], sizes = [8, 32], strides = [1, 1]} : vector<8x128xf32> to vector<8x32xf32>
    %163 = vector.extract_strided_slice %160 {offsets = [0, 64], sizes = [8, 32], strides = [1, 1]} : vector<8x128xf32> to vector<8x32xf32>
    %164 = vector.extract_strided_slice %160 {offsets = [0, 96], sizes = [8, 32], strides = [1, 1]} : vector<8x128xf32> to vector<8x32xf32>
    %165 = arith.mulf %162, %145 : vector<8x32xf32>
    %166 = arith.mulf %161, %163 : vector<8x32xf32>
    %167 = arith.addf %165, %166 : vector<8x32xf32>
    %168 = math.tanh %167 : vector<8x32xf32>
    %169 = arith.mulf %164, %168 : vector<8x32xf32>
    %cst_41 = arith.constant dense<0.000000e+00> : vector<8x128xf32>
    %170 = tpu.matmul %146, %4, %cst_41 {dimension_numbers = #tpu.dot_dimension_numbers<[1], [0], [0], [1], [0, 0, 1, 1], [], []>} : vector<8x32xf32>, vector<32x128xf32>, vector<8x128xf32> -> vector<8x128xf32>
    %171 = arith.addf %151, %170 : vector<8x128xf32>
    %172 = math.tanh %171 : vector<8x128xf32>
    %173 = arith.negf %171 : vector<8x128xf32>
    %174 = math.exp %173 : vector<8x128xf32>
    %cst_42 = arith.constant 1.000000e+00 : f32
    %175 = vector.broadcast %cst_42 : f32 to vector<8x128xf32>
    %176 = arith.addf %175, %174 : vector<8x128xf32>
    %177 = arith.divf %175, %176 : vector<8x128xf32>
    %178 = arith.select %60, %172, %177 : vector<8x128xi1>, vector<8x128xf32>
    %179 = vector.extract_strided_slice %178 {offsets = [0, 0], sizes = [8, 32], strides = [1, 1]} : vector<8x128xf32> to vector<8x32xf32>
    %180 = vector.extract_strided_slice %178 {offsets = [0, 32], sizes = [8, 32], strides = [1, 1]} : vector<8x128xf32> to vector<8x32xf32>
    %181 = vector.extract_strided_slice %178 {offsets = [0, 64], sizes = [8, 32], strides = [1, 1]} : vector<8x128xf32> to vector<8x32xf32>
    %182 = vector.extract_strided_slice %178 {offsets = [0, 96], sizes = [8, 32], strides = [1, 1]} : vector<8x128xf32> to vector<8x32xf32>
    %183 = arith.mulf %180, %147 : vector<8x32xf32>
    %184 = arith.mulf %179, %181 : vector<8x32xf32>
    %185 = arith.addf %183, %184 : vector<8x32xf32>
    %186 = math.tanh %185 : vector<8x32xf32>
    %187 = arith.mulf %182, %186 : vector<8x32xf32>
    %188 = arith.select %34, %169, %144 : vector<8x32xi1>, vector<8x32xf32>
    %189 = arith.select %34, %167, %145 : vector<8x32xi1>, vector<8x32xf32>
    %190 = arith.select %46, %187, %146 : vector<8x32xi1>, vector<8x32xf32>
    %191 = arith.select %46, %185, %147 : vector<8x32xi1>, vector<8x32xf32>
    %c16 = arith.constant 16 : index
    %c0_43 = arith.constant 0 : index
    %192 = vector.load %arg13[%c16, %c0_43] : memref<64x32xf32, #tpu.memory_space<vmem>>, vector<8x32xf32>
    tpu.vector_store %arg13[%c16, %c0_43], %188 {strides = array<i32>} : memref<64x32xf32, #tpu.memory_space<vmem>>, vector<8x32xf32>,
    %c40 = arith.constant 40 : index
    %c0_44 = arith.constant 0 : index
    %193 = vector.load %arg14[%c40, %c0_44] : memref<64x32xf32, #tpu.memory_space<vmem>>, vector<8x32xf32>
    tpu.vector_store %arg14[%c40, %c0_44], %190 {strides = array<i32>} : memref<64x32xf32, #tpu.memory_space<vmem>>, vector<8x32xf32>,
    %194 = vector.extract_strided_slice %22 {offsets = [24, 0], sizes = [8, 128], strides = [1, 1]} : vector<64x256xf32> to vector<8x128xf32>
    %195 = vector.extract_strided_slice %22 {offsets = [32, 128], sizes = [8, 128], strides = [1, 1]} : vector<64x256xf32> to vector<8x128xf32>
    %cst_45 = arith.constant dense<0.000000e+00> : vector<8x128xf32>
    %196 = tpu.matmul %188, %3, %cst_45 {dimension_numbers = #tpu.dot_dimension_numbers<[1], [0], [0], [1], [0, 0, 1, 1], [], []>} : vector<8x32xf32>, vector<32x128xf32>, vector<8x128xf32> -> vector<8x128xf32>
    %197 = arith.addf %194, %196 : vector<8x128xf32>
    %198 = math.tanh %197 : vector<8x128xf32>
    %199 = arith.negf %197 : vector<8x128xf32>
    %200 = math.exp %199 : vector<8x128xf32>
    %cst_46 = arith.constant 1.000000e+00 : f32
    %201 = vector.broadcast %cst_46 : f32 to vector<8x128xf32>
    %202 = arith.addf %201, %200 : vector<8x128xf32>
    %203 = arith.divf %201, %202 : vector<8x128xf32>
    %204 = arith.select %60, %198, %203 : vector<8x128xi1>, vector<8x128xf32>
    %205 = vector.extract_strided_slice %204 {offsets = [0, 0], sizes = [8, 32], strides = [1, 1]} : vector<8x128xf32> to vector<8x32xf32>
    %206 = vector.extract_strided_slice %204 {offsets = [0, 32], sizes = [8, 32], strides = [1, 1]} : vector<8x128xf32> to vector<8x32xf32>
    %207 = vector.extract_strided_slice %204 {offsets = [0, 64], sizes = [8, 32], strides = [1, 1]} : vector<8x128xf32> to vector<8x32xf32>
    %208 = vector.extract_strided_slice %204 {offsets = [0, 96], sizes = [8, 32], strides = [1, 1]} : vector<8x128xf32> to vector<8x32xf32>
    %209 = arith.mulf %206, %189 : vector<8x32xf32>
    %210 = arith.mulf %205, %207 : vector<8x32xf32>
    %211 = arith.addf %209, %210 : vector<8x32xf32>
    %212 = math.tanh %211 : vector<8x32xf32>
    %213 = arith.mulf %208, %212 : vector<8x32xf32>
    %cst_47 = arith.constant dense<0.000000e+00> : vector<8x128xf32>
    %214 = tpu.matmul %190, %4, %cst_47 {dimension_numbers = #tpu.dot_dimension_numbers<[1], [0], [0], [1], [0, 0, 1, 1], [], []>} : vector<8x32xf32>, vector<32x128xf32>, vector<8x128xf32> -> vector<8x128xf32>
    %215 = arith.addf %195, %214 : vector<8x128xf32>
    %216 = math.tanh %215 : vector<8x128xf32>
    %217 = arith.negf %215 : vector<8x128xf32>
    %218 = math.exp %217 : vector<8x128xf32>
    %cst_48 = arith.constant 1.000000e+00 : f32
    %219 = vector.broadcast %cst_48 : f32 to vector<8x128xf32>
    %220 = arith.addf %219, %218 : vector<8x128xf32>
    %221 = arith.divf %219, %220 : vector<8x128xf32>
    %222 = arith.select %60, %216, %221 : vector<8x128xi1>, vector<8x128xf32>
    %223 = vector.extract_strided_slice %222 {offsets = [0, 0], sizes = [8, 32], strides = [1, 1]} : vector<8x128xf32> to vector<8x32xf32>
    %224 = vector.extract_strided_slice %222 {offsets = [0, 32], sizes = [8, 32], strides = [1, 1]} : vector<8x128xf32> to vector<8x32xf32>
    %225 = vector.extract_strided_slice %222 {offsets = [0, 64], sizes = [8, 32], strides = [1, 1]} : vector<8x128xf32> to vector<8x32xf32>
    %226 = vector.extract_strided_slice %222 {offsets = [0, 96], sizes = [8, 32], strides = [1, 1]} : vector<8x128xf32> to vector<8x32xf32>
    %227 = arith.mulf %224, %191 : vector<8x32xf32>
    %228 = arith.mulf %223, %225 : vector<8x32xf32>
    %229 = arith.addf %227, %228 : vector<8x32xf32>
    %230 = math.tanh %229 : vector<8x32xf32>
    %231 = arith.mulf %226, %230 : vector<8x32xf32>
    %232 = arith.select %38, %213, %188 : vector<8x32xi1>, vector<8x32xf32>
    %233 = arith.select %38, %211, %189 : vector<8x32xi1>, vector<8x32xf32>
    %234 = arith.select %42, %231, %190 : vector<8x32xi1>, vector<8x32xf32>
    %235 = arith.select %42, %229, %191 : vector<8x32xi1>, vector<8x32xf32>
    %c24 = arith.constant 24 : index
    %c0_49 = arith.constant 0 : index
    %236 = vector.load %arg13[%c24, %c0_49] : memref<64x32xf32, #tpu.memory_space<vmem>>, vector<8x32xf32>
    tpu.vector_store %arg13[%c24, %c0_49], %232 {strides = array<i32>} : memref<64x32xf32, #tpu.memory_space<vmem>>, vector<8x32xf32>,
    %c32 = arith.constant 32 : index
    %c0_50 = arith.constant 0 : index
    %237 = vector.load %arg14[%c32, %c0_50] : memref<64x32xf32, #tpu.memory_space<vmem>>, vector<8x32xf32>
    tpu.vector_store %arg14[%c32, %c0_50], %234 {strides = array<i32>} : memref<64x32xf32, #tpu.memory_space<vmem>>, vector<8x32xf32>,
    %238 = vector.extract_strided_slice %22 {offsets = [32, 0], sizes = [8, 128], strides = [1, 1]} : vector<64x256xf32> to vector<8x128xf32>
    %239 = vector.extract_strided_slice %22 {offsets = [24, 128], sizes = [8, 128], strides = [1, 1]} : vector<64x256xf32> to vector<8x128xf32>
    %cst_51 = arith.constant dense<0.000000e+00> : vector<8x128xf32>
    %240 = tpu.matmul %232, %3, %cst_51 {dimension_numbers = #tpu.dot_dimension_numbers<[1], [0], [0], [1], [0, 0, 1, 1], [], []>} : vector<8x32xf32>, vector<32x128xf32>, vector<8x128xf32> -> vector<8x128xf32>
    %241 = arith.addf %238, %240 : vector<8x128xf32>
    %242 = math.tanh %241 : vector<8x128xf32>
    %243 = arith.negf %241 : vector<8x128xf32>
    %244 = math.exp %243 : vector<8x128xf32>
    %cst_52 = arith.constant 1.000000e+00 : f32
    %245 = vector.broadcast %cst_52 : f32 to vector<8x128xf32>
    %246 = arith.addf %245, %244 : vector<8x128xf32>
    %247 = arith.divf %245, %246 : vector<8x128xf32>
    %248 = arith.select %60, %242, %247 : vector<8x128xi1>, vector<8x128xf32>
    %249 = vector.extract_strided_slice %248 {offsets = [0, 0], sizes = [8, 32], strides = [1, 1]} : vector<8x128xf32> to vector<8x32xf32>
    %250 = vector.extract_strided_slice %248 {offsets = [0, 32], sizes = [8, 32], strides = [1, 1]} : vector<8x128xf32> to vector<8x32xf32>
    %251 = vector.extract_strided_slice %248 {offsets = [0, 64], sizes = [8, 32], strides = [1, 1]} : vector<8x128xf32> to vector<8x32xf32>
    %252 = vector.extract_strided_slice %248 {offsets = [0, 96], sizes = [8, 32], strides = [1, 1]} : vector<8x128xf32> to vector<8x32xf32>
    %253 = arith.mulf %250, %233 : vector<8x32xf32>
    %254 = arith.mulf %249, %251 : vector<8x32xf32>
    %255 = arith.addf %253, %254 : vector<8x32xf32>
    %256 = math.tanh %255 : vector<8x32xf32>
    %257 = arith.mulf %252, %256 : vector<8x32xf32>
    %cst_53 = arith.constant dense<0.000000e+00> : vector<8x128xf32>
    %258 = tpu.matmul %234, %4, %cst_53 {dimension_numbers = #tpu.dot_dimension_numbers<[1], [0], [0], [1], [0, 0, 1, 1], [], []>} : vector<8x32xf32>, vector<32x128xf32>, vector<8x128xf32> -> vector<8x128xf32>
    %259 = arith.addf %239, %258 : vector<8x128xf32>
    %260 = math.tanh %259 : vector<8x128xf32>
    %261 = arith.negf %259 : vector<8x128xf32>
    %262 = math.exp %261 : vector<8x128xf32>
    %cst_54 = arith.constant 1.000000e+00 : f32
    %263 = vector.broadcast %cst_54 : f32 to vector<8x128xf32>
    %264 = arith.addf %263, %262 : vector<8x128xf32>
    %265 = arith.divf %263, %264 : vector<8x128xf32>
    %266 = arith.select %60, %260, %265 : vector<8x128xi1>, vector<8x128xf32>
    %267 = vector.extract_strided_slice %266 {offsets = [0, 0], sizes = [8, 32], strides = [1, 1]} : vector<8x128xf32> to vector<8x32xf32>
    %268 = vector.extract_strided_slice %266 {offsets = [0, 32], sizes = [8, 32], strides = [1, 1]} : vector<8x128xf32> to vector<8x32xf32>
    %269 = vector.extract_strided_slice %266 {offsets = [0, 64], sizes = [8, 32], strides = [1, 1]} : vector<8x128xf32> to vector<8x32xf32>
    %270 = vector.extract_strided_slice %266 {offsets = [0, 96], sizes = [8, 32], strides = [1, 1]} : vector<8x128xf32> to vector<8x32xf32>
    %271 = arith.mulf %268, %235 : vector<8x32xf32>
    %272 = arith.mulf %267, %269 : vector<8x32xf32>
    %273 = arith.addf %271, %272 : vector<8x32xf32>
    %274 = math.tanh %273 : vector<8x32xf32>
    %275 = arith.mulf %270, %274 : vector<8x32xf32>
    %276 = arith.select %42, %257, %232 : vector<8x32xi1>, vector<8x32xf32>
    %277 = arith.select %42, %255, %233 : vector<8x32xi1>, vector<8x32xf32>
    %278 = arith.select %38, %275, %234 : vector<8x32xi1>, vector<8x32xf32>
    %279 = arith.select %38, %273, %235 : vector<8x32xi1>, vector<8x32xf32>
    %c32_55 = arith.constant 32 : index
    %c0_56 = arith.constant 0 : index
    %280 = vector.load %arg13[%c32_55, %c0_56] : memref<64x32xf32, #tpu.memory_space<vmem>>, vector<8x32xf32>
    tpu.vector_store %arg13[%c32_55, %c0_56], %276 {strides = array<i32>} : memref<64x32xf32, #tpu.memory_space<vmem>>, vector<8x32xf32>,
    %c24_57 = arith.constant 24 : index
    %c0_58 = arith.constant 0 : index
    %281 = vector.load %arg14[%c24_57, %c0_58] : memref<64x32xf32, #tpu.memory_space<vmem>>, vector<8x32xf32>
    tpu.vector_store %arg14[%c24_57, %c0_58], %278 {strides = array<i32>} : memref<64x32xf32, #tpu.memory_space<vmem>>, vector<8x32xf32>,
    %282 = vector.extract_strided_slice %22 {offsets = [40, 0], sizes = [8, 128], strides = [1, 1]} : vector<64x256xf32> to vector<8x128xf32>
    %283 = vector.extract_strided_slice %22 {offsets = [16, 128], sizes = [8, 128], strides = [1, 1]} : vector<64x256xf32> to vector<8x128xf32>
    %cst_59 = arith.constant dense<0.000000e+00> : vector<8x128xf32>
    %284 = tpu.matmul %276, %3, %cst_59 {dimension_numbers = #tpu.dot_dimension_numbers<[1], [0], [0], [1], [0, 0, 1, 1], [], []>} : vector<8x32xf32>, vector<32x128xf32>, vector<8x128xf32> -> vector<8x128xf32>
    %285 = arith.addf %282, %284 : vector<8x128xf32>
    %286 = math.tanh %285 : vector<8x128xf32>
    %287 = arith.negf %285 : vector<8x128xf32>
    %288 = math.exp %287 : vector<8x128xf32>
    %cst_60 = arith.constant 1.000000e+00 : f32
    %289 = vector.broadcast %cst_60 : f32 to vector<8x128xf32>
    %290 = arith.addf %289, %288 : vector<8x128xf32>
    %291 = arith.divf %289, %290 : vector<8x128xf32>
    %292 = arith.select %60, %286, %291 : vector<8x128xi1>, vector<8x128xf32>
    %293 = vector.extract_strided_slice %292 {offsets = [0, 0], sizes = [8, 32], strides = [1, 1]} : vector<8x128xf32> to vector<8x32xf32>
    %294 = vector.extract_strided_slice %292 {offsets = [0, 32], sizes = [8, 32], strides = [1, 1]} : vector<8x128xf32> to vector<8x32xf32>
    %295 = vector.extract_strided_slice %292 {offsets = [0, 64], sizes = [8, 32], strides = [1, 1]} : vector<8x128xf32> to vector<8x32xf32>
    %296 = vector.extract_strided_slice %292 {offsets = [0, 96], sizes = [8, 32], strides = [1, 1]} : vector<8x128xf32> to vector<8x32xf32>
    %297 = arith.mulf %294, %277 : vector<8x32xf32>
    %298 = arith.mulf %293, %295 : vector<8x32xf32>
    %299 = arith.addf %297, %298 : vector<8x32xf32>
    %300 = math.tanh %299 : vector<8x32xf32>
    %301 = arith.mulf %296, %300 : vector<8x32xf32>
    %cst_61 = arith.constant dense<0.000000e+00> : vector<8x128xf32>
    %302 = tpu.matmul %278, %4, %cst_61 {dimension_numbers = #tpu.dot_dimension_numbers<[1], [0], [0], [1], [0, 0, 1, 1], [], []>} : vector<8x32xf32>, vector<32x128xf32>, vector<8x128xf32> -> vector<8x128xf32>
    %303 = arith.addf %283, %302 : vector<8x128xf32>
    %304 = math.tanh %303 : vector<8x128xf32>
    %305 = arith.negf %303 : vector<8x128xf32>
    %306 = math.exp %305 : vector<8x128xf32>
    %cst_62 = arith.constant 1.000000e+00 : f32
    %307 = vector.broadcast %cst_62 : f32 to vector<8x128xf32>
    %308 = arith.addf %307, %306 : vector<8x128xf32>
    %309 = arith.divf %307, %308 : vector<8x128xf32>
    %310 = arith.select %60, %304, %309 : vector<8x128xi1>, vector<8x128xf32>
    %311 = vector.extract_strided_slice %310 {offsets = [0, 0], sizes = [8, 32], strides = [1, 1]} : vector<8x128xf32> to vector<8x32xf32>
    %312 = vector.extract_strided_slice %310 {offsets = [0, 32], sizes = [8, 32], strides = [1, 1]} : vector<8x128xf32> to vector<8x32xf32>
    %313 = vector.extract_strided_slice %310 {offsets = [0, 64], sizes = [8, 32], strides = [1, 1]} : vector<8x128xf32> to vector<8x32xf32>
    %314 = vector.extract_strided_slice %310 {offsets = [0, 96], sizes = [8, 32], strides = [1, 1]} : vector<8x128xf32> to vector<8x32xf32>
    %315 = arith.mulf %312, %279 : vector<8x32xf32>
    %316 = arith.mulf %311, %313 : vector<8x32xf32>
    %317 = arith.addf %315, %316 : vector<8x32xf32>
    %318 = math.tanh %317 : vector<8x32xf32>
    %319 = arith.mulf %314, %318 : vector<8x32xf32>
    %320 = arith.select %46, %301, %276 : vector<8x32xi1>, vector<8x32xf32>
    %321 = arith.select %46, %299, %277 : vector<8x32xi1>, vector<8x32xf32>
    %322 = arith.select %34, %319, %278 : vector<8x32xi1>, vector<8x32xf32>
    %323 = arith.select %34, %317, %279 : vector<8x32xi1>, vector<8x32xf32>
    %c40_63 = arith.constant 40 : index
    %c0_64 = arith.constant 0 : index
    %324 = vector.load %arg13[%c40_63, %c0_64] : memref<64x32xf32, #tpu.memory_space<vmem>>, vector<8x32xf32>
    tpu.vector_store %arg13[%c40_63, %c0_64], %320 {strides = array<i32>} : memref<64x32xf32, #tpu.memory_space<vmem>>, vector<8x32xf32>,
    %c16_65 = arith.constant 16 : index
    %c0_66 = arith.constant 0 : index
    %325 = vector.load %arg14[%c16_65, %c0_66] : memref<64x32xf32, #tpu.memory_space<vmem>>, vector<8x32xf32>
    tpu.vector_store %arg14[%c16_65, %c0_66], %322 {strides = array<i32>} : memref<64x32xf32, #tpu.memory_space<vmem>>, vector<8x32xf32>,
    %326 = vector.extract_strided_slice %22 {offsets = [48, 0], sizes = [8, 128], strides = [1, 1]} : vector<64x256xf32> to vector<8x128xf32>
    %327 = vector.extract_strided_slice %22 {offsets = [8, 128], sizes = [8, 128], strides = [1, 1]} : vector<64x256xf32> to vector<8x128xf32>
    %cst_67 = arith.constant dense<0.000000e+00> : vector<8x128xf32>
    %328 = tpu.matmul %320, %3, %cst_67 {dimension_numbers = #tpu.dot_dimension_numbers<[1], [0], [0], [1], [0, 0, 1, 1], [], []>} : vector<8x32xf32>, vector<32x128xf32>, vector<8x128xf32> -> vector<8x128xf32>
    %329 = arith.addf %326, %328 : vector<8x128xf32>
    %330 = math.tanh %329 : vector<8x128xf32>
    %331 = arith.negf %329 : vector<8x128xf32>
    %332 = math.exp %331 : vector<8x128xf32>
    %cst_68 = arith.constant 1.000000e+00 : f32
    %333 = vector.broadcast %cst_68 : f32 to vector<8x128xf32>
    %334 = arith.addf %333, %332 : vector<8x128xf32>
    %335 = arith.divf %333, %334 : vector<8x128xf32>
    %336 = arith.select %60, %330, %335 : vector<8x128xi1>, vector<8x128xf32>
    %337 = vector.extract_strided_slice %336 {offsets = [0, 0], sizes = [8, 32], strides = [1, 1]} : vector<8x128xf32> to vector<8x32xf32>
    %338 = vector.extract_strided_slice %336 {offsets = [0, 32], sizes = [8, 32], strides = [1, 1]} : vector<8x128xf32> to vector<8x32xf32>
    %339 = vector.extract_strided_slice %336 {offsets = [0, 64], sizes = [8, 32], strides = [1, 1]} : vector<8x128xf32> to vector<8x32xf32>
    %340 = vector.extract_strided_slice %336 {offsets = [0, 96], sizes = [8, 32], strides = [1, 1]} : vector<8x128xf32> to vector<8x32xf32>
    %341 = arith.mulf %338, %321 : vector<8x32xf32>
    %342 = arith.mulf %337, %339 : vector<8x32xf32>
    %343 = arith.addf %341, %342 : vector<8x32xf32>
    %344 = math.tanh %343 : vector<8x32xf32>
    %345 = arith.mulf %340, %344 : vector<8x32xf32>
    %cst_69 = arith.constant dense<0.000000e+00> : vector<8x128xf32>
    %346 = tpu.matmul %322, %4, %cst_69 {dimension_numbers = #tpu.dot_dimension_numbers<[1], [0], [0], [1], [0, 0, 1, 1], [], []>} : vector<8x32xf32>, vector<32x128xf32>, vector<8x128xf32> -> vector<8x128xf32>
    %347 = arith.addf %327, %346 : vector<8x128xf32>
    %348 = math.tanh %347 : vector<8x128xf32>
    %349 = arith.negf %347 : vector<8x128xf32>
    %350 = math.exp %349 : vector<8x128xf32>
    %cst_70 = arith.constant 1.000000e+00 : f32
    %351 = vector.broadcast %cst_70 : f32 to vector<8x128xf32>
    %352 = arith.addf %351, %350 : vector<8x128xf32>
    %353 = arith.divf %351, %352 : vector<8x128xf32>
    %354 = arith.select %60, %348, %353 : vector<8x128xi1>, vector<8x128xf32>
    %355 = vector.extract_strided_slice %354 {offsets = [0, 0], sizes = [8, 32], strides = [1, 1]} : vector<8x128xf32> to vector<8x32xf32>
    %356 = vector.extract_strided_slice %354 {offsets = [0, 32], sizes = [8, 32], strides = [1, 1]} : vector<8x128xf32> to vector<8x32xf32>
    %357 = vector.extract_strided_slice %354 {offsets = [0, 64], sizes = [8, 32], strides = [1, 1]} : vector<8x128xf32> to vector<8x32xf32>
    %358 = vector.extract_strided_slice %354 {offsets = [0, 96], sizes = [8, 32], strides = [1, 1]} : vector<8x128xf32> to vector<8x32xf32>
    %359 = arith.mulf %356, %323 : vector<8x32xf32>
    %360 = arith.mulf %355, %357 : vector<8x32xf32>
    %361 = arith.addf %359, %360 : vector<8x32xf32>
    %362 = math.tanh %361 : vector<8x32xf32>
    %363 = arith.mulf %358, %362 : vector<8x32xf32>
    %364 = arith.select %50, %345, %320 : vector<8x32xi1>, vector<8x32xf32>
    %365 = arith.select %50, %343, %321 : vector<8x32xi1>, vector<8x32xf32>
    %366 = arith.select %30, %363, %322 : vector<8x32xi1>, vector<8x32xf32>
    %367 = arith.select %30, %361, %323 : vector<8x32xi1>, vector<8x32xf32>
    %c48_71 = arith.constant 48 : index
    %c0_72 = arith.constant 0 : index
    %368 = vector.load %arg13[%c48_71, %c0_72] : memref<64x32xf32, #tpu.memory_space<vmem>>, vector<8x32xf32>
    tpu.vector_store %arg13[%c48_71, %c0_72], %364 {strides = array<i32>} : memref<64x32xf32, #tpu.memory_space<vmem>>, vector<8x32xf32>,
    %c8_73 = arith.constant 8 : index
    %c0_74 = arith.constant 0 : index
    %369 = vector.load %arg14[%c8_73, %c0_74] : memref<64x32xf32, #tpu.memory_space<vmem>>, vector<8x32xf32>
    tpu.vector_store %arg14[%c8_73, %c0_74], %366 {strides = array<i32>} : memref<64x32xf32, #tpu.memory_space<vmem>>, vector<8x32xf32>,
    %370 = vector.extract_strided_slice %22 {offsets = [56, 0], sizes = [8, 128], strides = [1, 1]} : vector<64x256xf32> to vector<8x128xf32>
    %371 = vector.extract_strided_slice %22 {offsets = [0, 128], sizes = [8, 128], strides = [1, 1]} : vector<64x256xf32> to vector<8x128xf32>
    %cst_75 = arith.constant dense<0.000000e+00> : vector<8x128xf32>
    %372 = tpu.matmul %364, %3, %cst_75 {dimension_numbers = #tpu.dot_dimension_numbers<[1], [0], [0], [1], [0, 0, 1, 1], [], []>} : vector<8x32xf32>, vector<32x128xf32>, vector<8x128xf32> -> vector<8x128xf32>
    %373 = arith.addf %370, %372 : vector<8x128xf32>
    %374 = math.tanh %373 : vector<8x128xf32>
    %375 = arith.negf %373 : vector<8x128xf32>
    %376 = math.exp %375 : vector<8x128xf32>
    %cst_76 = arith.constant 1.000000e+00 : f32
    %377 = vector.broadcast %cst_76 : f32 to vector<8x128xf32>
    %378 = arith.addf %377, %376 : vector<8x128xf32>
    %379 = arith.divf %377, %378 : vector<8x128xf32>
    %380 = arith.select %60, %374, %379 : vector<8x128xi1>, vector<8x128xf32>
    %381 = vector.extract_strided_slice %380 {offsets = [0, 0], sizes = [8, 32], strides = [1, 1]} : vector<8x128xf32> to vector<8x32xf32>
    %382 = vector.extract_strided_slice %380 {offsets = [0, 32], sizes = [8, 32], strides = [1, 1]} : vector<8x128xf32> to vector<8x32xf32>
    %383 = vector.extract_strided_slice %380 {offsets = [0, 64], sizes = [8, 32], strides = [1, 1]} : vector<8x128xf32> to vector<8x32xf32>
    %384 = vector.extract_strided_slice %380 {offsets = [0, 96], sizes = [8, 32], strides = [1, 1]} : vector<8x128xf32> to vector<8x32xf32>
    %385 = arith.mulf %382, %365 : vector<8x32xf32>
    %386 = arith.mulf %381, %383 : vector<8x32xf32>
    %387 = arith.addf %385, %386 : vector<8x32xf32>
    %388 = math.tanh %387 : vector<8x32xf32>
    %389 = arith.mulf %384, %388 : vector<8x32xf32>
    %cst_77 = arith.constant dense<0.000000e+00> : vector<8x128xf32>
    %390 = tpu.matmul %366, %4, %cst_77 {dimension_numbers = #tpu.dot_dimension_numbers<[1], [0], [0], [1], [0, 0, 1, 1], [], []>} : vector<8x32xf32>, vector<32x128xf32>, vector<8x128xf32> -> vector<8x128xf32>
    %391 = arith.addf %371, %390 : vector<8x128xf32>
    %392 = math.tanh %391 : vector<8x128xf32>
    %393 = arith.negf %391 : vector<8x128xf32>
    %394 = math.exp %393 : vector<8x128xf32>
    %cst_78 = arith.constant 1.000000e+00 : f32
    %395 = vector.broadcast %cst_78 : f32 to vector<8x128xf32>
    %396 = arith.addf %395, %394 : vector<8x128xf32>
    %397 = arith.divf %395, %396 : vector<8x128xf32>
    %398 = arith.select %60, %392, %397 : vector<8x128xi1>, vector<8x128xf32>
    %399 = vector.extract_strided_slice %398 {offsets = [0, 0], sizes = [8, 32], strides = [1, 1]} : vector<8x128xf32> to vector<8x32xf32>
    %400 = vector.extract_strided_slice %398 {offsets = [0, 32], sizes = [8, 32], strides = [1, 1]} : vector<8x128xf32> to vector<8x32xf32>
    %401 = vector.extract_strided_slice %398 {offsets = [0, 64], sizes = [8, 32], strides = [1, 1]} : vector<8x128xf32> to vector<8x32xf32>
    %402 = vector.extract_strided_slice %398 {offsets = [0, 96], sizes = [8, 32], strides = [1, 1]} : vector<8x128xf32> to vector<8x32xf32>
    %403 = arith.mulf %400, %367 : vector<8x32xf32>
    %404 = arith.mulf %399, %401 : vector<8x32xf32>
    %405 = arith.addf %403, %404 : vector<8x32xf32>
    %406 = math.tanh %405 : vector<8x32xf32>
    %407 = arith.mulf %402, %406 : vector<8x32xf32>
    %408 = arith.select %54, %389, %364 : vector<8x32xi1>, vector<8x32xf32>
    %409 = arith.select %26, %407, %366 : vector<8x32xi1>, vector<8x32xf32>
    %c56_79 = arith.constant 56 : index
    %c0_80 = arith.constant 0 : index
    %410 = vector.load %arg13[%c56_79, %c0_80] : memref<64x32xf32, #tpu.memory_space<vmem>>, vector<8x32xf32>
    tpu.vector_store %arg13[%c56_79, %c0_80], %408 {strides = array<i32>} : memref<64x32xf32, #tpu.memory_space<vmem>>, vector<8x32xf32>,
    %c0_81 = arith.constant 0 : index
    %c0_82 = arith.constant 0 : index
    %411 = vector.load %arg14[%c0_81, %c0_82] : memref<64x32xf32, #tpu.memory_space<vmem>>, vector<8x32xf32>
    tpu.vector_store %arg14[%c0_81, %c0_82], %409 {strides = array<i32>} : memref<64x32xf32, #tpu.memory_space<vmem>>, vector<8x32xf32>,
    %c0_83 = arith.constant 0 : index
    %c0_84 = arith.constant 0 : index
    %412 = vector.load %arg13[%c0_83, %c0_84] : memref<64x32xf32, #tpu.memory_space<vmem>>, vector<64x32xf32>
    %cst_85 = arith.constant dense<0.000000e+00> : vector<64x256xf32>
    %413 = tpu.matmul %412, %5, %cst_85 {dimension_numbers = #tpu.dot_dimension_numbers<[1], [0], [0], [1], [0, 0, 1, 1], [], []>} : vector<64x32xf32>, vector<32x256xf32>, vector<64x256xf32> -> vector<64x256xf32>
    %c0_86 = arith.constant 0 : index
    %c0_87 = arith.constant 0 : index
    %414 = vector.load %arg14[%c0_86, %c0_87] : memref<64x32xf32, #tpu.memory_space<vmem>>, vector<64x32xf32>
    %cst_88 = arith.constant dense<0.000000e+00> : vector<64x256xf32>
    %415 = tpu.matmul %414, %6, %cst_88 {dimension_numbers = #tpu.dot_dimension_numbers<[1], [0], [0], [1], [0, 0, 1, 1], [], []>} : vector<64x32xf32>, vector<32x256xf32>, vector<64x256xf32> -> vector<64x256xf32>
    %416 = arith.addf %413, %415 : vector<64x256xf32>
    %417 = vector.broadcast %7 : vector<1x256xf32> to vector<64x256xf32>
    %418 = arith.addf %416, %417 : vector<64x256xf32>
    %419 = vector.extract_strided_slice %418 {offsets = [0, 0], sizes = [8, 128], strides = [1, 1]} : vector<64x256xf32> to vector<8x128xf32>
    %cst_89 = arith.constant dense<0.000000e+00> : vector<8x128xf32>
    %420 = tpu.matmul %61, %8, %cst_89 {dimension_numbers = #tpu.dot_dimension_numbers<[1], [0], [0], [1], [0, 0, 1, 1], [], []>} : vector<8x32xf32>, vector<32x128xf32>, vector<8x128xf32> -> vector<8x128xf32>
    %421 = arith.addf %419, %420 : vector<8x128xf32>
    %422 = math.tanh %421 : vector<8x128xf32>
    %423 = arith.negf %421 : vector<8x128xf32>
    %424 = math.exp %423 : vector<8x128xf32>
    %cst_90 = arith.constant 1.000000e+00 : f32
    %425 = vector.broadcast %cst_90 : f32 to vector<8x128xf32>
    %426 = arith.addf %425, %424 : vector<8x128xf32>
    %427 = arith.divf %425, %426 : vector<8x128xf32>
    %428 = arith.select %60, %422, %427 : vector<8x128xi1>, vector<8x128xf32>
    %429 = vector.extract_strided_slice %428 {offsets = [0, 0], sizes = [8, 32], strides = [1, 1]} : vector<8x128xf32> to vector<8x32xf32>
    %430 = vector.extract_strided_slice %428 {offsets = [0, 32], sizes = [8, 32], strides = [1, 1]} : vector<8x128xf32> to vector<8x32xf32>
    %431 = vector.extract_strided_slice %428 {offsets = [0, 64], sizes = [8, 32], strides = [1, 1]} : vector<8x128xf32> to vector<8x32xf32>
    %432 = vector.extract_strided_slice %428 {offsets = [0, 96], sizes = [8, 32], strides = [1, 1]} : vector<8x128xf32> to vector<8x32xf32>
    %433 = arith.mulf %430, %61 : vector<8x32xf32>
    %434 = arith.mulf %429, %431 : vector<8x32xf32>
    %435 = arith.addf %433, %434 : vector<8x32xf32>
    %436 = math.tanh %435 : vector<8x32xf32>
    %437 = arith.mulf %432, %436 : vector<8x32xf32>
    %438 = vector.extract_strided_slice %418 {offsets = [56, 128], sizes = [8, 128], strides = [1, 1]} : vector<64x256xf32> to vector<8x128xf32>
    %cst_91 = arith.constant dense<0.000000e+00> : vector<8x128xf32>
    %439 = tpu.matmul %61, %9, %cst_91 {dimension_numbers = #tpu.dot_dimension_numbers<[1], [0], [0], [1], [0, 0, 1, 1], [], []>} : vector<8x32xf32>, vector<32x128xf32>, vector<8x128xf32> -> vector<8x128xf32>
    %440 = arith.addf %438, %439 : vector<8x128xf32>
    %441 = math.tanh %440 : vector<8x128xf32>
    %442 = arith.negf %440 : vector<8x128xf32>
    %443 = math.exp %442 : vector<8x128xf32>
    %cst_92 = arith.constant 1.000000e+00 : f32
    %444 = vector.broadcast %cst_92 : f32 to vector<8x128xf32>
    %445 = arith.addf %444, %443 : vector<8x128xf32>
    %446 = arith.divf %444, %445 : vector<8x128xf32>
    %447 = arith.select %60, %441, %446 : vector<8x128xi1>, vector<8x128xf32>
    %448 = vector.extract_strided_slice %447 {offsets = [0, 0], sizes = [8, 32], strides = [1, 1]} : vector<8x128xf32> to vector<8x32xf32>
    %449 = vector.extract_strided_slice %447 {offsets = [0, 32], sizes = [8, 32], strides = [1, 1]} : vector<8x128xf32> to vector<8x32xf32>
    %450 = vector.extract_strided_slice %447 {offsets = [0, 64], sizes = [8, 32], strides = [1, 1]} : vector<8x128xf32> to vector<8x32xf32>
    %451 = vector.extract_strided_slice %447 {offsets = [0, 96], sizes = [8, 32], strides = [1, 1]} : vector<8x128xf32> to vector<8x32xf32>
    %452 = arith.mulf %449, %61 : vector<8x32xf32>
    %453 = arith.mulf %448, %450 : vector<8x32xf32>
    %454 = arith.addf %452, %453 : vector<8x32xf32>
    %455 = math.tanh %454 : vector<8x32xf32>
    %456 = arith.mulf %451, %455 : vector<8x32xf32>
    %457 = arith.select %26, %437, %61 : vector<8x32xi1>, vector<8x32xf32>
    %458 = arith.select %26, %435, %61 : vector<8x32xi1>, vector<8x32xf32>
    %459 = arith.select %54, %456, %61 : vector<8x32xi1>, vector<8x32xf32>
    %460 = arith.select %54, %454, %61 : vector<8x32xi1>, vector<8x32xf32>
    %461 = vector.extract_strided_slice %418 {offsets = [8, 0], sizes = [8, 128], strides = [1, 1]} : vector<64x256xf32> to vector<8x128xf32>
    %cst_93 = arith.constant dense<0.000000e+00> : vector<8x128xf32>
    %462 = tpu.matmul %457, %8, %cst_93 {dimension_numbers = #tpu.dot_dimension_numbers<[1], [0], [0], [1], [0, 0, 1, 1], [], []>} : vector<8x32xf32>, vector<32x128xf32>, vector<8x128xf32> -> vector<8x128xf32>
    %463 = arith.addf %461, %462 : vector<8x128xf32>
    %464 = math.tanh %463 : vector<8x128xf32>
    %465 = arith.negf %463 : vector<8x128xf32>
    %466 = math.exp %465 : vector<8x128xf32>
    %cst_94 = arith.constant 1.000000e+00 : f32
    %467 = vector.broadcast %cst_94 : f32 to vector<8x128xf32>
    %468 = arith.addf %467, %466 : vector<8x128xf32>
    %469 = arith.divf %467, %468 : vector<8x128xf32>
    %470 = arith.select %60, %464, %469 : vector<8x128xi1>, vector<8x128xf32>
    %471 = vector.extract_strided_slice %470 {offsets = [0, 0], sizes = [8, 32], strides = [1, 1]} : vector<8x128xf32> to vector<8x32xf32>
    %472 = vector.extract_strided_slice %470 {offsets = [0, 32], sizes = [8, 32], strides = [1, 1]} : vector<8x128xf32> to vector<8x32xf32>
    %473 = vector.extract_strided_slice %470 {offsets = [0, 64], sizes = [8, 32], strides = [1, 1]} : vector<8x128xf32> to vector<8x32xf32>
    %474 = vector.extract_strided_slice %470 {offsets = [0, 96], sizes = [8, 32], strides = [1, 1]} : vector<8x128xf32> to vector<8x32xf32>
    %475 = arith.mulf %472, %458 : vector<8x32xf32>
    %476 = arith.mulf %471, %473 : vector<8x32xf32>
    %477 = arith.addf %475, %476 : vector<8x32xf32>
    %478 = math.tanh %477 : vector<8x32xf32>
    %479 = arith.mulf %474, %478 : vector<8x32xf32>
    %480 = vector.extract_strided_slice %418 {offsets = [48, 128], sizes = [8, 128], strides = [1, 1]} : vector<64x256xf32> to vector<8x128xf32>
    %cst_95 = arith.constant dense<0.000000e+00> : vector<8x128xf32>
    %481 = tpu.matmul %459, %9, %cst_95 {dimension_numbers = #tpu.dot_dimension_numbers<[1], [0], [0], [1], [0, 0, 1, 1], [], []>} : vector<8x32xf32>, vector<32x128xf32>, vector<8x128xf32> -> vector<8x128xf32>
    %482 = arith.addf %480, %481 : vector<8x128xf32>
    %483 = math.tanh %482 : vector<8x128xf32>
    %484 = arith.negf %482 : vector<8x128xf32>
    %485 = math.exp %484 : vector<8x128xf32>
    %cst_96 = arith.constant 1.000000e+00 : f32
    %486 = vector.broadcast %cst_96 : f32 to vector<8x128xf32>
    %487 = arith.addf %486, %485 : vector<8x128xf32>
    %488 = arith.divf %486, %487 : vector<8x128xf32>
    %489 = arith.select %60, %483, %488 : vector<8x128xi1>, vector<8x128xf32>
    %490 = vector.extract_strided_slice %489 {offsets = [0, 0], sizes = [8, 32], strides = [1, 1]} : vector<8x128xf32> to vector<8x32xf32>
    %491 = vector.extract_strided_slice %489 {offsets = [0, 32], sizes = [8, 32], strides = [1, 1]} : vector<8x128xf32> to vector<8x32xf32>
    %492 = vector.extract_strided_slice %489 {offsets = [0, 64], sizes = [8, 32], strides = [1, 1]} : vector<8x128xf32> to vector<8x32xf32>
    %493 = vector.extract_strided_slice %489 {offsets = [0, 96], sizes = [8, 32], strides = [1, 1]} : vector<8x128xf32> to vector<8x32xf32>
    %494 = arith.mulf %491, %460 : vector<8x32xf32>
    %495 = arith.mulf %490, %492 : vector<8x32xf32>
    %496 = arith.addf %494, %495 : vector<8x32xf32>
    %497 = math.tanh %496 : vector<8x32xf32>
    %498 = arith.mulf %493, %497 : vector<8x32xf32>
    %499 = arith.select %30, %479, %457 : vector<8x32xi1>, vector<8x32xf32>
    %500 = arith.select %30, %477, %458 : vector<8x32xi1>, vector<8x32xf32>
    %501 = arith.select %50, %498, %459 : vector<8x32xi1>, vector<8x32xf32>
    %502 = arith.select %50, %496, %460 : vector<8x32xi1>, vector<8x32xf32>
    %503 = vector.extract_strided_slice %418 {offsets = [16, 0], sizes = [8, 128], strides = [1, 1]} : vector<64x256xf32> to vector<8x128xf32>
    %cst_97 = arith.constant dense<0.000000e+00> : vector<8x128xf32>
    %504 = tpu.matmul %499, %8, %cst_97 {dimension_numbers = #tpu.dot_dimension_numbers<[1], [0], [0], [1], [0, 0, 1, 1], [], []>} : vector<8x32xf32>, vector<32x128xf32>, vector<8x128xf32> -> vector<8x128xf32>
    %505 = arith.addf %503, %504 : vector<8x128xf32>
    %506 = math.tanh %505 : vector<8x128xf32>
    %507 = arith.negf %505 : vector<8x128xf32>
    %508 = math.exp %507 : vector<8x128xf32>
    %cst_98 = arith.constant 1.000000e+00 : f32
    %509 = vector.broadcast %cst_98 : f32 to vector<8x128xf32>
    %510 = arith.addf %509, %508 : vector<8x128xf32>
    %511 = arith.divf %509, %510 : vector<8x128xf32>
    %512 = arith.select %60, %506, %511 : vector<8x128xi1>, vector<8x128xf32>
    %513 = vector.extract_strided_slice %512 {offsets = [0, 0], sizes = [8, 32], strides = [1, 1]} : vector<8x128xf32> to vector<8x32xf32>
    %514 = vector.extract_strided_slice %512 {offsets = [0, 32], sizes = [8, 32], strides = [1, 1]} : vector<8x128xf32> to vector<8x32xf32>
    %515 = vector.extract_strided_slice %512 {offsets = [0, 64], sizes = [8, 32], strides = [1, 1]} : vector<8x128xf32> to vector<8x32xf32>
    %516 = vector.extract_strided_slice %512 {offsets = [0, 96], sizes = [8, 32], strides = [1, 1]} : vector<8x128xf32> to vector<8x32xf32>
    %517 = arith.mulf %514, %500 : vector<8x32xf32>
    %518 = arith.mulf %513, %515 : vector<8x32xf32>
    %519 = arith.addf %517, %518 : vector<8x32xf32>
    %520 = math.tanh %519 : vector<8x32xf32>
    %521 = arith.mulf %516, %520 : vector<8x32xf32>
    %522 = vector.extract_strided_slice %418 {offsets = [40, 128], sizes = [8, 128], strides = [1, 1]} : vector<64x256xf32> to vector<8x128xf32>
    %cst_99 = arith.constant dense<0.000000e+00> : vector<8x128xf32>
    %523 = tpu.matmul %501, %9, %cst_99 {dimension_numbers = #tpu.dot_dimension_numbers<[1], [0], [0], [1], [0, 0, 1, 1], [], []>} : vector<8x32xf32>, vector<32x128xf32>, vector<8x128xf32> -> vector<8x128xf32>
    %524 = arith.addf %522, %523 : vector<8x128xf32>
    %525 = math.tanh %524 : vector<8x128xf32>
    %526 = arith.negf %524 : vector<8x128xf32>
    %527 = math.exp %526 : vector<8x128xf32>
    %cst_100 = arith.constant 1.000000e+00 : f32
    %528 = vector.broadcast %cst_100 : f32 to vector<8x128xf32>
    %529 = arith.addf %528, %527 : vector<8x128xf32>
    %530 = arith.divf %528, %529 : vector<8x128xf32>
    %531 = arith.select %60, %525, %530 : vector<8x128xi1>, vector<8x128xf32>
    %532 = vector.extract_strided_slice %531 {offsets = [0, 0], sizes = [8, 32], strides = [1, 1]} : vector<8x128xf32> to vector<8x32xf32>
    %533 = vector.extract_strided_slice %531 {offsets = [0, 32], sizes = [8, 32], strides = [1, 1]} : vector<8x128xf32> to vector<8x32xf32>
    %534 = vector.extract_strided_slice %531 {offsets = [0, 64], sizes = [8, 32], strides = [1, 1]} : vector<8x128xf32> to vector<8x32xf32>
    %535 = vector.extract_strided_slice %531 {offsets = [0, 96], sizes = [8, 32], strides = [1, 1]} : vector<8x128xf32> to vector<8x32xf32>
    %536 = arith.mulf %533, %502 : vector<8x32xf32>
    %537 = arith.mulf %532, %534 : vector<8x32xf32>
    %538 = arith.addf %536, %537 : vector<8x32xf32>
    %539 = math.tanh %538 : vector<8x32xf32>
    %540 = arith.mulf %535, %539 : vector<8x32xf32>
    %541 = arith.select %34, %521, %499 : vector<8x32xi1>, vector<8x32xf32>
    %542 = arith.select %34, %519, %500 : vector<8x32xi1>, vector<8x32xf32>
    %543 = arith.select %46, %540, %501 : vector<8x32xi1>, vector<8x32xf32>
    %544 = arith.select %46, %538, %502 : vector<8x32xi1>, vector<8x32xf32>
    %545 = vector.extract_strided_slice %418 {offsets = [24, 0], sizes = [8, 128], strides = [1, 1]} : vector<64x256xf32> to vector<8x128xf32>
    %cst_101 = arith.constant dense<0.000000e+00> : vector<8x128xf32>
    %546 = tpu.matmul %541, %8, %cst_101 {dimension_numbers = #tpu.dot_dimension_numbers<[1], [0], [0], [1], [0, 0, 1, 1], [], []>} : vector<8x32xf32>, vector<32x128xf32>, vector<8x128xf32> -> vector<8x128xf32>
    %547 = arith.addf %545, %546 : vector<8x128xf32>
    %548 = math.tanh %547 : vector<8x128xf32>
    %549 = arith.negf %547 : vector<8x128xf32>
    %550 = math.exp %549 : vector<8x128xf32>
    %cst_102 = arith.constant 1.000000e+00 : f32
    %551 = vector.broadcast %cst_102 : f32 to vector<8x128xf32>
    %552 = arith.addf %551, %550 : vector<8x128xf32>
    %553 = arith.divf %551, %552 : vector<8x128xf32>
    %554 = arith.select %60, %548, %553 : vector<8x128xi1>, vector<8x128xf32>
    %555 = vector.extract_strided_slice %554 {offsets = [0, 0], sizes = [8, 32], strides = [1, 1]} : vector<8x128xf32> to vector<8x32xf32>
    %556 = vector.extract_strided_slice %554 {offsets = [0, 32], sizes = [8, 32], strides = [1, 1]} : vector<8x128xf32> to vector<8x32xf32>
    %557 = vector.extract_strided_slice %554 {offsets = [0, 64], sizes = [8, 32], strides = [1, 1]} : vector<8x128xf32> to vector<8x32xf32>
    %558 = vector.extract_strided_slice %554 {offsets = [0, 96], sizes = [8, 32], strides = [1, 1]} : vector<8x128xf32> to vector<8x32xf32>
    %559 = arith.mulf %556, %542 : vector<8x32xf32>
    %560 = arith.mulf %555, %557 : vector<8x32xf32>
    %561 = arith.addf %559, %560 : vector<8x32xf32>
    %562 = math.tanh %561 : vector<8x32xf32>
    %563 = arith.mulf %558, %562 : vector<8x32xf32>
    %564 = vector.extract_strided_slice %418 {offsets = [32, 128], sizes = [8, 128], strides = [1, 1]} : vector<64x256xf32> to vector<8x128xf32>
    %cst_103 = arith.constant dense<0.000000e+00> : vector<8x128xf32>
    %565 = tpu.matmul %543, %9, %cst_103 {dimension_numbers = #tpu.dot_dimension_numbers<[1], [0], [0], [1], [0, 0, 1, 1], [], []>} : vector<8x32xf32>, vector<32x128xf32>, vector<8x128xf32> -> vector<8x128xf32>
    %566 = arith.addf %564, %565 : vector<8x128xf32>
    %567 = math.tanh %566 : vector<8x128xf32>
    %568 = arith.negf %566 : vector<8x128xf32>
    %569 = math.exp %568 : vector<8x128xf32>
    %cst_104 = arith.constant 1.000000e+00 : f32
    %570 = vector.broadcast %cst_104 : f32 to vector<8x128xf32>
    %571 = arith.addf %570, %569 : vector<8x128xf32>
    %572 = arith.divf %570, %571 : vector<8x128xf32>
    %573 = arith.select %60, %567, %572 : vector<8x128xi1>, vector<8x128xf32>
    %574 = vector.extract_strided_slice %573 {offsets = [0, 0], sizes = [8, 32], strides = [1, 1]} : vector<8x128xf32> to vector<8x32xf32>
    %575 = vector.extract_strided_slice %573 {offsets = [0, 32], sizes = [8, 32], strides = [1, 1]} : vector<8x128xf32> to vector<8x32xf32>
    %576 = vector.extract_strided_slice %573 {offsets = [0, 64], sizes = [8, 32], strides = [1, 1]} : vector<8x128xf32> to vector<8x32xf32>
    %577 = vector.extract_strided_slice %573 {offsets = [0, 96], sizes = [8, 32], strides = [1, 1]} : vector<8x128xf32> to vector<8x32xf32>
    %578 = arith.mulf %575, %544 : vector<8x32xf32>
    %579 = arith.mulf %574, %576 : vector<8x32xf32>
    %580 = arith.addf %578, %579 : vector<8x32xf32>
    %581 = math.tanh %580 : vector<8x32xf32>
    %582 = arith.mulf %577, %581 : vector<8x32xf32>
    %583 = arith.select %38, %563, %541 : vector<8x32xi1>, vector<8x32xf32>
    %584 = arith.select %38, %561, %542 : vector<8x32xi1>, vector<8x32xf32>
    %585 = arith.select %42, %582, %543 : vector<8x32xi1>, vector<8x32xf32>
    %586 = arith.select %42, %580, %544 : vector<8x32xi1>, vector<8x32xf32>
    %587 = vector.extract_strided_slice %418 {offsets = [32, 0], sizes = [8, 128], strides = [1, 1]} : vector<64x256xf32> to vector<8x128xf32>
    %cst_105 = arith.constant dense<0.000000e+00> : vector<8x128xf32>
    %588 = tpu.matmul %583, %8, %cst_105 {dimension_numbers = #tpu.dot_dimension_numbers<[1], [0], [0], [1], [0, 0, 1, 1], [], []>} : vector<8x32xf32>, vector<32x128xf32>, vector<8x128xf32> -> vector<8x128xf32>
    %589 = arith.addf %587, %588 : vector<8x128xf32>
    %590 = math.tanh %589 : vector<8x128xf32>
    %591 = arith.negf %589 : vector<8x128xf32>
    %592 = math.exp %591 : vector<8x128xf32>
    %cst_106 = arith.constant 1.000000e+00 : f32
    %593 = vector.broadcast %cst_106 : f32 to vector<8x128xf32>
    %594 = arith.addf %593, %592 : vector<8x128xf32>
    %595 = arith.divf %593, %594 : vector<8x128xf32>
    %596 = arith.select %60, %590, %595 : vector<8x128xi1>, vector<8x128xf32>
    %597 = vector.extract_strided_slice %596 {offsets = [0, 0], sizes = [8, 32], strides = [1, 1]} : vector<8x128xf32> to vector<8x32xf32>
    %598 = vector.extract_strided_slice %596 {offsets = [0, 32], sizes = [8, 32], strides = [1, 1]} : vector<8x128xf32> to vector<8x32xf32>
    %599 = vector.extract_strided_slice %596 {offsets = [0, 64], sizes = [8, 32], strides = [1, 1]} : vector<8x128xf32> to vector<8x32xf32>
    %600 = vector.extract_strided_slice %596 {offsets = [0, 96], sizes = [8, 32], strides = [1, 1]} : vector<8x128xf32> to vector<8x32xf32>
    %601 = arith.mulf %598, %584 : vector<8x32xf32>
    %602 = arith.mulf %597, %599 : vector<8x32xf32>
    %603 = arith.addf %601, %602 : vector<8x32xf32>
    %604 = math.tanh %603 : vector<8x32xf32>
    %605 = arith.mulf %600, %604 : vector<8x32xf32>
    %606 = vector.extract_strided_slice %418 {offsets = [24, 128], sizes = [8, 128], strides = [1, 1]} : vector<64x256xf32> to vector<8x128xf32>
    %cst_107 = arith.constant dense<0.000000e+00> : vector<8x128xf32>
    %607 = tpu.matmul %585, %9, %cst_107 {dimension_numbers = #tpu.dot_dimension_numbers<[1], [0], [0], [1], [0, 0, 1, 1], [], []>} : vector<8x32xf32>, vector<32x128xf32>, vector<8x128xf32> -> vector<8x128xf32>
    %608 = arith.addf %606, %607 : vector<8x128xf32>
    %609 = math.tanh %608 : vector<8x128xf32>
    %610 = arith.negf %608 : vector<8x128xf32>
    %611 = math.exp %610 : vector<8x128xf32>
    %cst_108 = arith.constant 1.000000e+00 : f32
    %612 = vector.broadcast %cst_108 : f32 to vector<8x128xf32>
    %613 = arith.addf %612, %611 : vector<8x128xf32>
    %614 = arith.divf %612, %613 : vector<8x128xf32>
    %615 = arith.select %60, %609, %614 : vector<8x128xi1>, vector<8x128xf32>
    %616 = vector.extract_strided_slice %615 {offsets = [0, 0], sizes = [8, 32], strides = [1, 1]} : vector<8x128xf32> to vector<8x32xf32>
    %617 = vector.extract_strided_slice %615 {offsets = [0, 32], sizes = [8, 32], strides = [1, 1]} : vector<8x128xf32> to vector<8x32xf32>
    %618 = vector.extract_strided_slice %615 {offsets = [0, 64], sizes = [8, 32], strides = [1, 1]} : vector<8x128xf32> to vector<8x32xf32>
    %619 = vector.extract_strided_slice %615 {offsets = [0, 96], sizes = [8, 32], strides = [1, 1]} : vector<8x128xf32> to vector<8x32xf32>
    %620 = arith.mulf %617, %586 : vector<8x32xf32>
    %621 = arith.mulf %616, %618 : vector<8x32xf32>
    %622 = arith.addf %620, %621 : vector<8x32xf32>
    %623 = math.tanh %622 : vector<8x32xf32>
    %624 = arith.mulf %619, %623 : vector<8x32xf32>
    %625 = arith.select %42, %605, %583 : vector<8x32xi1>, vector<8x32xf32>
    %626 = arith.select %42, %603, %584 : vector<8x32xi1>, vector<8x32xf32>
    %627 = arith.select %38, %624, %585 : vector<8x32xi1>, vector<8x32xf32>
    %628 = arith.select %38, %622, %586 : vector<8x32xi1>, vector<8x32xf32>
    %629 = vector.extract_strided_slice %418 {offsets = [40, 0], sizes = [8, 128], strides = [1, 1]} : vector<64x256xf32> to vector<8x128xf32>
    %cst_109 = arith.constant dense<0.000000e+00> : vector<8x128xf32>
    %630 = tpu.matmul %625, %8, %cst_109 {dimension_numbers = #tpu.dot_dimension_numbers<[1], [0], [0], [1], [0, 0, 1, 1], [], []>} : vector<8x32xf32>, vector<32x128xf32>, vector<8x128xf32> -> vector<8x128xf32>
    %631 = arith.addf %629, %630 : vector<8x128xf32>
    %632 = math.tanh %631 : vector<8x128xf32>
    %633 = arith.negf %631 : vector<8x128xf32>
    %634 = math.exp %633 : vector<8x128xf32>
    %cst_110 = arith.constant 1.000000e+00 : f32
    %635 = vector.broadcast %cst_110 : f32 to vector<8x128xf32>
    %636 = arith.addf %635, %634 : vector<8x128xf32>
    %637 = arith.divf %635, %636 : vector<8x128xf32>
    %638 = arith.select %60, %632, %637 : vector<8x128xi1>, vector<8x128xf32>
    %639 = vector.extract_strided_slice %638 {offsets = [0, 0], sizes = [8, 32], strides = [1, 1]} : vector<8x128xf32> to vector<8x32xf32>
    %640 = vector.extract_strided_slice %638 {offsets = [0, 32], sizes = [8, 32], strides = [1, 1]} : vector<8x128xf32> to vector<8x32xf32>
    %641 = vector.extract_strided_slice %638 {offsets = [0, 64], sizes = [8, 32], strides = [1, 1]} : vector<8x128xf32> to vector<8x32xf32>
    %642 = vector.extract_strided_slice %638 {offsets = [0, 96], sizes = [8, 32], strides = [1, 1]} : vector<8x128xf32> to vector<8x32xf32>
    %643 = arith.mulf %640, %626 : vector<8x32xf32>
    %644 = arith.mulf %639, %641 : vector<8x32xf32>
    %645 = arith.addf %643, %644 : vector<8x32xf32>
    %646 = math.tanh %645 : vector<8x32xf32>
    %647 = arith.mulf %642, %646 : vector<8x32xf32>
    %648 = vector.extract_strided_slice %418 {offsets = [16, 128], sizes = [8, 128], strides = [1, 1]} : vector<64x256xf32> to vector<8x128xf32>
    %cst_111 = arith.constant dense<0.000000e+00> : vector<8x128xf32>
    %649 = tpu.matmul %627, %9, %cst_111 {dimension_numbers = #tpu.dot_dimension_numbers<[1], [0], [0], [1], [0, 0, 1, 1], [], []>} : vector<8x32xf32>, vector<32x128xf32>, vector<8x128xf32> -> vector<8x128xf32>
    %650 = arith.addf %648, %649 : vector<8x128xf32>
    %651 = math.tanh %650 : vector<8x128xf32>
    %652 = arith.negf %650 : vector<8x128xf32>
    %653 = math.exp %652 : vector<8x128xf32>
    %cst_112 = arith.constant 1.000000e+00 : f32
    %654 = vector.broadcast %cst_112 : f32 to vector<8x128xf32>
    %655 = arith.addf %654, %653 : vector<8x128xf32>
    %656 = arith.divf %654, %655 : vector<8x128xf32>
    %657 = arith.select %60, %651, %656 : vector<8x128xi1>, vector<8x128xf32>
    %658 = vector.extract_strided_slice %657 {offsets = [0, 0], sizes = [8, 32], strides = [1, 1]} : vector<8x128xf32> to vector<8x32xf32>
    %659 = vector.extract_strided_slice %657 {offsets = [0, 32], sizes = [8, 32], strides = [1, 1]} : vector<8x128xf32> to vector<8x32xf32>
    %660 = vector.extract_strided_slice %657 {offsets = [0, 64], sizes = [8, 32], strides = [1, 1]} : vector<8x128xf32> to vector<8x32xf32>
    %661 = vector.extract_strided_slice %657 {offsets = [0, 96], sizes = [8, 32], strides = [1, 1]} : vector<8x128xf32> to vector<8x32xf32>
    %662 = arith.mulf %659, %628 : vector<8x32xf32>
    %663 = arith.mulf %658, %660 : vector<8x32xf32>
    %664 = arith.addf %662, %663 : vector<8x32xf32>
    %665 = math.tanh %664 : vector<8x32xf32>
    %666 = arith.mulf %661, %665 : vector<8x32xf32>
    %667 = arith.select %46, %647, %625 : vector<8x32xi1>, vector<8x32xf32>
    %668 = arith.select %46, %645, %626 : vector<8x32xi1>, vector<8x32xf32>
    %669 = arith.select %34, %666, %627 : vector<8x32xi1>, vector<8x32xf32>
    %670 = arith.select %34, %664, %628 : vector<8x32xi1>, vector<8x32xf32>
    %671 = vector.extract_strided_slice %418 {offsets = [48, 0], sizes = [8, 128], strides = [1, 1]} : vector<64x256xf32> to vector<8x128xf32>
    %cst_113 = arith.constant dense<0.000000e+00> : vector<8x128xf32>
    %672 = tpu.matmul %667, %8, %cst_113 {dimension_numbers = #tpu.dot_dimension_numbers<[1], [0], [0], [1], [0, 0, 1, 1], [], []>} : vector<8x32xf32>, vector<32x128xf32>, vector<8x128xf32> -> vector<8x128xf32>
    %673 = arith.addf %671, %672 : vector<8x128xf32>
    %674 = math.tanh %673 : vector<8x128xf32>
    %675 = arith.negf %673 : vector<8x128xf32>
    %676 = math.exp %675 : vector<8x128xf32>
    %cst_114 = arith.constant 1.000000e+00 : f32
    %677 = vector.broadcast %cst_114 : f32 to vector<8x128xf32>
    %678 = arith.addf %677, %676 : vector<8x128xf32>
    %679 = arith.divf %677, %678 : vector<8x128xf32>
    %680 = arith.select %60, %674, %679 : vector<8x128xi1>, vector<8x128xf32>
    %681 = vector.extract_strided_slice %680 {offsets = [0, 0], sizes = [8, 32], strides = [1, 1]} : vector<8x128xf32> to vector<8x32xf32>
    %682 = vector.extract_strided_slice %680 {offsets = [0, 32], sizes = [8, 32], strides = [1, 1]} : vector<8x128xf32> to vector<8x32xf32>
    %683 = vector.extract_strided_slice %680 {offsets = [0, 64], sizes = [8, 32], strides = [1, 1]} : vector<8x128xf32> to vector<8x32xf32>
    %684 = vector.extract_strided_slice %680 {offsets = [0, 96], sizes = [8, 32], strides = [1, 1]} : vector<8x128xf32> to vector<8x32xf32>
    %685 = arith.mulf %682, %668 : vector<8x32xf32>
    %686 = arith.mulf %681, %683 : vector<8x32xf32>
    %687 = arith.addf %685, %686 : vector<8x32xf32>
    %688 = math.tanh %687 : vector<8x32xf32>
    %689 = arith.mulf %684, %688 : vector<8x32xf32>
    %690 = vector.extract_strided_slice %418 {offsets = [8, 128], sizes = [8, 128], strides = [1, 1]} : vector<64x256xf32> to vector<8x128xf32>
    %cst_115 = arith.constant dense<0.000000e+00> : vector<8x128xf32>
    %691 = tpu.matmul %669, %9, %cst_115 {dimension_numbers = #tpu.dot_dimension_numbers<[1], [0], [0], [1], [0, 0, 1, 1], [], []>} : vector<8x32xf32>, vector<32x128xf32>, vector<8x128xf32> -> vector<8x128xf32>
    %692 = arith.addf %690, %691 : vector<8x128xf32>
    %693 = math.tanh %692 : vector<8x128xf32>
    %694 = arith.negf %692 : vector<8x128xf32>
    %695 = math.exp %694 : vector<8x128xf32>
    %cst_116 = arith.constant 1.000000e+00 : f32
    %696 = vector.broadcast %cst_116 : f32 to vector<8x128xf32>
    %697 = arith.addf %696, %695 : vector<8x128xf32>
    %698 = arith.divf %696, %697 : vector<8x128xf32>
    %699 = arith.select %60, %693, %698 : vector<8x128xi1>, vector<8x128xf32>
    %700 = vector.extract_strided_slice %699 {offsets = [0, 0], sizes = [8, 32], strides = [1, 1]} : vector<8x128xf32> to vector<8x32xf32>
    %701 = vector.extract_strided_slice %699 {offsets = [0, 32], sizes = [8, 32], strides = [1, 1]} : vector<8x128xf32> to vector<8x32xf32>
    %702 = vector.extract_strided_slice %699 {offsets = [0, 64], sizes = [8, 32], strides = [1, 1]} : vector<8x128xf32> to vector<8x32xf32>
    %703 = vector.extract_strided_slice %699 {offsets = [0, 96], sizes = [8, 32], strides = [1, 1]} : vector<8x128xf32> to vector<8x32xf32>
    %704 = arith.mulf %701, %670 : vector<8x32xf32>
    %705 = arith.mulf %700, %702 : vector<8x32xf32>
    %706 = arith.addf %704, %705 : vector<8x32xf32>
    %707 = math.tanh %706 : vector<8x32xf32>
    %708 = arith.mulf %703, %707 : vector<8x32xf32>
    %709 = arith.select %50, %689, %667 : vector<8x32xi1>, vector<8x32xf32>
    %710 = arith.select %50, %687, %668 : vector<8x32xi1>, vector<8x32xf32>
    %711 = arith.select %30, %708, %669 : vector<8x32xi1>, vector<8x32xf32>
    %712 = arith.select %30, %706, %670 : vector<8x32xi1>, vector<8x32xf32>
    %713 = vector.extract_strided_slice %418 {offsets = [56, 0], sizes = [8, 128], strides = [1, 1]} : vector<64x256xf32> to vector<8x128xf32>
    %cst_117 = arith.constant dense<0.000000e+00> : vector<8x128xf32>
    %714 = tpu.matmul %709, %8, %cst_117 {dimension_numbers = #tpu.dot_dimension_numbers<[1], [0], [0], [1], [0, 0, 1, 1], [], []>} : vector<8x32xf32>, vector<32x128xf32>, vector<8x128xf32> -> vector<8x128xf32>
    %715 = arith.addf %713, %714 : vector<8x128xf32>
    %716 = math.tanh %715 : vector<8x128xf32>
    %717 = arith.negf %715 : vector<8x128xf32>
    %718 = math.exp %717 : vector<8x128xf32>
    %cst_118 = arith.constant 1.000000e+00 : f32
    %719 = vector.broadcast %cst_118 : f32 to vector<8x128xf32>
    %720 = arith.addf %719, %718 : vector<8x128xf32>
    %721 = arith.divf %719, %720 : vector<8x128xf32>
    %722 = arith.select %60, %716, %721 : vector<8x128xi1>, vector<8x128xf32>
    %723 = vector.extract_strided_slice %722 {offsets = [0, 0], sizes = [8, 32], strides = [1, 1]} : vector<8x128xf32> to vector<8x32xf32>
    %724 = vector.extract_strided_slice %722 {offsets = [0, 32], sizes = [8, 32], strides = [1, 1]} : vector<8x128xf32> to vector<8x32xf32>
    %725 = vector.extract_strided_slice %722 {offsets = [0, 64], sizes = [8, 32], strides = [1, 1]} : vector<8x128xf32> to vector<8x32xf32>
    %726 = vector.extract_strided_slice %722 {offsets = [0, 96], sizes = [8, 32], strides = [1, 1]} : vector<8x128xf32> to vector<8x32xf32>
    %727 = arith.mulf %724, %710 : vector<8x32xf32>
    %728 = arith.mulf %723, %725 : vector<8x32xf32>
    %729 = arith.addf %727, %728 : vector<8x32xf32>
    %730 = math.tanh %729 : vector<8x32xf32>
    %731 = arith.mulf %726, %730 : vector<8x32xf32>
    %732 = vector.extract_strided_slice %418 {offsets = [0, 128], sizes = [8, 128], strides = [1, 1]} : vector<64x256xf32> to vector<8x128xf32>
    %cst_119 = arith.constant dense<0.000000e+00> : vector<8x128xf32>
    %733 = tpu.matmul %711, %9, %cst_119 {dimension_numbers = #tpu.dot_dimension_numbers<[1], [0], [0], [1], [0, 0, 1, 1], [], []>} : vector<8x32xf32>, vector<32x128xf32>, vector<8x128xf32> -> vector<8x128xf32>
    %734 = arith.addf %732, %733 : vector<8x128xf32>
    %735 = math.tanh %734 : vector<8x128xf32>
    %736 = arith.negf %734 : vector<8x128xf32>
    %737 = math.exp %736 : vector<8x128xf32>
    %cst_120 = arith.constant 1.000000e+00 : f32
    %738 = vector.broadcast %cst_120 : f32 to vector<8x128xf32>
    %739 = arith.addf %738, %737 : vector<8x128xf32>
    %740 = arith.divf %738, %739 : vector<8x128xf32>
    %741 = arith.select %60, %735, %740 : vector<8x128xi1>, vector<8x128xf32>
    %742 = vector.extract_strided_slice %741 {offsets = [0, 0], sizes = [8, 32], strides = [1, 1]} : vector<8x128xf32> to vector<8x32xf32>
    %743 = vector.extract_strided_slice %741 {offsets = [0, 32], sizes = [8, 32], strides = [1, 1]} : vector<8x128xf32> to vector<8x32xf32>
    %744 = vector.extract_strided_slice %741 {offsets = [0, 64], sizes = [8, 32], strides = [1, 1]} : vector<8x128xf32> to vector<8x32xf32>
    %745 = vector.extract_strided_slice %741 {offsets = [0, 96], sizes = [8, 32], strides = [1, 1]} : vector<8x128xf32> to vector<8x32xf32>
    %746 = arith.mulf %743, %712 : vector<8x32xf32>
    %747 = arith.mulf %742, %744 : vector<8x32xf32>
    %748 = arith.addf %746, %747 : vector<8x32xf32>
    %749 = math.tanh %748 : vector<8x32xf32>
    %750 = arith.mulf %745, %749 : vector<8x32xf32>
    %751 = arith.select %54, %731, %709 : vector<8x32xi1>, vector<8x32xf32>
    %752 = arith.select %26, %750, %711 : vector<8x32xi1>, vector<8x32xf32>
    %c0_121 = arith.constant 0 : index
    %c0_122 = arith.constant 0 : index
    %753 = vector.load %arg12[%c0_121, %c0_122] : memref<32x32xf32, #tpu.memory_space<vmem>>, vector<8x32xf32>
    tpu.vector_store %arg12[%c0_121, %c0_122], %408 {strides = array<i32>} : memref<32x32xf32, #tpu.memory_space<vmem>>, vector<8x32xf32>,
    %c8_123 = arith.constant 8 : index
    %c0_124 = arith.constant 0 : index
    %754 = vector.load %arg12[%c8_123, %c0_124] : memref<32x32xf32, #tpu.memory_space<vmem>>, vector<8x32xf32>
    tpu.vector_store %arg12[%c8_123, %c0_124], %409 {strides = array<i32>} : memref<32x32xf32, #tpu.memory_space<vmem>>, vector<8x32xf32>,
    %c16_125 = arith.constant 16 : index
    %c0_126 = arith.constant 0 : index
    %755 = vector.load %arg12[%c16_125, %c0_126] : memref<32x32xf32, #tpu.memory_space<vmem>>, vector<8x32xf32>
    tpu.vector_store %arg12[%c16_125, %c0_126], %751 {strides = array<i32>} : memref<32x32xf32, #tpu.memory_space<vmem>>, vector<8x32xf32>,
    %c24_127 = arith.constant 24 : index
    %c0_128 = arith.constant 0 : index
    %756 = vector.load %arg12[%c24_127, %c0_128] : memref<32x32xf32, #tpu.memory_space<vmem>>, vector<8x32xf32>
    tpu.vector_store %arg12[%c24_127, %c0_128], %752 {strides = array<i32>} : memref<32x32xf32, #tpu.memory_space<vmem>>, vector<8x32xf32>,
    return
  }
}

</mosaic_0001>

<bundles_post_ra>
// kernel: tpu_custom_call.1
= control target key start
LH: loop header
LB: loop body
LE: loop exit
PB: predicated region body
PF: predicated region fallthrough
CT: control target
= control target key end

     0   :  { %17 = vsyncpa [#allocation5], 0  ;;  %s4684_s0 = inlined_call_operand.vmem [shape: s32[64,1], index: 0, kind: input, shape index: {}]   ;;  %s4685_s1 = inlined_call_operand.vmem [shape: s32[8,1], index: 1, kind: input, shape index: {}]   ;;  %s4686_s2 = inlined_call_operand.vmem [shape: f32[128,32], index: 2, kind: input, shape index: {}]   ;;  %s4687_s3 = inlined_call_operand.vmem [shape: f32[32,256], index: 3, kind: input, shape index: {}]   ;;  %s4688_s4 = inlined_call_operand.vmem [shape: f32[1,256], index: 4, kind: input, shape index: {}]   ;;  %s4689_s5 = inlined_call_operand.hbm [shape: f32[32,128], index: 5, kind: input, shape index: {}]   ;;  %s4690_s6 = inlined_call_operand.hbm [shape: f32[32,128], index: 6, kind: input, shape index: {}]   ;;  %s4691_s7 = inlined_call_operand.vmem [shape: f32[32,256], index: 7, kind: input, shape index: {}]   ;;  %s4692_s8 = inlined_call_operand.vmem [shape: f32[32,256], index: 8, kind: input, shape index: {}]   ;;  %s4693_s9 = inlined_call_operand.vmem [shape: f32[1,256], index: 9, kind: input, shape index: {}]   ;;  %s4694_s10 = inlined_call_operand.hbm [shape: f32[32,128], index: 10, kind: input, shape index: {}]   ;;  %s4695_s11 = inlined_call_operand.hbm [shape: f32[32,128], index: 11, kind: input, shape index: {}]   ;;  %s4696_s12 = inlined_call_operand.hbm [shape: f32[32,32], index: 12, kind: output, shape index: {}]  }
   0x1   :  { %18 = vsyncpa [#allocation8], 0 }
   0x2   :  { %19 = vsyncpa [#allocation11], 0 }
   0x3   :  { %20 = vsyncpa [#allocation6], 0  ;;  %s48_s23 = sshll.u32 %s4690_s6, 4  ;;  %s3372_s24 = smov [#allocation7]   ;;  %s49_s23 = int_to_ptr.hbm [resolvable:$true] %s48_s23 }
   0x4   :  { %s50_s25 = sshll.u32 %s3372_s24, 4  ;;  %s35_s28 = sshll.u32 %s4689_s5, 4  ;;  %s51_s25 = int_to_ptr.vmem [resolvable:$true] %s50_s25  ;;  %s36_s28 = int_to_ptr.hbm [resolvable:$true] %s35_s28 }
   0x5   :  { %s3373_s29 = smov 128   ;;  %s3374_s30 = smov 8  }
   0x6   :  { %56 = dma.hbm_to_vmem [thread:$0]  %s49_s23, 512, %s51_s25, [#allocation8], %s3373_s29, %s3373_s29, %s3374_s30  }
   0x7   :  { %s3375_s13 = smov [#allocation4]   ;;  %s67_s6 = sshll.u32 %s4694_s10, 4  ;;  %s68_s6 = int_to_ptr.hbm [resolvable:$true] %s67_s6 }
   0x8   :  { %s37_s14 = sshll.u32 %s3375_s13, 4  ;;  %s80_s18 = sshll.u32 %s4695_s11, 4  ;;  %s38_s14 = int_to_ptr.vmem [resolvable:$true] %s37_s14  ;;  %s81_s18 = int_to_ptr.hbm [resolvable:$true] %s80_s18 }
   0x9   :  { %43 = dma.hbm_to_vmem [thread:$0]  %s36_s28, 512, %s38_s14, [#allocation5], %s3373_s29, %s3373_s29, %s3374_s30  }
   0xa   :  { %s3376_s19 = smov [#allocation9]   ;;  %s3377_s21 = smov [#allocation10]  }
   0xb   :  { %s69_s20 = sshll.u32 %s3376_s19, 4  ;;  %s82_s10 = sshll.u32 %s3377_s21, 4  ;;  %s70_s20 = int_to_ptr.vmem [resolvable:$true] %s69_s20  ;;  %s83_s10 = int_to_ptr.vmem [resolvable:$true] %s82_s10 }
   0xc   :  { %75 = dma.hbm_to_vmem [thread:$0]  %s68_s6, 512, %s70_s20, [#allocation8], %s3373_s29, %s3373_s29, %s3374_s30  }
   0xd   :  { %88 = dma.hbm_to_vmem [thread:$0]  %s81_s18, 512, %s83_s10, [#allocation11], %s3373_s29, %s3373_s29, %s3374_s30  }
   0xe   :  { %3364 = dma.done.wait [#allocation5], 512  }
   0xf   :  { %3365 = vsyncadd [#allocation5], 4294966784 }
  0x10   :  { %3366 = dma.done.wait [#allocation8], 1024  }
  0x11   :  { %3367 = vsyncadd [#allocation8], 4294966272 }
  0x12   :  { %3368 = dma.done.wait [#allocation11], 512  }
  0x13   :  { %3369 = vsyncadd [#allocation11], 4294966784  ;;  %v3378_v0 = vmov 0   ;;  %v150_v1 = vld [vmem:[%s4684_s0 + $0x10] sm:$0xff]  ;;  %v148_v2 = vld [vmem:[%s4684_s0] sm:$0xff]  ;;  %v156_v25 = vlaneseq  ;;  %v3379_v28 = vmov 1.0  }
  0x14   :  { %2982 = vset.pattern.permute.xlu1 %v3378_v0  ;;  %2981 = vset.pattern.permute.xlu0 %v3378_v0  ;;  %v152_v3 = vld [vmem:[%s4684_s0 + $0x20] sm:$0xff]  ;;  %v221_v4 = vld [vmem:[%s4686_s2 + $0x78] sm:$0xff]  ;;  %v220_v5 = vld [vmem:[%s4686_s2 + $0x70] sm:$0xff]  ;;  %v3380_v41 = vmov 0.0   ;;  %vm276_vm8 = vcmask 261120   ;;  %s3382_s25 = smov 32  }
  0x15   :  { %2983 = vset.pattern.permute.xlu2 %v3378_v0  ;;  %165 = vperm.xlu1 %2982, %v150_v1   ;;  %v219_v6 = vld [vmem:[%s4686_s2 + $0x68] sm:$0xff]  ;;  %v151_v7 = vld [vmem:[%s4684_s0 + $0x18] sm:$0xff]  ;;  %v218_v9 = vld [vmem:[%s4686_s2 + $0x60] sm:$0xff]  ;;  %v3548_v26 = vand.u32 127, %v156_v25  ;;  %s2830_s17 = sshll.u32 %s4696_s12, 4  ;;  %s2831_s17 = int_to_ptr.hbm [resolvable:$true] %s2830_s17 }
  0x16   :  { %159 = vperm.xlu0 %2981, %v148_v2   ;;  %171 = vperm.xlu2 %2983, %v152_v3   ;;  %v149_v8 = vld [vmem:[%s4684_s0 + $0x8] sm:$0xff]  ;;  %v217_v11 = vld [vmem:[%s4686_s2 + $0x58] sm:$0xff]  ;;  %v216_v12 = vld [vmem:[%s4686_s2 + $0x50] sm:$0xff] }
  0x17   :  { %222 = vmatpush.msra.mxu0 %v221_v4  ;;  %v153_v10 = vld [vmem:[%s4684_s0 + $0x28] sm:$0xff]  ;;  %v155_v14 = vld [vmem:[%s4684_s0 + $0x38] sm:$0xff]  ;;  %v154_v15 = vld [vmem:[%s4684_s0 + $0x30] sm:$0xff]  ;;  %vm431_vm9 = vcmp.ge.s32.totalorder %v3548_v26, 64  ;;  %vm432_vm10 = vcmp.lt.s32.totalorder %v3548_v26, 96 }
  0x18   :  { %v215_v13 = vld [vmem:[%s4686_s2 + $0x48] sm:$0xff]  ;;  %v214_v16 = vld [vmem:[%s4686_s2 + $0x40] sm:$0xff]  ;;  %v213_v17 = vld [vmem:[%s4686_s2 + $0x38] sm:$0xff] }
  0x19   :  { %223 = vmatpush.msra.mxu0 %v220_v5  ;;  %v212_v18 = vld [vmem:[%s4686_s2 + $0x30] sm:$0xff]  ;;  %v211_v19 = vld [vmem:[%s4686_s2 + $0x28] sm:$0xff]  ;;  %v210_v20 = vld [vmem:[%s4686_s2 + $0x20] sm:$0xff] }
  0x1a   :  { %v209_v21 = vld [vmem:[%s4686_s2 + $0x18] sm:$0xff]  ;;  %v208_v22 = vld [vmem:[%s4686_s2 + $0x10] sm:$0xff]  ;;  %v207_v23 = vld [vmem:[%s4686_s2 + $0x8] sm:$0xff] }
  0x1b   :  { %224 = vmatpush.msra.mxu0 %v219_v6  ;;  %v206_v24 = vld [vmem:[%s4686_s2] sm:$0xff]  ;;  %v3554_v32 = vld [vmem:[#allocation4 + $0x18] sm:$0xff]  ;;  %v3556_v33 = vld [vmem:[#allocation4 + $0x10] sm:$0xff] }
  0x1c   :  { %v112_v34 = vld [vmem:[%s4687_s3 + $0x30] sm:$0xff]  ;;  %449 = vmatpush.msra.mxu3 %v3554_v32  ;;  %v113_v35 = vld [vmem:[%s4687_s3 + $0x38] sm:$0xff]  ;;  %v110_v36 = vld [vmem:[%s4687_s3 + $0x20] sm:$0xff] }
  0x1d   :  { %168 = vperm.xlu1 %2982, %v151_v7   ;;  %225 = vmatpush.msra.mxu0 %v218_v9  ;;  %v3568_v38 = vld [vmem:[#allocation4 + $0x8] sm:$0xff]  ;;  %v3574_v40 = vld [vmem:[#allocation4] sm:$0xff]  ;;  %v108_v45 = vld [vmem:[%s4687_s3 + $0x10] sm:$0xff] }
  0x1e   :  { %162 = vperm.xlu0 %2981, %v149_v8   ;;  %174 = vperm.xlu2 %2983, %v153_v10   ;;  %v111_v39 = vld [vmem:[%s4687_s3 + $0x28] sm:$0xff]  ;;  %v109_v46 = vld [vmem:[%s4687_s3 + $0x18] sm:$0xff]  ;;  %v106_v47 = vld [vmem:[%s4687_s3] sm:$0xff] }
  0x1f   :  { %226 = vmatpush.msra.mxu0 %v217_v11  ;;  %313 = vmatpush.msra.mxu1 %v112_v34  ;;  %v107_v48 = vld [vmem:[%s4687_s3 + $0x8] sm:$0xff]  ;;  %v3605_v55 = vld [vmem:[#allocation7 + $0x18] sm:$0xff]  ;;  %v3607_v56 = vld [vmem:[#allocation7 + $0x10] sm:$0xff] }
  0x20   :  { %354 = vmatpush.msra.mxu2 %v113_v35  ;;  %450 = vmatpush.msra.mxu3 %v3556_v33  ;;  %v3615_v59 = vld [vmem:[#allocation7 + $0x8] sm:$0xff]  ;;  %v3621_v60 = vld [vmem:[#allocation7] sm:$0xff]  ;;  %vm3668_vm12 = vmand %vm431_vm9, %vm432_vm10 }
  0x21   :  { %227 = vmatpush.msra.mxu0 %v216_v12  ;;  %314 = vmatpush.msra.mxu1 %v110_v36  ;;  %v114_v6 = vld [vmem:[%s4688_s4] sm:$0x3]  ;;  %s3381_s4 = smov 64  }
  0x22   :  { %355 = vmatpush.msra.mxu2 %v111_v39  ;;  %451 = vmatpush.msra.mxu3 %v3568_v38  ;;  %v3651_v7 = vperm.slane %v114_v6, 0  ;;  %v273_v12 = vperm.slane %v114_v6, 1 }
  0x23   :  { %228 = vmatpush.msra.mxu0 %v215_v13  ;;  %315 = vmatpush.msra.mxu1 %v108_v45 }
  0x24   :  { %452 = vmatpush.msra.mxu3 %v3574_v40  ;;  %356 = vmatpush.msra.mxu2 %v109_v46 }
  0x25   :  { %180 = vperm.xlu1 %2982, %v155_v14   ;;  %229 = vmatpush.msra.mxu0 %v214_v16 }
  0x26   :  { %177 = vperm.xlu0 %2981, %v154_v15   ;;  %453 = vmatmul.f32.vlgmr.msra.gmra.mxu3 %v3380_v41 }
  0x27   :  { %230 = vmatpush.msra.mxu0 %v213_v17  ;;  %316 = vmatpush.msra.mxu1 %v106_v47 }
  0x28   :  { %357 = vmatpush.msra.mxu2 %v107_v48  ;;  %508 = vmatpush.msrb.mxu3 %v3605_v55 }
  0x29   :  { %231 = vmatpush.msra.mxu0 %v212_v18  ;;  %991 = vmatpush.msrb.mxu1 %v3554_v32 }
  0x2a   :  { %1052 = vmatpush.msrb.mxu2 %v3605_v55  ;;  %509 = vmatpush.msrb.mxu3 %v3607_v56 }
  0x2b   :  { %232 = vmatpush.msra.mxu0 %v211_v19  ;;  %992 = vmatpush.msrb.mxu1 %v3556_v33 }
  0x2c   :  { %1053 = vmatpush.msrb.mxu2 %v3607_v56  ;;  %510 = vmatpush.msrb.mxu3 %v3615_v59 }
  0x2d   :  { %233 = vmatpush.msra.mxu0 %v210_v20  ;;  %993 = vmatpush.msrb.mxu1 %v3568_v38 }
  0x2e   :  { %1054 = vmatpush.msrb.mxu2 %v3615_v59  ;;  %511 = vmatpush.msrb.mxu3 %v3621_v60 }
  0x2f   :  { %234 = vmatpush.msra.mxu0 %v209_v21  ;;  %994 = vmatpush.msrb.mxu1 %v3574_v40 }
  0x30   :  { %1055 = vmatpush.msrb.mxu2 %v3621_v60  ;;  %512 = vmatmul.f32.vlgmr.msrb.gmra.mxu3 %v3380_v41 }
  0x31   :  { %235 = vmatpush.msra.mxu0 %v208_v22  ;;  %583 = vmatpush.msra.mxu3 %v3554_v32 }
  0x33   :  { %236 = vmatpush.msra.mxu0 %v207_v23  ;;  %584 = vmatpush.msra.mxu3 %v3556_v33 }
  0x35   :  { %237 = vmatpush.msra.mxu0 %v206_v24  ;;  %585 = vmatpush.msra.mxu3 %v3568_v38 }
  0x37   :  { %586 = vmatpush.msra.mxu3 %v3574_v40 }
  0x39   :  { %644 = vmatpush.msrb.mxu3 %v3605_v55 }
  0x3b   :  { %645 = vmatpush.msrb.mxu3 %v3607_v56 }
  0x3d   :  { %646 = vmatpush.msrb.mxu3 %v3615_v59 }
  0x3f   :  { %647 = vmatpush.msrb.mxu3 %v3621_v60 }
  0x70   :  { %v172_v37 = vpop.permute.xlu2 %171 }
  0x71   :  { %vm186_vm4 = vcmp.eq.s32.totalorder %v172_v37, %v3548_v26 }
  0x78   :  { %v175_v42 = vpop.permute.xlu2 %174 }
  0x79   :  { %vm187_vm5 = vcmp.eq.s32.totalorder %v175_v42, %v3548_v26 }
  0x87   :  { %v166_v30 = vpop.permute.xlu1 %165 }
  0x88   :  { %v160_v27 = vpop.permute.xlu0 %159  ;;  %vm184_vm2 = vcmp.eq.s32.totalorder %v166_v30, %v3548_v26 }
  0x89   :  { %vm182_vm0 = vcmp.eq.s32.totalorder %v160_v27, %v3548_v26 }
  0x8a   :  { %2853 = vmatmul.msk.f32.vlgmr.msra.gmra.mxu0 %vm182_vm0, %v3379_v28 }
  0x8f   :  { %v169_v31 = vpop.permute.xlu1 %168 }
  0x90   :  { %v163_v29 = vpop.permute.xlu0 %162  ;;  %vm185_vm3 = vcmp.eq.s32.totalorder %v169_v31, %v3548_v26 }
  0x91   :  { %vm183_vm1 = vcmp.eq.s32.totalorder %v163_v29, %v3548_v26 }
  0x92   :  { %2854 = vmatmul.msk.f32.gmra.mxu0 %vm183_vm1, %v3379_v28 }
  0x97   :  { %v181_v44 = vpop.permute.xlu1 %180 }
  0x98   :  { %v178_v43 = vpop.permute.xlu0 %177  ;;  %vm189_vm7 = vcmp.eq.s32.totalorder %v181_v44, %v3548_v26 }
  0x99   :  { %vm188_vm6 = vcmp.eq.s32.totalorder %v178_v43, %v3548_v26 }
  0x9a   :  { %2855 = vmatmul.msk.f32.gmra.mxu0 %vm184_vm2, %v3379_v28 }
  0xa2   :  { %2856 = vmatmul.msk.f32.gmra.mxu0 %vm185_vm3, %v3379_v28 }
  0xa9   :  { %v454_v9 = vpop.f32.mrf.mxu3 }
  0xaa   :  { %2857 = vmatmul.msk.f32.gmra.mxu0 %vm186_vm4, %v3379_v28 }
  0xb2   :  { %2858 = vmatmul.msk.f32.gmra.mxu0 %vm187_vm5, %v3379_v28 }
  0xba   :  { %2859 = vmatmul.msk.f32.gmra.mxu0 %vm188_vm6, %v3379_v28 }
  0xc2   :  { %2860 = vmatmul.msk.f32.gmra.mxu0 %vm189_vm7, %v3379_v28 }
 0x107   :  { %v239_v49 = vpop.f32.mrf.mxu0 }
 0x108   :  { %v263_v50 = vmax.f32 %v239_v49, 0.0 }
 0x10a   :  { %2861 = vmatmul.msk.f32.vlgmr.msra.gmra.mxu1 %vm276_vm8, %v263_v50  ;;  %2869 = vmatmul.msk.f32.vlgmr.msra.gmra.mxu2 %vm276_vm8, %v263_v50 }
 0x10b   :  { %1188 = vmatpush.msra.mxu1 %v3605_v55  ;;  %1263 = vmatpush.msra.mxu2 %v3554_v32 }
 0x10d   :  { %1189 = vmatpush.msra.mxu1 %v3607_v56  ;;  %1264 = vmatpush.msra.mxu2 %v3556_v33 }
 0x10f   :  { %v242_v51 = vpop.f32.mrf.mxu0  ;;  %1190 = vmatpush.msra.mxu1 %v3615_v59  ;;  %1265 = vmatpush.msra.mxu2 %v3568_v38 }
 0x110   :  { %v264_v52 = vmax.f32 %v242_v51, 0.0 }
 0x111   :  { %1191 = vmatpush.msra.mxu1 %v3621_v60  ;;  %1266 = vmatpush.msra.mxu2 %v3574_v40 }
 0x112   :  { %2862 = vmatmul.msk.f32.gmra.mxu1 %vm276_vm8, %v264_v52  ;;  %2870 = vmatmul.msk.f32.gmra.mxu2 %vm276_vm8, %v264_v52 }
 0x117   :  { %v245_v53 = vpop.f32.mrf.mxu0 }
 0x118   :  { %v265_v54 = vmax.f32 %v245_v53, 0.0 }
 0x11a   :  { %2863 = vmatmul.msk.f32.gmra.mxu1 %vm276_vm8, %v265_v54  ;;  %2871 = vmatmul.msk.f32.gmra.mxu2 %vm276_vm8, %v265_v54 }
 0x11f   :  { %v248_v57 = vpop.f32.mrf.mxu0 }
 0x120   :  { %v266_v58 = vmax.f32 %v248_v57, 0.0 }
 0x122   :  { %2864 = vmatmul.msk.f32.gmra.mxu1 %vm276_vm8, %v266_v58  ;;  %2872 = vmatmul.msk.f32.gmra.mxu2 %vm276_vm8, %v266_v58 }
 0x127   :  { %v251_v61 = vpop.f32.mrf.mxu0 }
 0x128   :  { %v267_v62 = vmax.f32 %v251_v61, 0.0  ;;  %v513_v61 = vpop.f32.mrf.mxu3 }
 0x12a   :  { %2865 = vmatmul.msk.f32.gmra.mxu1 %vm276_vm8, %v267_v62  ;;  %2873 = vmatmul.msk.f32.gmra.mxu2 %vm276_vm8, %v267_v62 }
 0x12f   :  { %v254_v63 = vpop.f32.mrf.mxu0 }
 0x130   :  { %v268_v1 = vmax.f32 %v254_v63, 0.0 }
 0x132   :  { %2866 = vmatmul.msk.f32.gmra.mxu1 %vm276_vm8, %v268_v1  ;;  %2874 = vmatmul.msk.f32.gmra.mxu2 %vm276_vm8, %v268_v1 }
 0x137   :  { %v257_v2 = vpop.f32.mrf.mxu0 }
 0x138   :  { %v269_v3 = vmax.f32 %v257_v2, 0.0 }
 0x13a   :  { %2867 = vmatmul.msk.f32.gmra.mxu1 %vm276_vm8, %v269_v3  ;;  %2875 = vmatmul.msk.f32.gmra.mxu2 %vm276_vm8, %v269_v3 }
 0x13f   :  { %v260_v4 = vpop.f32.mrf.mxu0 }
 0x140   :  { %v270_v5 = vmax.f32 %v260_v4, 0.0 }
 0x142   :  { %2868 = vmatmul.msk.f32.gmra.mxu1 %vm276_vm8, %v270_v5  ;;  %2876 = vmatmul.msk.f32.gmra.mxu2 %vm276_vm8, %v270_v5 }
 0x187   :  { %v318_v8 = vpop.f32.mrf.mxu1 }
 0x188   :  { %v319_v10 = vadd.f32 %v318_v8, %v3651_v7 }
 0x18a   :  { %v457_v11 = vadd.f32 %v454_v9, %v319_v10 }
 0x18c   :  { %v2877_v13 = vmul.f32 -1.442695, %v457_v11 }
 0x18d   :  { %v359_v14 = vpop.f32.mrf.mxu2 }
 0x18e   :  { %2984 = vpow2.f32 %v2877_v13  ;;  %v3654_v15 = vadd.f32 %v359_v14, %v273_v12 }
 0x18f   :  { %v3656_v16 = vpop.f32.mrf.mxu1 }
 0x194   :  { %v2985_v17 = vpop.eup %2984 }
 0x195   :  { %v462_v18 = vadd.f32 1.0, %v2985_v17  ;;  %v362_v19 = vpop.f32.mrf.mxu2 }
 0x196   :  { %v3658_v20 = vadd.f32 %v362_v19, %v273_v12 }
 0x197   :  { %2986 = vrcp.f32 %v462_v18  ;;  %v3660_v21 = vpop.f32.mrf.mxu1  ;;  %v474_v29 = vand.u32 2147483648, %v462_v18  ;;  %v472_v31 = vand.u32 2147483647, %v462_v18  ;;  %vm468_vm13 = vweird.f32 %v462_v18 }
 0x198   :  { %2988 = vtanh.f32 %v457_v11 }
 0x199   :  { %v475_v37 = vor.u32 1.1754944e-38, %v474_v29  ;;  %vm473_vm15 = vcmp.eq.f32.partialorder %v472_v31, 8.507059e+37 }
 0x19d   :  { %v2987_v22 = vpop.eup %2986  ;;  %v365_v23 = vpop.f32.mrf.mxu2 }
 0x19e   :  { %v3662_v24 = vadd.f32 %v365_v23, %v273_v12  ;;  %v464_v25 = vmul.f32 %v2987_v22, %v462_v18  ;;  %vm469_vm11 = vweird.f32 %v2987_v22  ;;  %v2989_v43 = vpop.eup %2988  ;;  %v3701_v23 = vld [vmem:[%s4685_s1] sm:$0xff] }
 0x19f   :  { %v3664_v27 = vpop.f32.mrf.mxu1  ;;  %vm470_vm14 = vmor %vm468_vm13, %vm469_vm11  ;;  %vm383_vm4 = vcmp.gt.s32.totalorder %v3701_v23, 0  ;;  %vm425_vm5 = vcmp.gt.s32.totalorder %v3701_v23, 7 }
 0x1a0   :  { %v465_v28 = vsub.f32 1.0, %v464_v25  ;;  %v384_v25 = vsel %vm383_vm4, 1, %v3378_v0 }
 0x1a2   :  { %v466_v30 = vmul.f32 %v2987_v22, %v465_v28 }
 0x1a4   :  { %v467_v35 = vadd.f32 %v2987_v22, %v466_v30 }
 0x1a5   :  { %v368_v36 = vpop.f32.mrf.mxu2 }
 0x1a6   :  { %v3672_v39 = vadd.f32 %v368_v36, %v273_v12  ;;  %v471_v42 = vsel %vm470_vm14, %v2987_v22, %v467_v35 }
 0x1a7   :  { %v3674_v26 = vpop.f32.mrf.mxu1  ;;  %v476_v44 = vsel %vm473_vm15, %v475_v37, %v471_v42  ;;  %v426_v37 = vsel %vm425_vm5, 1, %v3378_v0 }
 0x1a8   :  { %v3678_v45 = vsel %vm3668_vm12, %v2989_v43, %v476_v44 }
 0x1a9   :  { %481 = vrot.lane.b32.xlu2 %v3678_v45, %s3381_s4  ;;  %v479_v30 = vmul.f32 0.0, %v3678_v45 }
 0x1ad   :  { %v371_v46 = vpop.f32.mrf.mxu2 }
 0x1ae   :  { %v3682_v47 = vadd.f32 %v371_v46, %v273_v12 }
 0x1af   :  { %v333_v48 = vpop.f32.mrf.mxu1 }
 0x1b0   :  { %v3685_v49 = vadd.f32 %v333_v48, %v3651_v7 }
 0x1b5   :  { %v374_v50 = vpop.f32.mrf.mxu2 }
 0x1b6   :  { %v3687_v51 = vadd.f32 %v374_v50, %v273_v12 }
 0x1b7   :  { %v336_v52 = vpop.f32.mrf.mxu1 }
 0x1b8   :  { %v3690_v53 = vadd.f32 %v336_v52, %v3651_v7 }
 0x1bd   :  { %v377_v54 = vpop.f32.mrf.mxu2 }
 0x1be   :  { %v3692_v57 = vadd.f32 %v377_v54, %v273_v12 }
 0x1c5   :  { %v380_v58 = vpop.f32.mrf.mxu2 }
 0x1c6   :  { %v381_v62 = vadd.f32 %v380_v58, %v273_v12 }
 0x1c8   :  { %v516_v63 = vadd.f32 %v513_v61, %v381_v62 }
 0x1ca   :  { %v2878_v1 = vmul.f32 -1.442695, %v516_v63 }
 0x1cc   :  { %2990 = vpow2.f32 %v2878_v1 }
 0x1d2   :  { %v2991_v2 = vpop.eup %2990 }
 0x1d3   :  { %v521_v3 = vadd.f32 1.0, %v2991_v2  ;;  %v322_v2 = vadd.f32 %v3656_v16, %v3651_v7 }
 0x1d5   :  { %2992 = vrcp.f32 %v521_v3  ;;  %v533_v8 = vand.u32 2147483648, %v521_v3  ;;  %v531_v10 = vand.u32 2147483647, %v521_v3  ;;  %vm527_vm1 = vweird.f32 %v521_v3 }
 0x1d6   :  { %2994 = vtanh.f32 %v516_v63 }
 0x1d7   :  { %v534_v13 = vor.u32 1.1754944e-38, %v533_v8  ;;  %vm532_vm3 = vcmp.eq.f32.partialorder %v531_v10, 8.507059e+37 }
 0x1db   :  { %v2993_v4 = vpop.eup %2992 }
 0x1dc   :  { %v523_v5 = vmul.f32 %v2993_v4, %v521_v3  ;;  %vm528_vm0 = vweird.f32 %v2993_v4  ;;  %v2995_v12 = vpop.eup %2994 }
 0x1dd   :  { %vm529_vm2 = vmor %vm527_vm1, %vm528_vm0 }
 0x1de   :  { %v524_v6 = vsub.f32 1.0, %v523_v5 }
 0x1e0   :  { %v525_v9 = vmul.f32 %v2993_v4, %v524_v6 }
 0x1e2   :  { %v526_v11 = vadd.f32 %v2993_v4, %v525_v9 }
 0x1e4   :  { %v530_v14 = vsel %vm529_vm2, %v2993_v4, %v526_v11  ;;  %vm389_vm2 = vcmp.gt.s32.totalorder %v3701_v23, 1 }
 0x1e5   :  { %v535_v17 = vsel %vm532_vm3, %v534_v13, %v530_v14  ;;  %vm419_vm3 = vcmp.gt.s32.totalorder %v3701_v23, 6 }
 0x1e6   :  { %v537_v18 = vsel %vm3668_vm12, %v2995_v12, %v535_v17 }
 0x1e7   :  { %540 = vrot.lane.b32.xlu0 %v537_v18, %s3381_s4  ;;  %v538_v42 = vmul.f32 0.0, %v537_v18 }
 0x203   :  { %v482_v19 = vpop.permute.xlu2 %481 }
 0x204   :  { %v484_v22 = vmul.f32 %v482_v19, %v3678_v45 }
 0x206   :  { %486 = vrot.lane.b32.xlu1 %v484_v22, %s3382_s25 }
 0x20e   :  { %386 = vperm.xlu1 %2982, %v384_v25  }
 0x259   :  { %v541_v28 = vpop.permute.xlu0 %540 }
 0x25a   :  { %v543_v29 = vmul.f32 %v541_v28, %v537_v18 }
 0x25c   :  { %545 = vrot.lane.b32.xlu2 %v543_v29, %s3382_s25 }
 0x278   :  { %v487_v31 = vpop.permute.xlu1 %486 }
 0x279   :  { %v3708_v35 = vadd.f32 %v487_v31, %v479_v30 }
 0x27b   :  { %2996 = vtanh.f32 %v3708_v35 }
 0x280   :  { %v3718_v48 = vpop.permute.xlu1 %386 }
 0x281   :  { %v2997_v36 = vpop.eup %2996  ;;  %vm4698_vm6 = vcmp.eq.s32.totalorder %v3718_v48, 1 }
 0x282   :  { %492 = vrot.lane.b32.xlu0 %v2997_v36, %s3381_s4 }
 0x28a   :  { %428 = vperm.xlu0 %2981, %v426_v37  }
 0x2b6   :  { %v546_v43 = vpop.permute.xlu2 %545 }
 0x2b7   :  { %v3714_v44 = vadd.f32 %v546_v43, %v538_v42 }
 0x2b9   :  { %2998 = vtanh.f32 %v3714_v44 }
 0x2bf   :  { %v2999_v46 = vpop.eup %2998 }
 0x2c0   :  { %551 = vrot.lane.b32.xlu2 %v2999_v46, %s3381_s4 }
 0x2f4   :  { %v493_v50 = vpop.permute.xlu0 %492 }
 0x2f5   :  { %v495_v52 = vmul.f32 %v493_v50, %v3678_v45 }
 0x2f7   :  { %v3724_v54 = vsel %vm4698_vm6, %v495_v52, 0.0 }
 0x2f8   :  { %560 = vrot.lane.b32.xlu1 %v3724_v54, %s3382_s25 }
 0x2fc   :  { %v3728_v58 = vpop.permute.xlu0 %428 }
 0x2fd   :  { %vm4697_vm7 = vcmp.eq.s32.totalorder %v3728_v58, 1 }
 0x31a   :  { %v552_v61 = vpop.permute.xlu2 %551 }
 0x31b   :  { %v554_v62 = vmul.f32 %v552_v61, %v537_v18 }
 0x31d   :  { %v3733_v63 = vsel %vm4697_vm7, %v554_v62, 0.0 }
 0x31e   :  { %565 = vrot.lane.b32.xlu2 %v3733_v63, %s3382_s25 }
 0x36a   :  { %v561_v45 = vpop.permute.xlu1 %560 }
 0x36b   :  { %563 = vst.msk [vmem:[#allocation2] sm:$0xff] %vm276_vm8, %v561_v45  ;;  %2879 = vmatmul.msk.f32.vlgmr.msra.gmra.mxu3 %vm276_vm8, %v561_v45 }
 0x36c   :  { %719 = vmatpush.msra.mxu3 %v3554_v32 }
 0x36e   :  { %720 = vmatpush.msra.mxu3 %v3556_v33 }
 0x370   :  { %721 = vmatpush.msra.mxu3 %v3568_v38 }
 0x372   :  { %722 = vmatpush.msra.mxu3 %v3574_v40 }
 0x378   :  { %v566_v1 = vpop.permute.xlu2 %565 }
 0x379   :  { %568 = vst.msk [vmem:[#allocation3 + $0x38] sm:$0xff] %vm276_vm8, %v566_v1  ;;  %2881 = vmatmul.msk.f32.vlgmr.msrb.gmra.mxu3 %vm276_vm8, %v566_v1 }
 0x37a   :  { %780 = vmatpush.msrb.mxu3 %v3605_v55 }
 0x37c   :  { %781 = vmatpush.msrb.mxu3 %v3607_v56 }
 0x37e   :  { %782 = vmatpush.msrb.mxu3 %v3615_v59 }
 0x380   :  { %783 = vmatpush.msrb.mxu3 %v3621_v60 }
 0x3ee   :  { %v588_v3 = vpop.f32.mrf.mxu3 }
 0x3ef   :  { %v591_v4 = vadd.f32 %v588_v3, %v322_v2 }
 0x3f1   :  { %v2880_v5 = vmul.f32 -1.442695, %v591_v4 }
 0x3f3   :  { %3000 = vpow2.f32 %v2880_v5  ;;  %v390_v5 = vsel %vm389_vm2, 1, %v3378_v0  ;;  %vm395_vm2 = vcmp.gt.s32.totalorder %v3701_v23, 2 }
 0x3f9   :  { %v3001_v6 = vpop.eup %3000 }
 0x3fa   :  { %v596_v8 = vadd.f32 1.0, %v3001_v6 }
 0x3fc   :  { %3002 = vrcp.f32 %v596_v8  ;;  %v649_v9 = vpop.f32.mrf.mxu3  ;;  %v608_v17 = vand.u32 2147483648, %v596_v8  ;;  %v606_v16 = vand.u32 2147483647, %v596_v8  ;;  %vm602_vm10 = vweird.f32 %v596_v8 }
 0x3fd   :  { %v652_v10 = vadd.f32 %v649_v9, %v3692_v57  ;;  %v3765_v9 = vsel %vm4698_vm6, %v3708_v35, 0.0  ;;  %v3777_v35 = vsel %vm4697_vm7, %v3714_v44, 0.0 }
 0x3fe   :  { %v609_v28 = vor.u32 1.1754944e-38, %v608_v17  ;;  %vm607_vm13 = vcmp.eq.f32.partialorder %v606_v16, 8.507059e+37 }
 0x3ff   :  { %v2882_v11 = vmul.f32 -1.442695, %v652_v10 }
 0x401   :  { %3004 = vpow2.f32 %v2882_v11 }
 0x402   :  { %v3003_v13 = vpop.eup %3002  ;;  %3006 = vtanh.f32 %v591_v4 }
 0x403   :  { %v598_v14 = vmul.f32 %v3003_v13, %v596_v8  ;;  %vm603_vm9 = vweird.f32 %v3003_v13 }
 0x404   :  { %vm604_vm11 = vmor %vm602_vm10, %vm603_vm9 }
 0x405   :  { %v599_v12 = vsub.f32 1.0, %v598_v14 }
 0x407   :  { %v3005_v18 = vpop.eup %3004  ;;  %v600_v19 = vmul.f32 %v3003_v13, %v599_v12  ;;  %v420_v12 = vsel %vm419_vm3, 1, %v3378_v0  ;;  %vm413_vm3 = vcmp.gt.s32.totalorder %v3701_v23, 5 }
 0x408   :  { %v657_v22 = vadd.f32 1.0, %v3005_v18  ;;  %v3007_v57 = vpop.eup %3006 }
 0x409   :  { %v601_v25 = vadd.f32 %v3003_v13, %v600_v19 }
 0x40a   :  { %3008 = vrcp.f32 %v657_v22  ;;  %v669_v43 = vand.u32 2147483648, %v657_v22  ;;  %v667_v50 = vand.u32 2147483647, %v657_v22  ;;  %vm663_vm15 = vweird.f32 %v657_v22 }
 0x40b   :  { %v605_v29 = vsel %vm604_vm11, %v3003_v13, %v601_v25  ;;  %3010 = vtanh.f32 %v652_v10 }
 0x40c   :  { %v610_v30 = vsel %vm607_vm13, %v609_v28, %v605_v29  ;;  %v670_v61 = vor.u32 1.1754944e-38, %v669_v43  ;;  %vm668_vm1 = vcmp.eq.f32.partialorder %v667_v50, 8.507059e+37 }
 0x40d   :  { %v612_v31 = vsel %vm3668_vm12, %v3007_v57, %v610_v30 }
 0x40e   :  { %615 = vrot.lane.b32.xlu0 %v612_v31, %s3381_s4  ;;  %v613_v10 = vmul.f32 %v612_v31, %v3765_v9 }
 0x410   :  { %v3009_v36 = vpop.eup %3008 }
 0x411   :  { %v659_v37 = vmul.f32 %v3009_v36, %v657_v22  ;;  %vm664_vm14 = vweird.f32 %v3009_v36  ;;  %v3011_v45 = vpop.eup %3010 }
 0x412   :  { %vm665_vm0 = vmor %vm663_vm15, %vm664_vm14 }
 0x413   :  { %v660_v42 = vsub.f32 1.0, %v659_v37 }
 0x415   :  { %v661_v46 = vmul.f32 %v3009_v36, %v660_v42 }
 0x417   :  { %v662_v52 = vadd.f32 %v3009_v36, %v661_v46 }
 0x419   :  { %v666_v62 = vsel %vm665_vm0, %v3009_v36, %v662_v52 }
 0x41a   :  { %v671_v1 = vsel %vm668_vm1, %v670_v61, %v666_v62 }
 0x41b   :  { %v673_v2 = vsel %vm3668_vm12, %v3011_v45, %v671_v1 }
 0x41c   :  { %676 = vrot.lane.b32.xlu1 %v673_v2, %s3381_s4  ;;  %v674_v17 = vmul.f32 %v673_v2, %v3777_v35 }
 0x480   :  { %v616_v3 = vpop.permute.xlu0 %615 }
 0x481   :  { %v618_v4 = vmul.f32 %v616_v3, %v612_v31 }
 0x483   :  { %620 = vrot.lane.b32.xlu2 %v618_v4, %s3382_s25 }
 0x48b   :  { %392 = vperm.xlu2 %2983, %v390_v5  }
 0x48e   :  { %v677_v6 = vpop.permute.xlu1 %676 }
 0x48f   :  { %v679_v8 = vmul.f32 %v677_v6, %v673_v2 }
 0x491   :  { %681 = vrot.lane.b32.xlu0 %v679_v8, %s3382_s25 }
 0x4dd   :  { %v621_v11 = vpop.permute.xlu2 %620 }
 0x4de   :  { %v3768_v13 = vadd.f32 %v621_v11, %v613_v10 }
 0x4e0   :  { %3012 = vtanh.f32 %v3768_v13 }
 0x4e5   :  { %v3784_v22 = vpop.permute.xlu2 %392 }
 0x4e6   :  { %v3013_v14 = vpop.eup %3012  ;;  %vm394_vm4 = vcmp.eq.s32.totalorder %v3784_v22, 1 }
 0x4e7   :  { %626 = vrot.lane.b32.xlu1 %v3013_v14, %s3381_s4 }
 0x4ef   :  { %422 = vperm.xlu1 %2982, %v420_v12  }
 0x503   :  { %v682_v18 = vpop.permute.xlu0 %681 }
 0x504   :  { %v3780_v19 = vadd.f32 %v682_v18, %v674_v17 }
 0x506   :  { %3014 = vtanh.f32 %v3780_v19 }
 0x50c   :  { %v3015_v16 = vpop.eup %3014 }
 0x50d   :  { %687 = vrot.lane.b32.xlu0 %v3015_v16, %s3381_s4 }
 0x559   :  { %v627_v25 = vpop.permute.xlu1 %626 }
 0x55a   :  { %v629_v28 = vmul.f32 %v627_v25, %v612_v31 }
 0x55c   :  { %v3790_v44 = vsel %vm394_vm4, %v629_v28, %v3724_v54 }
 0x55d   :  { %696 = vrot.lane.b32.xlu2 %v3790_v44, %s3382_s25 }
 0x561   :  { %v3794_v29 = vpop.permute.xlu1 %422 }
 0x562   :  { %vm424_vm5 = vcmp.eq.s32.totalorder %v3794_v29, 1 }
 0x57f   :  { %v688_v57 = vpop.permute.xlu0 %687 }
 0x580   :  { %v690_v30 = vmul.f32 %v688_v57, %v673_v2 }
 0x582   :  { %v3800_v31 = vsel %vm424_vm5, %v690_v30, %v3733_v63  ;;  %v325_v63 = vadd.f32 %v3660_v21, %v3651_v7 }
 0x583   :  { %701 = vrot.lane.b32.xlu0 %v3800_v31, %s3382_s25 }
 0x5b7   :  { %v697_v36 = vpop.permute.xlu2 %696 }
 0x5b8   :  { %699 = vst.msk [vmem:[#allocation2 + $0x8] sm:$0xff] %vm276_vm8, %v697_v36  ;;  %2883 = vmatmul.msk.f32.vlgmr.msra.gmra.mxu3 %vm276_vm8, %v697_v36 }
 0x5b9   :  { %855 = vmatpush.msra.mxu3 %v3554_v32 }
 0x5bb   :  { %856 = vmatpush.msra.mxu3 %v3556_v33 }
 0x5bd   :  { %857 = vmatpush.msra.mxu3 %v3568_v38 }
 0x5bf   :  { %858 = vmatpush.msra.mxu3 %v3574_v40 }
 0x5f5   :  { %v702_v54 = vpop.permute.xlu0 %701 }
 0x5f6   :  { %704 = vst.msk [vmem:[#allocation3 + $0x30] sm:$0xff] %vm276_vm8, %v702_v54  ;;  %2885 = vmatmul.msk.f32.vlgmr.msrb.gmra.mxu3 %vm276_vm8, %v702_v54 }
 0x5f7   :  { %916 = vmatpush.msrb.mxu3 %v3605_v55 }
 0x5f9   :  { %917 = vmatpush.msrb.mxu3 %v3607_v56 }
 0x5fb   :  { %918 = vmatpush.msrb.mxu3 %v3615_v59 }
 0x5fd   :  { %919 = vmatpush.msrb.mxu3 %v3621_v60 }
 0x63b   :  { %v724_v37 = vpop.f32.mrf.mxu3 }
 0x63c   :  { %v727_v42 = vadd.f32 %v724_v37, %v325_v63 }
 0x63e   :  { %v2884_v43 = vmul.f32 -1.442695, %v727_v42 }
 0x640   :  { %3016 = vpow2.f32 %v2884_v43 }
 0x646   :  { %v3017_v46 = vpop.eup %3016 }
 0x647   :  { %v732_v50 = vadd.f32 1.0, %v3017_v46 }
 0x649   :  { %3018 = vrcp.f32 %v732_v50  ;;  %v744_v45 = vand.u32 2147483648, %v732_v50  ;;  %v742_v2 = vand.u32 2147483647, %v732_v50  ;;  %vm738_vm10 = vweird.f32 %v732_v50 }
 0x64a   :  { %3020 = vtanh.f32 %v727_v42 }
 0x64b   :  { %v745_v4 = vor.u32 1.1754944e-38, %v744_v45  ;;  %vm743_vm13 = vcmp.eq.f32.partialorder %v742_v2, 8.507059e+37 }
 0x64f   :  { %v3019_v52 = vpop.eup %3018 }
 0x650   :  { %v734_v61 = vmul.f32 %v3019_v52, %v732_v50  ;;  %vm739_vm9 = vweird.f32 %v3019_v52  ;;  %v3021_v5 = vpop.eup %3020  ;;  %v396_v50 = vsel %vm395_vm2, 1, %v3378_v0 }
 0x651   :  { %vm740_vm11 = vmor %vm738_vm10, %vm739_vm9 }
 0x652   :  { %v735_v62 = vsub.f32 1.0, %v734_v61 }
 0x654   :  { %v736_v1 = vmul.f32 %v3019_v52, %v735_v62  ;;  %v3833_v62 = vsel %vm394_vm4, %v3768_v13, %v3765_v9  ;;  %v3846_v9 = vsel %vm424_vm5, %v3780_v19, %v3777_v35 }
 0x656   :  { %v737_v3 = vadd.f32 %v3019_v52, %v736_v1 }
 0x658   :  { %v741_v21 = vsel %vm740_vm11, %v3019_v52, %v737_v3 }
 0x659   :  { %v746_v6 = vsel %vm743_vm13, %v745_v4, %v741_v21  ;;  %v414_v4 = vsel %vm413_vm3, 1, %v3378_v0 }
 0x65a   :  { %v748_v8 = vsel %vm3668_vm12, %v3021_v5, %v746_v6 }
 0x65b   :  { %751 = vrot.lane.b32.xlu1 %v748_v8, %s3381_s4  ;;  %v749_v45 = vmul.f32 %v748_v8, %v3833_v62 }
 0x679   :  { %v785_v10 = vpop.f32.mrf.mxu3 }
 0x67a   :  { %v788_v11 = vadd.f32 %v785_v10, %v3687_v51 }
 0x67c   :  { %v2886_v14 = vmul.f32 -1.442695, %v788_v11 }
 0x67e   :  { %3022 = vpow2.f32 %v2886_v14 }
 0x684   :  { %v3023_v12 = vpop.eup %3022 }
 0x685   :  { %v793_v17 = vadd.f32 1.0, %v3023_v12 }
 0x687   :  { %3024 = vrcp.f32 %v793_v17  ;;  %v805_v28 = vand.u32 2147483648, %v793_v17  ;;  %v803_v30 = vand.u32 2147483647, %v793_v17  ;;  %vm799_vm15 = vweird.f32 %v793_v17 }
 0x688   :  { %3026 = vtanh.f32 %v788_v11 }
 0x689   :  { %v806_v54 = vor.u32 1.1754944e-38, %v805_v28  ;;  %vm804_vm1 = vcmp.eq.f32.partialorder %v803_v30, 8.507059e+37 }
 0x68d   :  { %v3025_v18 = vpop.eup %3024 }
 0x68e   :  { %v795_v16 = vmul.f32 %v3025_v18, %v793_v17  ;;  %vm800_vm14 = vweird.f32 %v3025_v18  ;;  %v3027_v51 = vpop.eup %3026 }
 0x68f   :  { %vm801_vm0 = vmor %vm799_vm15, %vm800_vm14 }
 0x690   :  { %v796_v25 = vsub.f32 1.0, %v795_v16 }
 0x692   :  { %v797_v57 = vmul.f32 %v3025_v18, %v796_v25 }
 0x694   :  { %v798_v36 = vadd.f32 %v3025_v18, %v797_v57 }
 0x696   :  { %v802_v63 = vsel %vm801_vm0, %v3025_v18, %v798_v36 }
 0x697   :  { %v807_v37 = vsel %vm804_vm1, %v806_v54, %v802_v63 }
 0x698   :  { %v809_v42 = vsel %vm3668_vm12, %v3027_v51, %v807_v37 }
 0x699   :  { %812 = vrot.lane.b32.xlu2 %v809_v42, %s3381_s4  ;;  %v810_v13 = vmul.f32 %v809_v42, %v3846_v9 }
 0x6cd   :  { %v752_v43 = vpop.permute.xlu1 %751 }
 0x6ce   :  { %v754_v46 = vmul.f32 %v752_v43, %v748_v8 }
 0x6d0   :  { %756 = vrot.lane.b32.xlu0 %v754_v46, %s3382_s25 }
 0x6d8   :  { %398 = vperm.xlu0 %2981, %v396_v50  }
 0x6f3   :  { %v813_v52 = vpop.permute.xlu2 %812 }
 0x6f4   :  { %v815_v61 = vmul.f32 %v813_v52, %v809_v42 }
 0x6f6   :  { %817 = vrot.lane.b32.xlu1 %v815_v61, %s3382_s25 }
 0x742   :  { %v757_v1 = vpop.permute.xlu0 %756 }
 0x743   :  { %v3836_v2 = vadd.f32 %v757_v1, %v749_v45 }
 0x745   :  { %3028 = vtanh.f32 %v3836_v2 }
 0x74a   :  { %v3853_v10 = vpop.permute.xlu0 %398 }
 0x74b   :  { %v3029_v3 = vpop.eup %3028  ;;  %vm400_vm9 = vcmp.eq.s32.totalorder %v3853_v10, 1 }
 0x74c   :  { %762 = vrot.lane.b32.xlu2 %v3029_v3, %s3381_s4 }
 0x754   :  { %416 = vperm.xlu2 %2983, %v414_v4  }
 0x768   :  { %v818_v21 = vpop.permute.xlu1 %817 }
 0x769   :  { %v3849_v5 = vadd.f32 %v818_v21, %v810_v13 }
 0x76b   :  { %3030 = vtanh.f32 %v3849_v5 }
 0x771   :  { %v3031_v6 = vpop.eup %3030 }
 0x772   :  { %823 = vrot.lane.b32.xlu1 %v3031_v6, %s3381_s4 }
 0x7a6   :  { %v763_v11 = vpop.permute.xlu2 %762 }
 0x7a7   :  { %v765_v14 = vmul.f32 %v763_v11, %v748_v8 }
 0x7a9   :  { %v3859_v35 = vsel %vm400_vm9, %v765_v14, %v3790_v44 }
 0x7aa   :  { %832 = vrot.lane.b32.xlu0 %v3859_v35, %s3382_s25 }
 0x7ae   :  { %v3863_v19 = vpop.permute.xlu2 %416 }
 0x7af   :  { %vm418_vm10 = vcmp.eq.s32.totalorder %v3863_v19, 1 }
 0x7e4   :  { %v824_v12 = vpop.permute.xlu1 %823 }
 0x7e5   :  { %v826_v17 = vmul.f32 %v824_v12, %v809_v42 }
 0x7e7   :  { %v3869_v8 = vsel %vm418_vm10, %v826_v17, %v3800_v31 }
 0x7e8   :  { %837 = vrot.lane.b32.xlu1 %v3869_v8, %s3382_s25 }
 0x81c   :  { %v833_v18 = vpop.permute.xlu0 %832 }
 0x81d   :  { %835 = vst.msk [vmem:[#allocation2 + $0x10] sm:$0xff] %vm276_vm8, %v833_v18  ;;  %2887 = vmatmul.msk.f32.vlgmr.msra.gmra.mxu3 %vm276_vm8, %v833_v18 }
 0x81e   :  { %1127 = vmatpush.msra.mxu3 %v3554_v32  ;;  %v328_v32 = vadd.f32 %v3664_v27, %v3651_v7 }
 0x820   :  { %1128 = vmatpush.msra.mxu3 %v3556_v33 }
 0x822   :  { %1129 = vmatpush.msra.mxu3 %v3568_v38 }
 0x824   :  { %1130 = vmatpush.msra.mxu3 %v3574_v40 }
 0x85a   :  { %v838_v44 = vpop.permute.xlu1 %837 }
 0x85b   :  { %840 = vst.msk [vmem:[#allocation3 + $0x28] sm:$0xff] %vm276_vm8, %v838_v44  ;;  %2889 = vmatmul.msk.f32.vlgmr.msrb.gmra.mxu3 %vm276_vm8, %v838_v44 }
 0x85c   :  { %1324 = vmatpush.msrb.mxu3 %v3605_v55 }
 0x85e   :  { %1325 = vmatpush.msrb.mxu3 %v3607_v56 }
 0x860   :  { %1326 = vmatpush.msrb.mxu3 %v3615_v59 }
 0x862   :  { %1327 = vmatpush.msrb.mxu3 %v3621_v60 }
 0x8a0   :  { %v860_v33 = vpop.f32.mrf.mxu3 }
 0x8a1   :  { %v863_v38 = vadd.f32 %v860_v33, %v328_v32 }
 0x8a3   :  { %v2888_v31 = vmul.f32 -1.442695, %v863_v38 }
 0x8a5   :  { %3032 = vpow2.f32 %v2888_v31 }
 0x8ab   :  { %v3033_v40 = vpop.eup %3032 }
 0x8ac   :  { %v868_v16 = vadd.f32 1.0, %v3033_v40 }
 0x8ae   :  { %3034 = vrcp.f32 %v868_v16  ;;  %v880_v30 = vand.u32 2147483648, %v868_v16  ;;  %v878_v54 = vand.u32 2147483647, %v868_v16  ;;  %vm874_vm13 = vweird.f32 %v868_v16 }
 0x8af   :  { %3036 = vtanh.f32 %v863_v38 }
 0x8b0   :  { %v881_v51 = vor.u32 1.1754944e-38, %v880_v30  ;;  %vm879_vm15 = vcmp.eq.f32.partialorder %v878_v54, 8.507059e+37 }
 0x8b4   :  { %v3035_v25 = vpop.eup %3034 }
 0x8b5   :  { %v870_v28 = vmul.f32 %v3035_v25, %v868_v16  ;;  %vm875_vm11 = vweird.f32 %v3035_v25  ;;  %v3037_v37 = vpop.eup %3036  ;;  %v3904_v16 = vsel %vm400_vm9, %v3836_v2, %v3833_v62 }
 0x8b6   :  { %vm876_vm14 = vmor %vm874_vm13, %vm875_vm11  ;;  %vm401_vm11 = vcmp.gt.s32.totalorder %v3701_v23, 3  ;;  %vm407_vm13 = vcmp.gt.s32.totalorder %v3701_v23, 4 }
 0x8b7   :  { %v871_v57 = vsub.f32 1.0, %v870_v28  ;;  %v402_v33 = vsel %vm401_vm11, 1, %v3378_v0  ;;  %v408_v40 = vsel %vm407_vm13, 1, %v3378_v0  ;;  %v3915_v0 = vsel %vm418_vm10, %v3849_v5, %v3846_v9 }
 0x8b9   :  { %v872_v36 = vmul.f32 %v3035_v25, %v871_v57 }
 0x8bb   :  { %v873_v63 = vadd.f32 %v3035_v25, %v872_v36 }
 0x8bd   :  { %v877_v27 = vsel %vm876_vm14, %v3035_v25, %v873_v63 }
 0x8be   :  { %v882_v42 = vsel %vm879_vm15, %v881_v51, %v877_v27 }
 0x8bf   :  { %v884_v43 = vsel %vm3668_vm12, %v3037_v37, %v882_v42 }
 0x8c0   :  { %887 = vrot.lane.b32.xlu1 %v884_v43, %s3381_s4  ;;  %v885_v25 = vmul.f32 %v884_v43, %v3904_v16 }
 0x8de   :  { %v921_v46 = vpop.f32.mrf.mxu3 }
 0x8df   :  { %v924_v50 = vadd.f32 %v921_v46, %v3682_v47 }
 0x8e1   :  { %v2890_v52 = vmul.f32 -1.442695, %v924_v50 }
 0x8e3   :  { %3038 = vpow2.f32 %v2890_v52  ;;  %v3243_v52 = vld [vmem:[#allocation4] sm:$0xff] }
 0x8e9   :  { %v3039_v61 = vpop.eup %3038 }
 0x8ea   :  { %v929_v45 = vadd.f32 1.0, %v3039_v61 }
 0x8ec   :  { %3040 = vrcp.f32 %v929_v45  ;;  %v941_v13 = vand.u32 2147483648, %v929_v45  ;;  %v939_v6 = vand.u32 2147483647, %v929_v45  ;;  %vm935_vm1 = vweird.f32 %v929_v45 }
 0x8ed   :  { %3042 = vtanh.f32 %v924_v50  ;;  %v3242_v50 = vld [vmem:[#allocation4 + $0x8] sm:$0xff] }
 0x8ee   :  { %v942_v14 = vor.u32 1.1754944e-38, %v941_v13  ;;  %vm940_vm3 = vcmp.eq.f32.partialorder %v939_v6, 8.507059e+37 }
 0x8f2   :  { %v3041_v1 = vpop.eup %3040 }
 0x8f3   :  { %v931_v3 = vmul.f32 %v3041_v1, %v929_v45  ;;  %vm936_vm0 = vweird.f32 %v3041_v1  ;;  %v3043_v47 = vpop.eup %3042 }
 0x8f4   :  { %vm937_vm2 = vmor %vm935_vm1, %vm936_vm0 }
 0x8f5   :  { %v932_v4 = vsub.f32 1.0, %v931_v3 }
 0x8f7   :  { %v933_v21 = vmul.f32 %v3041_v1, %v932_v4 }
 0x8f9   :  { %v934_v11 = vadd.f32 %v3041_v1, %v933_v21 }
 0x8fb   :  { %v938_v12 = vsel %vm937_vm2, %v3041_v1, %v934_v11 }
 0x8fc   :  { %v943_v17 = vsel %vm940_vm3, %v942_v14, %v938_v12 }
 0x8fd   :  { %v945_v18 = vsel %vm3668_vm12, %v3043_v47, %v943_v17 }
 0x8fe   :  { %948 = vrot.lane.b32.xlu2 %v945_v18, %s3381_s4  ;;  %v946_v23 = vmul.f32 %v945_v18, %v3915_v0 }
 0x932   :  { %v888_v44 = vpop.permute.xlu1 %887 }
 0x933   :  { %v890_v32 = vmul.f32 %v888_v44, %v884_v43 }
 0x935   :  { %892 = vrot.lane.b32.xlu1 %v890_v32, %s3382_s25 }
 0x93d   :  { %404 = vperm.xlu1 %2982, %v402_v33  }
 0x958   :  { %v949_v38 = vpop.permute.xlu2 %948 }
 0x959   :  { %v951_v31 = vmul.f32 %v949_v38, %v945_v18 }
 0x95b   :  { %953 = vrot.lane.b32.xlu0 %v951_v31, %s3382_s25 }
 0x963   :  { %410 = vperm.xlu0 %2981, %v408_v40  }
 0x9a7   :  { %v893_v28 = vpop.permute.xlu1 %892 }
 0x9a8   :  { %v3907_v57 = vadd.f32 %v893_v28, %v885_v25 }
 0x9aa   :  { %3044 = vtanh.f32 %v3907_v57 }
 0x9af   :  { %v3932_v27 = vpop.permute.xlu1 %404 }
 0x9b0   :  { %v3045_v30 = vpop.eup %3044  ;;  %vm406_vm15 = vcmp.eq.s32.totalorder %v3932_v27, 1 }
 0x9b1   :  { %898 = vrot.lane.b32.xlu0 %v3045_v30, %s3381_s4 }
 0x9cd   :  { %v954_v62 = vpop.permute.xlu0 %953 }
 0x9ce   :  { %v3918_v2 = vadd.f32 %v954_v62, %v946_v23 }
 0x9d0   :  { %3046 = vtanh.f32 %v3918_v2 }
 0x9d5   :  { %v3922_v54 = vpop.permute.xlu0 %410 }
 0x9d6   :  { %v3047_v36 = vpop.eup %3046  ;;  %vm412_vm14 = vcmp.eq.s32.totalorder %v3922_v54, 1 }
 0x9d7   :  { %959 = vrot.lane.b32.xlu2 %v3047_v36, %s3381_s4 }
 0xa23   :  { %v899_v5 = vpop.permute.xlu0 %898 }
 0xa24   :  { %v901_v37 = vmul.f32 %v899_v5, %v884_v43  ;;  %v3241_v43 = vld [vmem:[#allocation4 + $0x10] sm:$0xff] }
 0xa26   :  { %v3938_v42 = vsel %vm406_vm15, %v901_v37, %v3859_v35  ;;  %v3240_v35 = vld [vmem:[#allocation4 + $0x18] sm:$0xff] }
 0xa31   :  { %v960_v63 = vpop.permute.xlu2 %959 }
 0xa32   :  { %v962_v51 = vmul.f32 %v960_v63, %v945_v18 }
 0xa34   :  { %v3928_v9 = vsel %vm412_vm14, %v962_v51, %v3869_v8 }
 0xa35   :  { %973 = vrot.lane.b32.xlu2 %v3928_v9, %s3382_s25 }
 0xa3d   :  { %968 = vrot.lane.b32.xlu2 %v3938_v42, %s3382_s25 }
 0xa8f   :  { %v974_v46 = vpop.permute.xlu2 %973 }
 0xa90   :  { %976 = vst.msk [vmem:[#allocation3 + $0x20] sm:$0xff] %vm276_vm8, %v974_v46  ;;  %2893 = vmatmul.msk.f32.vlgmr.msrb.gmra.mxu2 %vm276_vm8, %v974_v46 }
 0xa91   :  { %1460 = vmatpush.msrb.mxu2 %v3605_v55  ;;  %v3950_v55 = vpop.f32.mrf.mxu1 }
 0xa93   :  { %1461 = vmatpush.msrb.mxu2 %v3607_v56 }
 0xa95   :  { %1462 = vmatpush.msrb.mxu2 %v3615_v59  ;;  %v331_v59 = vadd.f32 %v3674_v26, %v3651_v7 }
 0xa97   :  { %v969_v8 = vpop.permute.xlu2 %968  ;;  %1463 = vmatpush.msrb.mxu2 %v3621_v60 }
 0xa98   :  { %971 = vst.msk [vmem:[#allocation2 + $0x18] sm:$0xff] %vm276_vm8, %v969_v8  ;;  %2891 = vmatmul.msk.f32.vlgmr.msrb.gmra.mxu1 %vm276_vm8, %v969_v8 }
 0xa99   :  { %1399 = vmatpush.msrb.mxu1 %v3240_v35 }
 0xa9b   :  { %1400 = vmatpush.msrb.mxu1 %v3241_v43 }
 0xa9d   :  { %1401 = vmatpush.msrb.mxu1 %v3242_v50  ;;  %v3967_v50 = vsel %vm412_vm14, %v3918_v2, %v3915_v0 }
 0xa9f   :  { %1402 = vmatpush.msrb.mxu1 %v3243_v52 }
 0xb13   :  { %v1057_v56 = vpop.f32.mrf.mxu2 }
 0xb14   :  { %v1060_v60 = vadd.f32 %v1057_v56, %v3672_v39 }
 0xb15   :  { %v996_v61 = vpop.f32.mrf.mxu1 }
 0xb16   :  { %v2894_v45 = vmul.f32 -1.442695, %v1060_v60  ;;  %v999_v1 = vadd.f32 %v996_v61, %v331_v59 }
 0xb18   :  { %3048 = vpow2.f32 %v2894_v45  ;;  %v2892_v3 = vmul.f32 -1.442695, %v999_v1 }
 0xb1a   :  { %3050 = vpow2.f32 %v2892_v3 }
 0xb1e   :  { %v3049_v4 = vpop.eup %3048 }
 0xb1f   :  { %v1065_v13 = vadd.f32 1.0, %v3049_v4 }
 0xb20   :  { %v3051_v21 = vpop.eup %3050 }
 0xb21   :  { %3052 = vrcp.f32 %v1065_v13  ;;  %v1004_v6 = vadd.f32 1.0, %v3051_v21  ;;  %v1077_v26 = vand.u32 2147483648, %v1065_v13  ;;  %v1075_v18 = vand.u32 2147483647, %v1065_v13 }
 0xb22   :  { %vm1071_vm1 = vweird.f32 %v1065_v13 }
 0xb23   :  { %3054 = vrcp.f32 %v1004_v6  ;;  %v1016_v32 = vand.u32 2147483648, %v1004_v6  ;;  %v1014_v31 = vand.u32 2147483647, %v1004_v6  ;;  %v1078_v40 = vor.u32 1.1754944e-38, %v1077_v26 }
 0xb24   :  { %3056 = vtanh.f32 %v1060_v60  ;;  %vm1076_vm11 = vcmp.eq.f32.partialorder %v1075_v18, 8.507059e+37  ;;  %vm1010_vm13 = vweird.f32 %v1004_v6  ;;  %v3977_v60 = vsel %vm406_vm15, %v3907_v57, %v3904_v16 }
 0xb25   :  { %3058 = vtanh.f32 %v999_v1  ;;  %v1017_v62 = vor.u32 1.1754944e-38, %v1016_v32  ;;  %vm1015_vm6 = vcmp.eq.f32.partialorder %v1014_v31, 8.507059e+37 }
 0xb27   :  { %v3053_v11 = vpop.eup %3052 }
 0xb28   :  { %v1067_v14 = vmul.f32 %v3053_v11, %v1065_v13  ;;  %vm1072_vm0 = vweird.f32 %v3053_v11 }
 0xb29   :  { %v3055_v12 = vpop.eup %3054  ;;  %vm1073_vm3 = vmor %vm1071_vm1, %vm1072_vm0 }
 0xb2a   :  { %v1068_v47 = vsub.f32 1.0, %v1067_v14  ;;  %v1006_v17 = vmul.f32 %v3055_v12, %v1004_v6  ;;  %vm1011_vm2 = vweird.f32 %v3055_v12  ;;  %v3057_v30 = vpop.eup %3056 }
 0xb2b   :  { %vm1012_vm7 = vmor %vm1010_vm13, %vm1011_vm2  ;;  %v3059_v51 = vpop.eup %3058 }
 0xb2c   :  { %v1069_v39 = vmul.f32 %v3053_v11, %v1068_v47  ;;  %v1007_v44 = vsub.f32 1.0, %v1006_v17 }
 0xb2e   :  { %v1070_v33 = vadd.f32 %v3053_v11, %v1069_v39  ;;  %v1008_v38 = vmul.f32 %v3055_v12, %v1007_v44 }
 0xb30   :  { %v1074_v25 = vsel %vm1073_vm3, %v3053_v11, %v1070_v33  ;;  %v1009_v28 = vadd.f32 %v3055_v12, %v1008_v38 }
 0xb31   :  { %v1079_v23 = vsel %vm1076_vm11, %v1078_v40, %v1074_v25 }
 0xb32   :  { %v1081_v36 = vsel %vm3668_vm12, %v3057_v30, %v1079_v23  ;;  %v1013_v63 = vsel %vm1012_vm7, %v3055_v12, %v1009_v28 }
 0xb33   :  { %1084 = vrot.lane.b32.xlu0 %v1081_v36, %s3381_s4  ;;  %v1018_v5 = vsel %vm1015_vm6, %v1017_v62, %v1013_v63  ;;  %v1082_v52 = vmul.f32 %v1081_v36, %v3967_v50 }
 0xb34   :  { %v1020_v37 = vsel %vm3668_vm12, %v3059_v51, %v1018_v5 }
 0xb35   :  { %1023 = vrot.lane.b32.xlu2 %v1020_v37, %s3381_s4  ;;  %v1021_v61 = vmul.f32 %v1020_v37, %v3977_v60 }
 0xb8f   :  { %v1024_v35 = vpop.permute.xlu2 %1023 }
 0xb90   :  { %v1026_v43 = vmul.f32 %v1024_v35, %v1020_v37 }
 0xba5   :  { %v1085_v46 = vpop.permute.xlu0 %1084 }
 0xba6   :  { %v1087_v8 = vmul.f32 %v1085_v46, %v1081_v36 }
 0xba8   :  { %1089 = vrot.lane.b32.xlu1 %v1087_v8, %s3382_s25 }
 0xbb0   :  { %1028 = vrot.lane.b32.xlu1 %v1026_v43, %s3382_s25 }
 0xc1a   :  { %v1090_v56 = vpop.permute.xlu1 %1089 }
 0xc1b   :  { %v3970_v59 = vadd.f32 %v1090_v56, %v1082_v52 }
 0xc1d   :  { %3060 = vtanh.f32 %v3970_v59 }
 0xc22   :  { %v1029_v45 = vpop.permute.xlu1 %1028 }
 0xc23   :  { %v3061_v1 = vpop.eup %3060  ;;  %v3980_v3 = vadd.f32 %v1029_v45, %v1021_v61 }
 0xc24   :  { %1095 = vrot.lane.b32.xlu0 %v3061_v1, %s3381_s4 }
 0xc25   :  { %3062 = vtanh.f32 %v3980_v3 }
 0xc2b   :  { %v3063_v0 = vpop.eup %3062 }
 0xc2c   :  { %1034 = vrot.lane.b32.xlu0 %v3063_v0, %s3381_s4 }
 0xc96   :  { %v1096_v2 = vpop.permute.xlu0 %1095 }
 0xc97   :  { %v1098_v4 = vmul.f32 %v1096_v2, %v1081_v36 }
 0xc99   :  { %v3988_v16 = vsel %vm406_vm15, %v1098_v4, %v3928_v9  ;;  %v4017_v4 = vsel %vm406_vm15, %v3970_v59, %v3967_v50 }
 0xc9a   :  { %1109 = vrot.lane.b32.xlu2 %v3988_v16, %s3382_s25 }
 0xc9e   :  { %v1035_v57 = vpop.permute.xlu0 %1034 }
 0xc9f   :  { %v1037_v13 = vmul.f32 %v1035_v57, %v1020_v37 }
 0xca1   :  { %v3995_v21 = vsel %vm412_vm14, %v1037_v13, %v3938_v42 }
 0xca2   :  { %1104 = vrot.lane.b32.xlu1 %v3995_v21, %s3382_s25 }
 0xcf4   :  { %v1110_v6 = vpop.permute.xlu2 %1109 }
 0xcf5   :  { %1112 = vst.msk [vmem:[#allocation3 + $0x18] sm:$0xff] %vm276_vm8, %v1110_v6  ;;  %2897 = vmatmul.msk.f32.vlgmr.msra.gmra.mxu1 %vm276_vm8, %v1110_v6 }
 0xd14   :  { %v1105_v9 = vpop.permute.xlu1 %1104 }
 0xd15   :  { %1107 = vst.msk [vmem:[#allocation2 + $0x20] sm:$0xff] %vm276_vm8, %v1105_v9  ;;  %2895 = vmatmul.msk.f32.vlgmr.msra.gmra.mxu3 %vm276_vm8, %v1105_v9 }
 0xd72   :  { %v1193_v11 = vpop.f32.mrf.mxu1 }
 0xd73   :  { %v1196_v14 = vadd.f32 %v1193_v11, %v3662_v24  ;;  %v4028_v11 = vsel %vm412_vm14, %v3980_v3, %v3977_v60 }
 0xd75   :  { %v2898_v12 = vmul.f32 -1.442695, %v1196_v14 }
 0xd77   :  { %3064 = vpow2.f32 %v2898_v12 }
 0xd7d   :  { %v3065_v42 = vpop.eup %3064 }
 0xd7e   :  { %v1201_v47 = vadd.f32 1.0, %v3065_v42 }
 0xd80   :  { %3066 = vrcp.f32 %v1201_v47  ;;  %v1213_v18 = vand.u32 2147483648, %v1201_v47  ;;  %v1211_v32 = vand.u32 2147483647, %v1201_v47  ;;  %vm1207_vm7 = vweird.f32 %v1201_v47 }
 0xd81   :  { %3068 = vtanh.f32 %v1196_v14 }
 0xd82   :  { %v1214_v38 = vor.u32 1.1754944e-38, %v1213_v18  ;;  %vm1212_vm1 = vcmp.eq.f32.partialorder %v1211_v32, 8.507059e+37 }
 0xd86   :  { %v3067_v17 = vpop.eup %3066 }
 0xd87   :  { %v1203_v26 = vmul.f32 %v3067_v17, %v1201_v47  ;;  %vm1208_vm6 = vweird.f32 %v3067_v17  ;;  %v3069_v24 = vpop.eup %3068 }
 0xd88   :  { %vm1209_vm0 = vmor %vm1207_vm7, %vm1208_vm6 }
 0xd89   :  { %v1204_v39 = vsub.f32 1.0, %v1203_v26 }
 0xd8b   :  { %v1205_v44 = vmul.f32 %v3067_v17, %v1204_v39 }
 0xd8d   :  { %v1206_v33 = vadd.f32 %v3067_v17, %v1205_v44 }
 0xd8f   :  { %v1210_v31 = vsel %vm1209_vm0, %v3067_v17, %v1206_v33 }
 0xd90   :  { %v1215_v40 = vsel %vm1212_vm1, %v1214_v38, %v1210_v31 }
 0xd91   :  { %v1217_v25 = vsel %vm3668_vm12, %v3069_v24, %v1215_v40 }
 0xd92   :  { %1220 = vrot.lane.b32.xlu2 %v1217_v25, %s3381_s4  ;;  %v1218_v57 = vmul.f32 %v1217_v25, %v4017_v4 }
 0xd98   :  { %v1132_v28 = vpop.f32.mrf.mxu3 }
 0xd99   :  { %v1135_v30 = vadd.f32 %v1132_v28, %v3685_v49 }
 0xd9b   :  { %v2896_v23 = vmul.f32 -1.442695, %v1135_v30 }
 0xd9d   :  { %3070 = vpow2.f32 %v2896_v23 }
 0xda3   :  { %v3071_v62 = vpop.eup %3070 }
 0xda4   :  { %v1140_v36 = vadd.f32 1.0, %v3071_v62 }
 0xda6   :  { %3072 = vrcp.f32 %v1140_v36  ;;  %v1152_v37 = vand.u32 2147483648, %v1140_v36  ;;  %v1150_v8 = vand.u32 2147483647, %v1140_v36  ;;  %vm1146_vm3 = vweird.f32 %v1140_v36 }
 0xda7   :  { %3074 = vtanh.f32 %v1135_v30 }
 0xda8   :  { %v1153_v43 = vor.u32 1.1754944e-38, %v1152_v37  ;;  %vm1151_vm13 = vcmp.eq.f32.partialorder %v1150_v8, 8.507059e+37 }
 0xdac   :  { %v3073_v63 = vpop.eup %3072 }
 0xdad   :  { %v1142_v51 = vmul.f32 %v3073_v63, %v1140_v36  ;;  %vm1147_vm2 = vweird.f32 %v3073_v63  ;;  %v3075_v49 = vpop.eup %3074 }
 0xdae   :  { %vm1148_vm11 = vmor %vm1146_vm3, %vm1147_vm2 }
 0xdaf   :  { %v1143_v5 = vsub.f32 1.0, %v1142_v51 }
 0xdb1   :  { %v1144_v46 = vmul.f32 %v3073_v63, %v1143_v5 }
 0xdb3   :  { %v1145_v35 = vadd.f32 %v3073_v63, %v1144_v46 }
 0xdb5   :  { %v1149_v52 = vsel %vm1148_vm11, %v3073_v63, %v1145_v35 }
 0xdb6   :  { %v1154_v56 = vsel %vm1151_vm13, %v1153_v43, %v1149_v52 }
 0xdb7   :  { %v1156_v61 = vsel %vm3668_vm12, %v3075_v49, %v1154_v56 }
 0xdb8   :  { %1159 = vrot.lane.b32.xlu1 %v1156_v61, %s3381_s4  ;;  %v1157_v14 = vmul.f32 %v1156_v61, %v4028_v11 }
 0xdec   :  { %v1221_v45 = vpop.permute.xlu2 %1220 }
 0xded   :  { %v1223_v1 = vmul.f32 %v1221_v45, %v1217_v25 }
 0xdef   :  { %1225 = vrot.lane.b32.xlu0 %v1223_v1, %s3382_s25 }
 0xe2a   :  { %v1160_v0 = vpop.permute.xlu1 %1159 }
 0xe2b   :  { %v1162_v2 = vmul.f32 %v1160_v0, %v1156_v61 }
 0xe2d   :  { %1164 = vrot.lane.b32.xlu0 %v1162_v2, %s3382_s25 }
 0xe61   :  { %v1226_v13 = vpop.permute.xlu0 %1225 }
 0xe62   :  { %v4020_v6 = vadd.f32 %v1226_v13, %v1218_v57 }
 0xe64   :  { %3076 = vtanh.f32 %v4020_v6 }
 0xe6a   :  { %v3077_v9 = vpop.eup %3076 }
 0xe6b   :  { %1231 = vrot.lane.b32.xlu2 %v3077_v9, %s3381_s4 }
 0xe9f   :  { %v1165_v50 = vpop.permute.xlu0 %1164 }
 0xea0   :  { %v4031_v59 = vadd.f32 %v1165_v50, %v1157_v14 }
 0xea2   :  { %3078 = vtanh.f32 %v4031_v59 }
 0xea8   :  { %v3079_v12 = vpop.eup %3078 }
 0xea9   :  { %1170 = vrot.lane.b32.xlu2 %v3079_v12, %s3381_s4  ;;  %v4067_v12 = vsel %vm400_vm9, %v4020_v6, %v4017_v4 }
 0xec5   :  { %v1232_v42 = vpop.permute.xlu2 %1231 }
 0xec6   :  { %v1234_v47 = vmul.f32 %v1232_v42, %v1217_v25 }
 0xec8   :  { %v4038_v17 = vsel %vm400_vm9, %v1234_v47, %v3988_v16 }
 0xec9   :  { %1245 = vrot.lane.b32.xlu1 %v4038_v17, %s3382_s25 }
 0xf03   :  { %v1171_v60 = vpop.permute.xlu2 %1170 }
 0xf04   :  { %v1173_v3 = vmul.f32 %v1171_v60, %v1156_v61 }
 0xf06   :  { %v4045_v26 = vsel %vm418_vm10, %v1173_v3, %v3995_v21 }
 0xf07   :  { %1240 = vrot.lane.b32.xlu0 %v4045_v26, %s3382_s25 }
 0xf3b   :  { %v1246_v39 = vpop.permute.xlu1 %1245 }
 0xf3c   :  { %1248 = vst.msk [vmem:[#allocation3 + $0x10] sm:$0xff] %vm276_vm8, %v1246_v39  ;;  %2901 = vmatmul.msk.f32.vlgmr.msrb.gmra.mxu3 %vm276_vm8, %v1246_v39  ;;  %v4078_v39 = vsel %vm418_vm10, %v4031_v59, %v4028_v11 }
 0xf79   :  { %v1241_v16 = vpop.permute.xlu0 %1240 }
 0xf7a   :  { %1243 = vst.msk [vmem:[#allocation2 + $0x28] sm:$0xff] %vm276_vm8, %v1241_v16  ;;  %2899 = vmatmul.msk.f32.vlgmr.msra.gmra.mxu2 %vm276_vm8, %v1241_v16 }
 0xfbf   :  { %v1329_v18 = vpop.f32.mrf.mxu3 }
 0xfc0   :  { %v1332_v44 = vadd.f32 %v1329_v18, %v3658_v20 }
 0xfc2   :  { %v2902_v32 = vmul.f32 -1.442695, %v1332_v44 }
 0xfc4   :  { %3080 = vpow2.f32 %v2902_v32 }
 0xfca   :  { %v3081_v21 = vpop.eup %3080 }
 0xfcb   :  { %v1337_v33 = vadd.f32 1.0, %v3081_v21 }
 0xfcd   :  { %3082 = vrcp.f32 %v1337_v33  ;;  %v1349_v40 = vand.u32 2147483648, %v1337_v33  ;;  %v1347_v28 = vand.u32 2147483647, %v1337_v33  ;;  %vm1343_vm7 = vweird.f32 %v1337_v33 }
 0xfce   :  { %3084 = vtanh.f32 %v1332_v44 }
 0xfcf   :  { %v1350_v23 = vor.u32 1.1754944e-38, %v1349_v40  ;;  %vm1348_vm1 = vcmp.eq.f32.partialorder %v1347_v28, 8.507059e+37  ;;  %v129_v40 = vld [vmem:[%s4691_s7 + $0x30] sm:$0xff]  ;;  %v127_v28 = vld [vmem:[%s4691_s7 + $0x20] sm:$0xff] }
 0xfd0   :  { %1677 = vmatpush.msra.mxu1 %v129_v40 }
 0xfd2   :  { %1678 = vmatpush.msra.mxu1 %v127_v28 }
 0xfd3   :  { %v3083_v38 = vpop.eup %3082 }
 0xfd4   :  { %v1339_v31 = vmul.f32 %v3083_v38, %v1337_v33  ;;  %vm1344_vm6 = vweird.f32 %v3083_v38  ;;  %v3085_v20 = vpop.eup %3084 }
 0xfd5   :  { %vm1345_vm0 = vmor %vm1343_vm7, %vm1344_vm6 }
 0xfd6   :  { %v1340_v24 = vsub.f32 1.0, %v1339_v31  ;;  %v126_v31 = vld [vmem:[%s4691_s7 + $0x18] sm:$0xff] }
 0xfd8   :  { %v1341_v25 = vmul.f32 %v3083_v38, %v1340_v24 }
 0xfda   :  { %v1342_v30 = vadd.f32 %v3083_v38, %v1341_v25  ;;  %v1519_v25 = vld [vmem:[#allocation2] sm:$0xff] }
 0xfdc   :  { %v1346_v62 = vsel %vm1345_vm0, %v3083_v38, %v1342_v30  ;;  %v130_v38 = vld [vmem:[%s4691_s7 + $0x38] sm:$0xff]  ;;  %v125_v30 = vld [vmem:[%s4691_s7 + $0x10] sm:$0xff] }
 0xfdd   :  { %v1351_v36 = vsel %vm1348_vm1, %v1350_v23, %v1346_v62  ;;  %1718 = vmatpush.msra.mxu2 %v130_v38  ;;  %v123_v23 = vld [vmem:[%s4691_s7] sm:$0xff]  ;;  %1679 = vmatpush.msra.mxu1 %v125_v30  ;;  %v1520_v62 = vld [vmem:[#allocation2 + $0x8] sm:$0xff] }
 0xfde   :  { %v1353_v63 = vsel %vm3668_vm12, %v3085_v20, %v1351_v36  ;;  %v1521_v20 = vld [vmem:[#allocation2 + $0x10] sm:$0xff]  ;;  %v1522_v36 = vld [vmem:[#allocation2 + $0x18] sm:$0xff] }
 0xfdf   :  { %1356 = vrot.lane.b32.xlu1 %v1353_v63, %s3381_s4  ;;  %v1354_v42 = vmul.f32 %v1353_v63, %v4067_v12  ;;  %1680 = vmatpush.msra.mxu1 %v123_v23 }
 0xffd   :  { %v1268_v51 = vpop.f32.mrf.mxu2 }
 0xffe   :  { %v1271_v5 = vadd.f32 %v1268_v51, %v3690_v53  ;;  %v1523_v51 = vld [vmem:[#allocation2 + $0x20] sm:$0xff] }
0x1000   :  { %v2900_v37 = vmul.f32 -1.442695, %v1271_v5 }
0x1002   :  { %3086 = vpow2.f32 %v2900_v37 }
0x1008   :  { %v3087_v46 = vpop.eup %3086 }
0x1009   :  { %v1276_v8 = vadd.f32 1.0, %v3087_v46 }
0x100b   :  { %3088 = vrcp.f32 %v1276_v8  ;;  %v1288_v49 = vand.u32 2147483648, %v1276_v8  ;;  %v1286_v61 = vand.u32 2147483647, %v1276_v8  ;;  %vm1282_vm3 = vweird.f32 %v1276_v8 }
0x100c   :  { %3090 = vtanh.f32 %v1271_v5  ;;  %v1524_v5 = vld [vmem:[#allocation2 + $0x28] sm:$0xff] }
0x100d   :  { %v1289_v1 = vor.u32 1.1754944e-38, %v1288_v49  ;;  %vm1287_vm13 = vcmp.eq.f32.partialorder %v1286_v61, 8.507059e+37 }
0x1011   :  { %v3089_v35 = vpop.eup %3088 }
0x1012   :  { %v1278_v43 = vmul.f32 %v3089_v35, %v1276_v8  ;;  %vm1283_vm2 = vweird.f32 %v3089_v35  ;;  %v3091_v53 = vpop.eup %3090 }
0x1013   :  { %vm1284_vm11 = vmor %vm1282_vm3, %vm1283_vm2 }
0x1014   :  { %v1279_v52 = vsub.f32 1.0, %v1278_v43 }
0x1016   :  { %v1280_v56 = vmul.f32 %v3089_v35, %v1279_v52 }
0x1018   :  { %v1281_v45 = vadd.f32 %v3089_v35, %v1280_v56 }
0x101a   :  { %v1285_v0 = vsel %vm1284_vm11, %v3089_v35, %v1281_v45 }
0x101b   :  { %v1290_v2 = vsel %vm1287_vm13, %v1289_v1, %v1285_v0 }
0x101c   :  { %v1292_v57 = vsel %vm3668_vm12, %v3091_v53, %v1290_v2 }
0x101d   :  { %1295 = vrot.lane.b32.xlu0 %v1292_v57, %s3381_s4  ;;  %v1293_v16 = vmul.f32 %v1292_v57, %v4078_v39 }
0x1051   :  { %v1357_v13 = vpop.permute.xlu1 %1356 }
0x1052   :  { %v1359_v9 = vmul.f32 %v1357_v13, %v1353_v63 }
0x1054   :  { %1361 = vrot.lane.b32.xlu2 %v1359_v9, %s3382_s25  ;;  %v340_v9 = vadd.f32 %v3950_v55, %v3651_v7 }
0x108f   :  { %v1296_v14 = vpop.permute.xlu0 %1295 }
0x1090   :  { %v1298_v50 = vmul.f32 %v1296_v14, %v1292_v57 }
0x1092   :  { %1300 = vrot.lane.b32.xlu2 %v1298_v50, %s3382_s25 }
0x10ae   :  { %v1362_v47 = vpop.permute.xlu2 %1361 }
0x10af   :  { %v4070_v60 = vadd.f32 %v1362_v47, %v1354_v42 }
0x10b1   :  { %3092 = vtanh.f32 %v4070_v60  ;;  %v1374_v30 = vsel %vm394_vm4, %v4070_v60, %v4067_v12  ;;  %v138_v12 = vld [vmem:[%s4692_s8 + $0x38] sm:$0xff] }
0x10b2   :  { %1612 = vmatpush.msrb.mxu0 %v138_v12 }
0x10b7   :  { %v3093_v3 = vpop.eup %3092 }
0x10b8   :  { %1367 = vrot.lane.b32.xlu1 %v3093_v3, %s3381_s4 }
0x10ec   :  { %v1301_v4 = vpop.permute.xlu2 %1300 }
0x10ed   :  { %v4081_v6 = vadd.f32 %v1301_v4, %v1293_v16 }
0x10ef   :  { %3094 = vtanh.f32 %v4081_v6 }
0x10f5   :  { %v3095_v18 = vpop.eup %3094 }
0x10f6   :  { %1306 = vrot.lane.b32.xlu1 %v3095_v18, %s3381_s4 }
0x112a   :  { %v1368_v44 = vpop.permute.xlu1 %1367 }
0x112b   :  { %v1370_v32 = vmul.f32 %v1368_v44, %v1353_v63 }
0x112d   :  { %v4088_v21 = vsel %vm394_vm4, %v1370_v32, %v4038_v17  ;;  %v128_v17 = vld [vmem:[%s4691_s7 + $0x28] sm:$0xff] }
0x112e   :  { %1381 = vrot.lane.b32.xlu0 %v4088_v21, %s3382_s25  ;;  %1719 = vmatpush.msra.mxu2 %v128_v17 }
0x1130   :  { %1720 = vmatpush.msra.mxu2 %v126_v31 }
0x1168   :  { %v1307_v11 = vpop.permute.xlu1 %1306 }
0x1169   :  { %v1309_v59 = vmul.f32 %v1307_v11, %v1292_v57 }
0x116b   :  { %v4095_v33 = vsel %vm424_vm5, %v1309_v59, %v4045_v26  ;;  %v124_v26 = vld [vmem:[%s4691_s7 + $0x8] sm:$0xff] }
0x116c   :  { %1376 = vrot.lane.b32.xlu2 %v4095_v33, %s3382_s25  ;;  %1721 = vmatpush.msra.mxu2 %v124_v26 }
0x11a0   :  { %v1382_v24 = vpop.permute.xlu0 %1381 }
0x11a1   :  { %1384 = vst.msk [vmem:[#allocation3 + $0x8] sm:$0xff] %vm276_vm8, %v1382_v24  ;;  %2905 = vmatmul.msk.f32.vlgmr.msrb.gmra.mxu2 %vm276_vm8, %v1382_v24 }
0x11a9   :  { %2931 = vmatmul.msk.f32.vlgmr.msra.gmra.mxu2 %vm276_vm8, %v1519_v25 }
0x11b1   :  { %2932 = vmatmul.msk.f32.gmra.mxu2 %vm276_vm8, %v1520_v62 }
0x11b9   :  { %2933 = vmatmul.msk.f32.gmra.mxu2 %vm276_vm8, %v1521_v20 }
0x11c1   :  { %2934 = vmatmul.msk.f32.gmra.mxu2 %vm276_vm8, %v1522_v36 }
0x11c6   :  { %v1377_v63 = vpop.permute.xlu2 %1376 }
0x11c7   :  { %1379 = vst.msk [vmem:[#allocation2 + $0x30] sm:$0xff] %vm276_vm8, %v1377_v63  ;;  %2903 = vmatmul.msk.f32.vlgmr.msrb.gmra.mxu1 %vm276_vm8, %v1377_v63 }
0x11c9   :  { %2935 = vmatmul.msk.f32.gmra.mxu2 %vm276_vm8, %v1523_v51 }
0x11ce   :  { %v1525_v37 = vld [vmem:[#allocation2 + $0x30] sm:$0xff] }
0x11cf   :  { %2923 = vmatmul.msk.f32.vlgmr.msra.gmra.mxu1 %vm276_vm8, %v1519_v25 }
0x11d1   :  { %2936 = vmatmul.msk.f32.gmra.mxu2 %vm276_vm8, %v1524_v5 }
0x11d7   :  { %2924 = vmatmul.msk.f32.gmra.mxu1 %vm276_vm8, %v1520_v62 }
0x11d9   :  { %2937 = vmatmul.msk.f32.gmra.mxu2 %vm276_vm8, %v1525_v37 }
0x11df   :  { %2925 = vmatmul.msk.f32.gmra.mxu1 %vm276_vm8, %v1521_v20 }
0x11e7   :  { %2926 = vmatmul.msk.f32.gmra.mxu1 %vm276_vm8, %v1522_v36  ;;  %v1372_v36 = vsel %vm424_vm5, %v4081_v6, %v4078_v39 }
0x11ef   :  { %2927 = vmatmul.msk.f32.gmra.mxu1 %vm276_vm8, %v1523_v51 }
0x11f7   :  { %2928 = vmatmul.msk.f32.gmra.mxu1 %vm276_vm8, %v1524_v5 }
0x11ff   :  { %2929 = vmatmul.msk.f32.gmra.mxu1 %vm276_vm8, %v1525_v37 }
0x1224   :  { %v1465_v46 = vpop.f32.mrf.mxu2 }
0x1225   :  { %v1468_v8 = vadd.f32 %v1465_v46, %v3654_v15 }
0x1227   :  { %v2906_v35 = vmul.f32 -1.442695, %v1468_v8 }
0x1229   :  { %3096 = vpow2.f32 %v2906_v35 }
0x122f   :  { %v3097_v43 = vpop.eup %3096 }
0x1230   :  { %v1473_v52 = vadd.f32 1.0, %v3097_v43 }
0x1232   :  { %3098 = vrcp.f32 %v1473_v52  ;;  %v1485_v45 = vand.u32 2147483648, %v1473_v52  ;;  %v1483_v0 = vand.u32 2147483647, %v1473_v52  ;;  %vm1479_vm7 = vweird.f32 %v1473_v52 }
0x1233   :  { %3100 = vtanh.f32 %v1468_v8 }
0x1234   :  { %v1486_v2 = vor.u32 1.1754944e-38, %v1485_v45  ;;  %vm1484_vm1 = vcmp.eq.f32.partialorder %v1483_v0, 8.507059e+37  ;;  %v131_v45 = vld [vmem:[%s4692_s8] sm:$0xff]  ;;  %v4198_v0 = vld [vmem:[#allocation9 + $0x10] sm:$0xff] }
0x1238   :  { %v3099_v49 = vpop.eup %3098 }
0x1239   :  { %v1475_v56 = vmul.f32 %v3099_v49, %v1473_v52  ;;  %vm1480_vm6 = vweird.f32 %v3099_v49  ;;  %v3101_v15 = vpop.eup %3100  ;;  %v137_v52 = vld [vmem:[%s4692_s8 + $0x30] sm:$0xff] }
0x123a   :  { %vm1481_vm0 = vmor %vm1479_vm7, %vm1480_vm6  ;;  %vm4701_vm6 = vcmp.eq.s32.totalorder %v3718_v48, 1  ;;  %vm4702_vm7 = vcmp.eq.s32.totalorder %v3728_v58, 1  ;;  %1571 = vmatpush.msra.mxu3 %v137_v52 }
0x123b   :  { %v1476_v61 = vsub.f32 1.0, %v1475_v56  ;;  %v133_v56 = vld [vmem:[%s4692_s8 + $0x10] sm:$0xff] }
0x123d   :  { %v1477_v1 = vmul.f32 %v3099_v49, %v1476_v61  ;;  %v132_v61 = vld [vmem:[%s4692_s8 + $0x8] sm:$0xff] }
0x123f   :  { %v1478_v53 = vadd.f32 %v3099_v49, %v1477_v1  ;;  %v4194_v1 = vld [vmem:[#allocation9 + $0x18] sm:$0xff] }
0x1240   :  { %1907 = vmatpush.msrb.mxu1 %v4194_v1 }
0x1241   :  { %v1482_v57 = vsel %vm1481_vm0, %v3099_v49, %v1478_v53  ;;  %v135_v49 = vld [vmem:[%s4692_s8 + $0x20] sm:$0xff] }
0x1242   :  { %v1487_v13 = vsel %vm1484_vm1, %v1486_v2, %v1482_v57  ;;  %1572 = vmatpush.msra.mxu3 %v135_v49  ;;  %1908 = vmatpush.msrb.mxu1 %v4198_v0  ;;  %v4206_v57 = vld [vmem:[#allocation9 + $0x8] sm:$0xff] }
0x1243   :  { %v1489_v14 = vsel %vm3668_vm12, %v3101_v15, %v1487_v13  ;;  %v1528_v15 = vld [vmem:[#allocation3 + $0x8] sm:$0xff]  ;;  %v1529_v13 = vld [vmem:[#allocation3 + $0x10] sm:$0xff] }
0x1244   :  { %1492 = vrot.lane.b32.xlu0 %v1489_v14, %s3381_s4  ;;  %v1404_v50 = vpop.f32.mrf.mxu1  ;;  %v1490_v23 = vmul.f32 %v1489_v14, %v1374_v30  ;;  %1573 = vmatpush.msra.mxu3 %v133_v56 }
0x1245   :  { %v1407_v42 = vadd.f32 %v1404_v50, %v340_v9  ;;  %1909 = vmatpush.msrb.mxu1 %v4206_v57  ;;  %v4214_v9 = vld [vmem:[#allocation9] sm:$0xff] }
0x1246   :  { %1574 = vmatpush.msra.mxu3 %v131_v45 }
0x1247   :  { %v2904_v47 = vmul.f32 -1.442695, %v1407_v42  ;;  %1910 = vmatpush.msrb.mxu1 %v4214_v9 }
0x1248   :  { %1780 = vmatpush.msrb.mxu3 %v4194_v1 }
0x1249   :  { %3102 = vpow2.f32 %v2904_v47  ;;  %2171 = vmatpush.msra.mxu1 %v4194_v1  ;;  %v4231_v47 = vld [vmem:[#allocation10 + $0x10] sm:$0xff] }
0x124a   :  { %1781 = vmatpush.msrb.mxu3 %v4198_v0 }
0x124b   :  { %2172 = vmatpush.msra.mxu1 %v4198_v0 }
0x124c   :  { %1782 = vmatpush.msrb.mxu3 %v4206_v57 }
0x124d   :  { %2173 = vmatpush.msra.mxu1 %v4206_v57 }
0x124e   :  { %1783 = vmatpush.msrb.mxu3 %v4214_v9 }
0x124f   :  { %v3103_v3 = vpop.eup %3102  ;;  %2174 = vmatpush.msra.mxu1 %v4214_v9 }
0x1250   :  { %v1412_v16 = vadd.f32 1.0, %v3103_v3  ;;  %v4233_v3 = vld [vmem:[#allocation10 + $0x8] sm:$0xff] }
0x1252   :  { %3104 = vrcp.f32 %v1412_v16  ;;  %v1424_v32 = vand.u32 2147483648, %v1412_v16  ;;  %v1422_v7 = vand.u32 2147483647, %v1412_v16  ;;  %vm1418_vm3 = vweird.f32 %v1412_v16 }
0x1253   :  { %3106 = vtanh.f32 %v1407_v42  ;;  %v1530_v42 = vld [vmem:[#allocation3 + $0x18] sm:$0xff] }
0x1254   :  { %v1425_v59 = vor.u32 1.1754944e-38, %v1424_v32  ;;  %vm1423_vm13 = vcmp.eq.f32.partialorder %v1422_v7, 8.507059e+37  ;;  %v1533_v32 = vld [vmem:[#allocation3 + $0x30] sm:$0xff]  ;;  %v1723_v7 = vpop.f32.mrf.mxu2 }
0x1258   :  { %v3105_v4 = vpop.eup %3104 }
0x1259   :  { %v1414_v18 = vmul.f32 %v3105_v4, %v1412_v16  ;;  %vm1419_vm2 = vweird.f32 %v3105_v4  ;;  %v3107_v17 = vpop.eup %3106  ;;  %v4238_v16 = vld [vmem:[#allocation10] sm:$0xff] }
0x125a   :  { %vm1420_vm11 = vmor %vm1418_vm3, %vm1419_vm2 }
0x125b   :  { %v1415_v44 = vsub.f32 1.0, %v1414_v18 }
0x125d   :  { %v1416_v11 = vmul.f32 %v3105_v4, %v1415_v44  ;;  %v1532_v44 = vld [vmem:[#allocation3 + $0x28] sm:$0xff] }
0x125f   :  { %v1417_v55 = vadd.f32 %v3105_v4, %v1416_v11  ;;  %v1534_v11 = vld [vmem:[#allocation3 + $0x38] sm:$0xff] }
0x1261   :  { %v1421_v38 = vsel %vm1420_vm11, %v3105_v4, %v1417_v55  ;;  %v1531_v4 = vld [vmem:[#allocation3 + $0x20] sm:$0xff]  ;;  %v4274_v55 = vpop.f32.mrf.mxu1 }
0x1262   :  { %v1426_v31 = vsel %vm1423_vm13, %v1425_v59, %v1421_v38  ;;  %v1726_v59 = vpop.f32.mrf.mxu2 }
0x1263   :  { %v1428_v26 = vsel %vm3668_vm12, %v3107_v17, %v1426_v31 }
0x1264   :  { %1431 = vrot.lane.b32.xlu2 %v1428_v26, %s3381_s4  ;;  %v1429_v63 = vmul.f32 %v1428_v26, %v1372_v36 }
0x12b6   :  { %v1493_v24 = vpop.permute.xlu0 %1492 }
0x12b7   :  { %v1495_v40 = vmul.f32 %v1493_v24, %v1489_v14  ;;  %v1685_v24 = vpop.f32.mrf.mxu1 }
0x12b9   :  { %1497 = vrot.lane.b32.xlu1 %v1495_v40, %s3382_s25 }
0x12be   :  { %v1432_v25 = vpop.permute.xlu2 %1431 }
0x12bf   :  { %v1434_v28 = vmul.f32 %v1432_v25, %v1428_v26  ;;  %v1729_v25 = vpop.f32.mrf.mxu2 }
0x12c1   :  { %1436 = vrot.lane.b32.xlu1 %v1434_v28, %s3382_s25 }
0x132b   :  { %v1498_v62 = vpop.permute.xlu1 %1497 }
0x132c   :  { %v1500_v20 = vadd.f32 %v1498_v62, %v1490_v23  ;;  %v1688_v62 = vpop.f32.mrf.mxu1 }
0x132e   :  { %3108 = vtanh.f32 %v1500_v20 }
0x1333   :  { %v1437_v51 = vpop.permute.xlu1 %1436 }
0x1334   :  { %v3109_v5 = vpop.eup %3108  ;;  %v1439_v37 = vadd.f32 %v1437_v51, %v1429_v63 }
0x1335   :  { %1503 = vrot.lane.b32.xlu0 %v3109_v5, %s3381_s4 }
0x1336   :  { %3110 = vtanh.f32 %v1439_v37 }
0x133c   :  { %v3111_v46 = vpop.eup %3110 }
0x133d   :  { %1442 = vrot.lane.b32.xlu0 %v3111_v46, %s3381_s4  ;;  %v1732_v46 = vpop.f32.mrf.mxu2 }
0x1345   :  { %v1735_v49 = vpop.f32.mrf.mxu2 }
0x13a7   :  { %v1504_v60 = vpop.permute.xlu0 %1503 }
0x13a8   :  { %v1506_v8 = vmul.f32 %v1504_v60, %v1489_v14  ;;  %v4216_v14 = vld [vmem:[#allocation10 + $0x18] sm:$0xff] }
0x13a9   :  { %1971 = vmatpush.msrb.mxu2 %v4216_v14 }
0x13aa   :  { %v1508_v39 = vsel %vm4701_vm6, %v1506_v8, %v4088_v21  ;;  %v136_v21 = vld [vmem:[%s4692_s8 + $0x28] sm:$0xff] }
0x13ab   :  { %1515 = vrot.lane.b32.xlu2 %v1508_v39, %s3382_s25  ;;  %1613 = vmatpush.msrb.mxu0 %v136_v21  ;;  %v1691_v39 = vpop.f32.mrf.mxu1 }
0x13ac   :  { %1972 = vmatpush.msrb.mxu2 %v4231_v47 }
0x13ae   :  { %1973 = vmatpush.msrb.mxu2 %v4233_v3 }
0x13af   :  { %v1443_v6 = vpop.permute.xlu0 %1442 }
0x13b0   :  { %v1445_v35 = vmul.f32 %v1443_v6, %v1428_v26  ;;  %1974 = vmatpush.msrb.mxu2 %v4238_v16 }
0x13b2   :  { %v1507_v43 = vsel %vm4702_vm7, %v1445_v35, %v4095_v33  ;;  %v134_v33 = vld [vmem:[%s4692_s8 + $0x18] sm:$0xff]  ;;  %2235 = vmatpush.msra.mxu2 %v4216_v14 }
0x13b3   :  { %1510 = vrot.lane.b32.xlu1 %v1507_v43, %s3382_s25  ;;  %1614 = vmatpush.msrb.mxu0 %v134_v33 }
0x13b4   :  { %2236 = vmatpush.msra.mxu2 %v4231_v47 }
0x13b5   :  { %1615 = vmatpush.msrb.mxu0 %v132_v61 }
0x13b6   :  { %2237 = vmatpush.msra.mxu2 %v4233_v3 }
0x13b7   :  { %1839 = vmatpush.msra.mxu0 %v4216_v14 }
0x13b8   :  { %2238 = vmatpush.msra.mxu2 %v4238_v16 }
0x13b9   :  { %1840 = vmatpush.msra.mxu0 %v4231_v47 }
0x13bb   :  { %1841 = vmatpush.msra.mxu0 %v4233_v3 }
0x13bd   :  { %1842 = vmatpush.msra.mxu0 %v4238_v16 }
0x1405   :  { %v1516_v53 = vpop.permute.xlu2 %1515 }
0x1406   :  { %1518 = vst.msk [vmem:[#allocation3] sm:$0xff] %vm276_vm8, %v1516_v53 }
0x1407   :  { %2813 = vst.msk [vmem:[#allocation12 + $0x8] sm:$0xff] %vm276_vm8, %v1516_v53  ;;  %v1694_v53 = vpop.f32.mrf.mxu1 }
0x140d   :  { %v1527_v2 = vld [vmem:[#allocation3] sm:$0xff] }
0x140e   :  { %2907 = vmatmul.msk.f32.vlgmr.msra.gmra.mxu3 %vm276_vm8, %v1527_v2  ;;  %2915 = vmatmul.msk.f32.vlgmr.msrb.gmra.mxu0 %vm276_vm8, %v1527_v2 }
0x140f   :  { %2039 = vmatpush.msra.mxu3 %v4194_v1  ;;  %2103 = vmatpush.msrb.mxu0 %v4216_v14 }
0x1411   :  { %2040 = vmatpush.msra.mxu3 %v4198_v0  ;;  %2104 = vmatpush.msrb.mxu0 %v4231_v47 }
0x1413   :  { %2041 = vmatpush.msra.mxu3 %v4206_v57  ;;  %2105 = vmatpush.msrb.mxu0 %v4233_v3 }
0x1415   :  { %2042 = vmatpush.msra.mxu3 %v4214_v9  ;;  %2106 = vmatpush.msrb.mxu0 %v4238_v16 }
0x1416   :  { %2908 = vmatmul.msk.f32.gmra.mxu3 %vm276_vm8, %v1528_v15  ;;  %2916 = vmatmul.msk.f32.gmra.mxu0 %vm276_vm8, %v1528_v15  ;;  %v1738_v15 = vpop.f32.mrf.mxu2 }
0x141e   :  { %2909 = vmatmul.msk.f32.gmra.mxu3 %vm276_vm8, %v1529_v13  ;;  %2917 = vmatmul.msk.f32.gmra.mxu0 %vm276_vm8, %v1529_v13 }
0x1425   :  { %v1511_v50 = vpop.permute.xlu1 %1510 }
0x1426   :  { %1513 = vst.msk [vmem:[#allocation2 + $0x38] sm:$0xff] %vm276_vm8, %v1511_v50  ;;  %2910 = vmatmul.msk.f32.gmra.mxu3 %vm276_vm8, %v1530_v42  ;;  %2918 = vmatmul.msk.f32.gmra.mxu0 %vm276_vm8, %v1530_v42 }
0x1427   :  { %2812 = vst.msk [vmem:[#allocation12] sm:$0xff] %vm276_vm8, %v1511_v50 }
0x142d   :  { %v1526_v18 = vld [vmem:[#allocation2 + $0x38] sm:$0xff] }
0x142e   :  { %2911 = vmatmul.msk.f32.gmra.mxu3 %vm276_vm8, %v1531_v4  ;;  %2919 = vmatmul.msk.f32.gmra.mxu0 %vm276_vm8, %v1531_v4 }
0x142f   :  { %2930 = vmatmul.msk.f32.gmra.mxu1 %vm276_vm8, %v1526_v18  ;;  %2938 = vmatmul.msk.f32.gmra.mxu2 %vm276_vm8, %v1526_v18 }
0x1436   :  { %2912 = vmatmul.msk.f32.gmra.mxu3 %vm276_vm8, %v1532_v44  ;;  %2920 = vmatmul.msk.f32.gmra.mxu0 %vm276_vm8, %v1532_v44 }
0x143e   :  { %2913 = vmatmul.msk.f32.gmra.mxu3 %vm276_vm8, %v1533_v32  ;;  %2921 = vmatmul.msk.f32.gmra.mxu0 %vm276_vm8, %v1533_v32  ;;  %v1697_v32 = vpop.f32.mrf.mxu1 }
0x1446   :  { %2914 = vmatmul.msk.f32.gmra.mxu3 %vm276_vm8, %v1534_v11  ;;  %2922 = vmatmul.msk.f32.gmra.mxu0 %vm276_vm8, %v1534_v11 }
0x144e   :  { %1784 = vmatmul.f32.vlgmr.msrb.gmra.mxu3 %v3380_v41  ;;  %1843 = vmatmul.f32.vlgmr.msra.gmra.mxu0 %v3380_v41  ;;  %v139_v41 = vld [vmem:[%s4693_s9] sm:$0x3]  ;;  %s3383_s9 = smov [#allocation12]  }
0x144f   :  { %2367 = vmatpush.msra.mxu0 %v4216_v14  ;;  %2303 = vmatpush.msrb.mxu3 %v4194_v1  ;;  %v1749_v38 = vperm.slane %v139_v41, 1  ;;  %v1748_v63 = vperm.slane %v139_v41, 0  ;;  %v1741_v41 = vpop.f32.mrf.mxu2 }
0x1451   :  { %2368 = vmatpush.msra.mxu0 %v4231_v47  ;;  %2304 = vmatpush.msrb.mxu3 %v4198_v0 }
0x1453   :  { %2369 = vmatpush.msra.mxu0 %v4233_v3  ;;  %2305 = vmatpush.msrb.mxu3 %v4206_v57 }
0x1455   :  { %2370 = vmatpush.msra.mxu0 %v4238_v16  ;;  %2306 = vmatpush.msrb.mxu3 %v4214_v9 }
0x148b   :  { %v1617_v17 = vpop.f32.mrf.mxu0 }
0x148c   :  { %v1724_v31 = vadd.f32 %v1723_v7, %v1617_v17 }
0x148e   :  { %v4279_v26 = vadd.f32 %v1749_v38, %v1724_v31 }
0x1491   :  { %v1576_v40 = vpop.f32.mrf.mxu3 }
0x1493   :  { %v1620_v28 = vpop.f32.mrf.mxu0 }
0x1494   :  { %v1727_v30 = vadd.f32 %v1726_v59, %v1620_v28 }
0x1496   :  { %v4281_v23 = vadd.f32 %v1749_v38, %v1727_v30 }
0x1499   :  { %v1579_v20 = vpop.f32.mrf.mxu3 }
0x149a   :  { %v1686_v36 = vadd.f32 %v1685_v24, %v1579_v20 }
0x149b   :  { %v1623_v51 = vpop.f32.mrf.mxu0 }
0x149c   :  { %v1730_v5 = vadd.f32 %v1729_v25, %v1623_v51  ;;  %v4283_v37 = vadd.f32 %v1748_v63, %v1686_v36  ;;  %v1700_v25 = vpop.f32.mrf.mxu1 }
0x149e   :  { %v4285_v12 = vadd.f32 %v1749_v38, %v1730_v5 }
0x14a1   :  { %v1582_v60 = vpop.f32.mrf.mxu3 }
0x14a2   :  { %v1689_v8 = vadd.f32 %v1688_v62, %v1582_v60 }
0x14a3   :  { %v1626_v6 = vpop.f32.mrf.mxu0 }
0x14a4   :  { %v1733_v35 = vadd.f32 %v1732_v46, %v1626_v6  ;;  %v4287_v43 = vadd.f32 %v1748_v63, %v1689_v8  ;;  %v1683_v6 = vadd.f32 %v4274_v55, %v1576_v40 }
0x14a6   :  { %v4289_v52 = vadd.f32 %v1749_v38, %v1733_v35 }
0x14a9   :  { %v1585_v21 = vpop.f32.mrf.mxu3 }
0x14aa   :  { %v1692_v33 = vadd.f32 %v1691_v39, %v1585_v21 }
0x14ab   :  { %v1629_v56 = vpop.f32.mrf.mxu0 }
0x14ac   :  { %v1736_v61 = vadd.f32 %v1735_v49, %v1629_v56  ;;  %v4291_v45 = vadd.f32 %v1748_v63, %v1692_v33  ;;  %v1703_v5 = vpop.f32.mrf.mxu1  ;;  %v1752_v33 = vadd.f32 %v1748_v63, %v1683_v6 }
0x14ae   :  { %v4293_v2 = vadd.f32 %v1749_v38, %v1736_v61 }
0x14b1   :  { %v1588_v13 = vpop.f32.mrf.mxu3 }
0x14b2   :  { %v1695_v50 = vadd.f32 %v1694_v53, %v1588_v13  ;;  %v1744_v36 = vpop.f32.mrf.mxu2 }
0x14b3   :  { %v1632_v42 = vpop.f32.mrf.mxu0 }
0x14b4   :  { %v1739_v4 = vadd.f32 %v1738_v15, %v1632_v42  ;;  %v4295_v18 = vadd.f32 %v1748_v63, %v1695_v50 }
0x14b6   :  { %v4297_v44 = vadd.f32 %v1749_v38, %v1739_v4 }
0x14b9   :  { %v1591_v11 = vpop.f32.mrf.mxu3 }
0x14ba   :  { %v1698_v7 = vadd.f32 %v1697_v32, %v1591_v11 }
0x14bb   :  { %v1635_v59 = vpop.f32.mrf.mxu0 }
0x14bc   :  { %v1742_v17 = vadd.f32 %v1741_v41, %v1635_v59  ;;  %v4299_v31 = vadd.f32 %v1748_v63, %v1698_v7 }
0x14be   :  { %v4301_v24 = vadd.f32 %v1749_v38, %v1742_v17 }
0x14c1   :  { %v1594_v28 = vpop.f32.mrf.mxu3 }
0x14c2   :  { %v1701_v30 = vadd.f32 %v1700_v25, %v1594_v28 }
0x14c3   :  { %v1638_v62 = vpop.f32.mrf.mxu0 }
0x14c4   :  { %v4303_v20 = vadd.f32 %v1748_v63, %v1701_v30  ;;  %v1745_v51 = vadd.f32 %v1744_v36, %v1638_v62 }
0x14c6   :  { %v1767_v8 = vadd.f32 %v1749_v38, %v1745_v51 }
0x14c9   :  { %v1597_v46 = vpop.f32.mrf.mxu3 }
0x14ca   :  { %v1704_v60 = vadd.f32 %v1703_v5, %v1597_v46 }
0x14cb   :  { %v1844_v39 = vpop.f32.mrf.mxu0 }
0x14cc   :  { %v1847_v35 = vadd.f32 %v1844_v39, %v1767_v8  ;;  %v4306_v49 = vadd.f32 %v1748_v63, %v1704_v60 }
0x14ce   :  { %v2940_v21 = vmul.f32 -1.442695, %v1847_v35 }
0x14d0   :  { %3112 = vpow2.f32 %v2940_v21 }
0x14d1   :  { %v1785_v56 = vpop.f32.mrf.mxu3 }
0x14d2   :  { %v1788_v61 = vadd.f32 %v1785_v56, %v1752_v33 }
0x14d4   :  { %v2939_v53 = vmul.f32 -1.442695, %v1788_v61 }
0x14d6   :  { %v3113_v15 = vpop.eup %3112  ;;  %3114 = vpow2.f32 %v2939_v53 }
0x14d7   :  { %v1852_v13 = vadd.f32 1.0, %v3113_v15 }
0x14d9   :  { %3116 = vrcp.f32 %v1852_v13  ;;  %v1864_v55 = vand.u32 2147483648, %v1852_v13  ;;  %v1862_v11 = vand.u32 2147483647, %v1852_v13  ;;  %vm1858_vm1 = vweird.f32 %v1852_v13 }
0x14db   :  { %v1865_v59 = vor.u32 1.1754944e-38, %v1864_v55  ;;  %vm1863_vm3 = vcmp.eq.f32.partialorder %v1862_v11, 8.507059e+37 }
0x14dc   :  { %v3115_v50 = vpop.eup %3114 }
0x14dd   :  { %v1793_v42 = vadd.f32 1.0, %v3115_v50 }
0x14df   :  { %v3117_v4 = vpop.eup %3116  ;;  %3118 = vrcp.f32 %v1793_v42  ;;  %v1805_v62 = vand.u32 2147483648, %v1793_v42  ;;  %v1803_v5 = vand.u32 2147483647, %v1793_v42  ;;  %vm1799_vm13 = vweird.f32 %v1793_v42 }
0x14e0   :  { %v1854_v38 = vmul.f32 %v3117_v4, %v1852_v13  ;;  %3120 = vtanh.f32 %v1847_v35  ;;  %vm1859_vm0 = vweird.f32 %v3117_v4 }
0x14e1   :  { %vm1860_vm2 = vmor %vm1858_vm1, %vm1859_vm0  ;;  %3122 = vtanh.f32 %v1788_v61  ;;  %v1806_v60 = vor.u32 1.1754944e-38, %v1805_v62  ;;  %vm1804_vm7 = vcmp.eq.f32.partialorder %v1803_v5, 8.507059e+37  ;;  %vm4703_vm0 = vcmp.eq.s32.totalorder %v3728_v58, 1 }
0x14e2   :  { %v1855_v32 = vsub.f32 1.0, %v1854_v38  ;;  %vm4704_vm1 = vcmp.eq.s32.totalorder %v3718_v48, 1 }
0x14e4   :  { %v1856_v40 = vmul.f32 %v3117_v4, %v1855_v32 }
0x14e5   :  { %v3119_v7 = vpop.eup %3118 }
0x14e6   :  { %v1857_v63 = vadd.f32 %v3117_v4, %v1856_v40  ;;  %v1795_v41 = vmul.f32 %v3119_v7, %v1793_v42  ;;  %v3121_v28 = vpop.eup %3120  ;;  %vm1800_vm11 = vweird.f32 %v3119_v7 }
0x14e7   :  { %vm1801_vm6 = vmor %vm1799_vm13, %vm1800_vm11  ;;  %v3123_v39 = vpop.eup %3122 }
0x14e8   :  { %v1861_v17 = vsel %vm1860_vm2, %v3117_v4, %v1857_v63  ;;  %v1796_v25 = vsub.f32 1.0, %v1795_v41 }
0x14e9   :  { %v1866_v30 = vsel %vm1863_vm3, %v1865_v59, %v1861_v17 }
0x14ea   :  { %v1868_v36 = vsel %vm3668_vm12, %v3121_v28, %v1866_v30  ;;  %v1797_v51 = vmul.f32 %v3119_v7, %v1796_v25 }
0x14eb   :  { %1871 = vrot.lane.b32.xlu2 %v1868_v36, %s3381_s4  ;;  %v1869_v53 = vmul.f32 0.0, %v1868_v36 }
0x14ec   :  { %v1798_v46 = vadd.f32 %v3119_v7, %v1797_v51 }
0x14ee   :  { %v1802_v8 = vsel %vm1801_vm6, %v3119_v7, %v1798_v46 }
0x14ef   :  { %v1807_v6 = vsel %vm1804_vm7, %v1806_v60, %v1802_v8 }
0x14f0   :  { %v1809_v35 = vsel %vm3668_vm12, %v3123_v39, %v1807_v6 }
0x14f1   :  { %1812 = vrot.lane.b32.xlu0 %v1809_v35, %s3381_s4  ;;  %v1810_v50 = vmul.f32 0.0, %v1809_v35 }
0x1545   :  { %v1872_v21 = vpop.permute.xlu2 %1871 }
0x1546   :  { %v1874_v33 = vmul.f32 %v1872_v21, %v1868_v36 }
0x1548   :  { %1876 = vrot.lane.b32.xlu1 %v1874_v33, %s3382_s25 }
0x1563   :  { %v1813_v56 = vpop.permute.xlu0 %1812 }
0x1564   :  { %v1815_v61 = vmul.f32 %v1813_v56, %v1809_v35 }
0x1566   :  { %1817 = vrot.lane.b32.xlu2 %v1815_v61, %s3382_s25 }
0x15ba   :  { %v1877_v15 = vpop.permute.xlu1 %1876 }
0x15bb   :  { %v4316_v13 = vadd.f32 %v1877_v15, %v1869_v53 }
0x15bd   :  { %3124 = vtanh.f32 %v4316_v13 }
0x15c0   :  { %v1818_v42 = vpop.permute.xlu2 %1817 }
0x15c1   :  { %v4319_v4 = vadd.f32 %v1818_v42, %v1810_v50 }
0x15c3   :  { %v3125_v38 = vpop.eup %3124  ;;  %3126 = vtanh.f32 %v4319_v4 }
0x15c4   :  { %1882 = vrot.lane.b32.xlu0 %v3125_v38, %s3381_s4 }
0x15c9   :  { %v3127_v32 = vpop.eup %3126 }
0x15ca   :  { %1823 = vrot.lane.b32.xlu1 %v3127_v32, %s3381_s4 }
0x1636   :  { %v1883_v55 = vpop.permute.xlu0 %1882 }
0x1637   :  { %v1885_v40 = vmul.f32 %v1883_v55, %v1868_v36 }
0x1639   :  { %v4326_v11 = vsel %vm4703_vm0, %v1885_v40, 0.0 }
0x163a   :  { %1955 = vrot.lane.b32.xlu2 %v4326_v11, %s3382_s25 }
0x163c   :  { %v1824_v7 = vpop.permute.xlu1 %1823 }
0x163d   :  { %v1826_v63 = vmul.f32 %v1824_v7, %v1809_v35 }
0x163f   :  { %v4332_v41 = vsel %vm4704_vm1, %v1826_v63, 0.0 }
0x1640   :  { %1891 = vrot.lane.b32.xlu0 %v4332_v41, %s3382_s25 }
0x1694   :  { %v1956_v59 = vpop.permute.xlu2 %1955 }
0x1695   :  { %2943 = vmatmul.msk.f32.vlgmr.msrb.gmra.mxu2 %vm276_vm8, %v1956_v59 }
0x1696   :  { %2499 = vmatpush.msrb.mxu2 %v4216_v14 }
0x1698   :  { %2500 = vmatpush.msrb.mxu2 %v4231_v47 }
0x169a   :  { %2501 = vmatpush.msrb.mxu2 %v4233_v3 }
0x169c   :  { %2502 = vmatpush.msrb.mxu2 %v4238_v16 }
0x16b2   :  { %v1892_v17 = vpop.permute.xlu0 %1891 }
0x16b3   :  { %2941 = vmatmul.msk.f32.vlgmr.msrb.gmra.mxu1 %vm276_vm8, %v1892_v17 }
0x16b4   :  { %2435 = vmatpush.msrb.mxu1 %v4194_v1 }
0x16b6   :  { %2436 = vmatpush.msrb.mxu1 %v4198_v0 }
0x16b8   :  { %2437 = vmatpush.msrb.mxu1 %v4206_v57 }
0x16ba   :  { %2438 = vmatpush.msrb.mxu1 %v4214_v9 }
0x1718   :  { %v1976_v25 = vpop.f32.mrf.mxu2 }
0x1719   :  { %v1979_v28 = vadd.f32 %v1976_v25, %v4301_v24 }
0x171b   :  { %v2944_v30 = vmul.f32 -1.442695, %v1979_v28 }
0x171d   :  { %3128 = vpow2.f32 %v2944_v30 }
0x1723   :  { %v3129_v62 = vpop.eup %3128 }
0x1724   :  { %v1984_v36 = vadd.f32 1.0, %v3129_v62 }
0x1726   :  { %3130 = vrcp.f32 %v1984_v36  ;;  %v1996_v8 = vand.u32 2147483648, %v1984_v36  ;;  %v1994_v35 = vand.u32 2147483647, %v1984_v36  ;;  %vm1990_vm3 = vweird.f32 %v1984_v36 }
0x1727   :  { %3132 = vtanh.f32 %v1979_v28 }
0x1728   :  { %v1997_v24 = vor.u32 1.1754944e-38, %v1996_v8  ;;  %vm1995_vm13 = vcmp.eq.f32.partialorder %v1994_v35, 8.507059e+37 }
0x172c   :  { %v3131_v51 = vpop.eup %3130 }
0x172d   :  { %v1986_v5 = vmul.f32 %v3131_v51, %v1984_v36  ;;  %vm1991_vm2 = vweird.f32 %v3131_v51  ;;  %v3133_v61 = vpop.eup %3132 }
0x172e   :  { %vm1992_vm11 = vmor %vm1990_vm3, %vm1991_vm2  ;;  %vm4705_vm2 = vcmp.eq.s32.totalorder %v3728_v58, 1  ;;  %vm4706_vm3 = vcmp.eq.s32.totalorder %v3718_v48, 1 }
0x172f   :  { %v1987_v46 = vsub.f32 1.0, %v1986_v5  ;;  %v4369_v35 = vsel %vm4706_vm3, %v4319_v4, 0.0 }
0x1730   :  { %v1912_v60 = vpop.f32.mrf.mxu1 }
0x1731   :  { %v1915_v39 = vadd.f32 %v1912_v60, %v4283_v37  ;;  %v1988_v6 = vmul.f32 %v3131_v51, %v1987_v46  ;;  %v4359_v46 = vsel %vm4705_vm2, %v4316_v13, 0.0 }
0x1733   :  { %v2942_v21 = vmul.f32 -1.442695, %v1915_v39  ;;  %v1989_v33 = vadd.f32 %v3131_v51, %v1988_v6 }
0x1735   :  { %3134 = vpow2.f32 %v2942_v21  ;;  %v1993_v56 = vsel %vm1992_vm11, %v3131_v51, %v1989_v33 }
0x1736   :  { %v1998_v53 = vsel %vm1995_vm13, %v1997_v24, %v1993_v56 }
0x1737   :  { %v2000_v15 = vsel %vm3668_vm12, %v3133_v61, %v1998_v53 }
0x1738   :  { %2003 = vrot.lane.b32.xlu2 %v2000_v15, %s3381_s4  ;;  %v2001_v60 = vmul.f32 %v2000_v15, %v4359_v46 }
0x173b   :  { %v3135_v50 = vpop.eup %3134 }
0x173c   :  { %v1920_v37 = vadd.f32 1.0, %v3135_v50 }
0x173e   :  { %3136 = vrcp.f32 %v1920_v37  ;;  %v1932_v55 = vand.u32 2147483648, %v1920_v37  ;;  %v1930_v7 = vand.u32 2147483647, %v1920_v37  ;;  %vm1926_vm7 = vweird.f32 %v1920_v37 }
0x173f   :  { %3138 = vtanh.f32 %v1915_v39 }
0x1740   :  { %v1933_v59 = vor.u32 1.1754944e-38, %v1932_v55  ;;  %vm1931_vm1 = vcmp.eq.f32.partialorder %v1930_v7, 8.507059e+37 }
0x1744   :  { %v3137_v42 = vpop.eup %3136 }
0x1745   :  { %v1922_v38 = vmul.f32 %v3137_v42, %v1920_v37  ;;  %vm1927_vm6 = vweird.f32 %v3137_v42  ;;  %v3139_v25 = vpop.eup %3138 }
0x1746   :  { %vm1928_vm0 = vmor %vm1926_vm7, %vm1927_vm6 }
0x1747   :  { %v1923_v32 = vsub.f32 1.0, %v1922_v38 }
0x1749   :  { %v1924_v40 = vmul.f32 %v3137_v42, %v1923_v32 }
0x174b   :  { %v1925_v63 = vadd.f32 %v3137_v42, %v1924_v40 }
0x174d   :  { %v1929_v17 = vsel %vm1928_vm0, %v3137_v42, %v1925_v63 }
0x174e   :  { %v1934_v28 = vsel %vm1931_vm1, %v1933_v59, %v1929_v17 }
0x174f   :  { %v1936_v30 = vsel %vm3668_vm12, %v3139_v25, %v1934_v28 }
0x1750   :  { %1939 = vrot.lane.b32.xlu1 %v1936_v30, %s3381_s4  ;;  %v1937_v21 = vmul.f32 %v1936_v30, %v4369_v35 }
0x1792   :  { %v2004_v62 = vpop.permute.xlu2 %2003 }
0x1793   :  { %v2006_v36 = vmul.f32 %v2004_v62, %v2000_v15 }
0x1795   :  { %2008 = vrot.lane.b32.xlu1 %v2006_v36, %s3382_s25 }
0x17c2   :  { %v1940_v51 = vpop.permute.xlu1 %1939 }
0x17c3   :  { %v1942_v5 = vmul.f32 %v1940_v51, %v1936_v30 }
0x17c5   :  { %1944 = vrot.lane.b32.xlu0 %v1942_v5, %s3382_s25 }
0x1807   :  { %v2009_v8 = vpop.permute.xlu1 %2008 }
0x1808   :  { %v4362_v39 = vadd.f32 %v2009_v8, %v2001_v60 }
0x180a   :  { %3140 = vtanh.f32 %v4362_v39 }
0x1810   :  { %v3141_v6 = vpop.eup %3140 }
0x1811   :  { %2014 = vrot.lane.b32.xlu0 %v3141_v6, %s3381_s4 }
0x1837   :  { %v1945_v33 = vpop.permute.xlu0 %1944 }
0x1838   :  { %v4372_v13 = vadd.f32 %v1945_v33, %v1937_v21 }
0x183a   :  { %3142 = vtanh.f32 %v4372_v13 }
0x1840   :  { %v3143_v24 = vpop.eup %3142 }
0x1841   :  { %1950 = vrot.lane.b32.xlu2 %v3143_v24, %s3381_s4 }
0x1883   :  { %v2015_v56 = vpop.permute.xlu0 %2014 }
0x1884   :  { %v2017_v61 = vmul.f32 %v2015_v56, %v2000_v15 }
0x1886   :  { %v4379_v53 = vsel %vm424_vm5, %v2017_v61, %v4326_v11 }
0x1887   :  { %2087 = vrot.lane.b32.xlu2 %v4379_v53, %s3382_s25 }
0x189b   :  { %v1951_v4 = vpop.permute.xlu2 %1950 }
0x189c   :  { %v1953_v50 = vmul.f32 %v1951_v4, %v1936_v30 }
0x189e   :  { %v4386_v37 = vsel %vm394_vm4, %v1953_v50, %v4332_v41 }
0x189f   :  { %2023 = vrot.lane.b32.xlu1 %v4386_v37, %s3382_s25 }
0x18e1   :  { %v2088_v42 = vpop.permute.xlu2 %2087 }
0x18e2   :  { %2947 = vmatmul.msk.f32.vlgmr.msrb.gmra.mxu0 %vm276_vm8, %v2088_v42 }
0x18e3   :  { %2631 = vmatpush.msrb.mxu0 %v4216_v14 }
0x18e5   :  { %2632 = vmatpush.msrb.mxu0 %v4231_v47 }
0x18e7   :  { %2633 = vmatpush.msrb.mxu0 %v4233_v3 }
0x18e9   :  { %2634 = vmatpush.msrb.mxu0 %v4238_v16 }
0x1911   :  { %v2024_v11 = vpop.permute.xlu1 %2023 }
0x1912   :  { %2945 = vmatmul.msk.f32.vlgmr.msra.gmra.mxu3 %vm276_vm8, %v2024_v11 }
0x1913   :  { %2567 = vmatpush.msra.mxu3 %v4194_v1 }
0x1915   :  { %2568 = vmatpush.msra.mxu3 %v4198_v0 }
0x1917   :  { %2569 = vmatpush.msra.mxu3 %v4206_v57 }
0x1919   :  { %2570 = vmatpush.msra.mxu3 %v4214_v9 }
0x195f   :  { %v2108_v41 = vpop.f32.mrf.mxu0 }
0x1960   :  { %v2111_v15 = vadd.f32 %v2108_v41, %v4297_v44 }
0x1962   :  { %v2948_v38 = vmul.f32 -1.442695, %v2111_v15 }
0x1964   :  { %3144 = vpow2.f32 %v2948_v38 }
0x196a   :  { %v3145_v32 = vpop.eup %3144 }
0x196b   :  { %v2116_v55 = vadd.f32 1.0, %v3145_v32 }
0x196d   :  { %3146 = vrcp.f32 %v2116_v55  ;;  %v2128_v59 = vand.u32 2147483648, %v2116_v55  ;;  %v2126_v25 = vand.u32 2147483647, %v2116_v55  ;;  %vm2122_vm13 = vweird.f32 %v2116_v55 }
0x196e   :  { %3148 = vtanh.f32 %v2111_v15 }
0x196f   :  { %v2129_v30 = vor.u32 1.1754944e-38, %v2128_v59  ;;  %vm2127_vm7 = vcmp.eq.f32.partialorder %v2126_v25, 8.507059e+37 }
0x1973   :  { %v3147_v40 = vpop.eup %3146 }
0x1974   :  { %v2118_v7 = vmul.f32 %v3147_v40, %v2116_v55  ;;  %vm2123_vm11 = vweird.f32 %v3147_v40  ;;  %v3149_v44 = vpop.eup %3148 }
0x1975   :  { %vm2124_vm6 = vmor %vm2122_vm13, %vm2123_vm11 }
0x1976   :  { %v2119_v63 = vsub.f32 1.0, %v2118_v7 }
0x1978   :  { %v2120_v17 = vmul.f32 %v3147_v40, %v2119_v63  ;;  %v4414_v63 = vsel %vm424_vm5, %v4362_v39, %v4359_v46 }
0x197a   :  { %v2121_v28 = vadd.f32 %v3147_v40, %v2120_v17 }
0x197c   :  { %v2125_v62 = vsel %vm2124_vm6, %v3147_v40, %v2121_v28 }
0x197d   :  { %v2130_v36 = vsel %vm2127_vm7, %v2129_v30, %v2125_v62  ;;  %v4425_v30 = vsel %vm394_vm4, %v4372_v13, %v4369_v35 }
0x197e   :  { %v2132_v51 = vsel %vm3668_vm12, %v3149_v44, %v2130_v36 }
0x197f   :  { %2135 = vrot.lane.b32.xlu0 %v2132_v51, %s3381_s4  ;;  %v2133_v59 = vmul.f32 %v2132_v51, %v4414_v63 }
0x1995   :  { %v2044_v5 = vpop.f32.mrf.mxu3 }
0x1996   :  { %v2047_v60 = vadd.f32 %v2044_v5, %v4287_v43 }
0x1998   :  { %v2946_v8 = vmul.f32 -1.442695, %v2047_v60 }
0x199a   :  { %3150 = vpow2.f32 %v2946_v8 }
0x19a0   :  { %v3151_v6 = vpop.eup %3150 }
0x19a1   :  { %v2052_v21 = vadd.f32 1.0, %v3151_v6 }
0x19a3   :  { %3152 = vrcp.f32 %v2052_v21  ;;  %v2064_v61 = vand.u32 2147483648, %v2052_v21  ;;  %v2062_v50 = vand.u32 2147483647, %v2052_v21  ;;  %vm2058_vm1 = vweird.f32 %v2052_v21 }
0x19a4   :  { %3154 = vtanh.f32 %v2047_v60 }
0x19a5   :  { %v2065_v11 = vor.u32 1.1754944e-38, %v2064_v61  ;;  %vm2063_vm3 = vcmp.eq.f32.partialorder %v2062_v50, 8.507059e+37 }
0x19a9   :  { %v3153_v33 = vpop.eup %3152 }
0x19aa   :  { %v2054_v24 = vmul.f32 %v3153_v33, %v2052_v21  ;;  %vm2059_vm0 = vweird.f32 %v3153_v33  ;;  %v3155_v43 = vpop.eup %3154 }
0x19ab   :  { %vm2060_vm2 = vmor %vm2058_vm1, %vm2059_vm0 }
0x19ac   :  { %v2055_v56 = vsub.f32 1.0, %v2054_v24 }
0x19ae   :  { %v2056_v4 = vmul.f32 %v3153_v33, %v2055_v56 }
0x19b0   :  { %v2057_v42 = vadd.f32 %v3153_v33, %v2056_v4 }
0x19b2   :  { %v2061_v41 = vsel %vm2060_vm2, %v3153_v33, %v2057_v42 }
0x19b3   :  { %v2066_v15 = vsel %vm2063_vm3, %v2065_v11, %v2061_v41 }
0x19b4   :  { %v2068_v38 = vsel %vm3668_vm12, %v3155_v43, %v2066_v15 }
0x19b5   :  { %2071 = vrot.lane.b32.xlu1 %v2068_v38, %s3381_s4  ;;  %v2069_v62 = vmul.f32 %v2068_v38, %v4425_v30 }
0x19f1   :  { %v2136_v32 = vpop.permute.xlu0 %2135 }
0x19f2   :  { %v2138_v55 = vmul.f32 %v2136_v32, %v2132_v51 }
0x19f4   :  { %2140 = vrot.lane.b32.xlu2 %v2138_v55, %s3382_s25 }
0x1a27   :  { %v2072_v40 = vpop.permute.xlu1 %2071 }
0x1a28   :  { %v2074_v7 = vmul.f32 %v2072_v40, %v2068_v38 }
0x1a2a   :  { %2076 = vrot.lane.b32.xlu0 %v2074_v7, %s3382_s25 }
0x1a4e   :  { %v2141_v17 = vpop.permute.xlu2 %2140 }
0x1a4f   :  { %v4417_v25 = vadd.f32 %v2141_v17, %v2133_v59 }
0x1a51   :  { %3156 = vtanh.f32 %v4417_v25 }
0x1a57   :  { %v3157_v28 = vpop.eup %3156 }
0x1a58   :  { %2146 = vrot.lane.b32.xlu1 %v3157_v28, %s3381_s4 }
0x1a9c   :  { %v2077_v46 = vpop.permute.xlu0 %2076 }
0x1a9d   :  { %v4428_v39 = vadd.f32 %v2077_v46, %v2069_v62 }
0x1a9f   :  { %3158 = vtanh.f32 %v4428_v39 }
0x1aa5   :  { %v3159_v44 = vpop.eup %3158 }
0x1aa6   :  { %2082 = vrot.lane.b32.xlu2 %v3159_v44, %s3381_s4 }
0x1aca   :  { %v2147_v36 = vpop.permute.xlu1 %2146 }
0x1acb   :  { %v2149_v5 = vmul.f32 %v2147_v36, %v2132_v51 }
0x1acd   :  { %v4435_v60 = vsel %vm418_vm10, %v2149_v5, %v4379_v53 }
0x1ace   :  { %2219 = vrot.lane.b32.xlu0 %v4435_v60, %s3382_s25 }
0x1b00   :  { %v2083_v35 = vpop.permute.xlu2 %2082 }
0x1b01   :  { %v2085_v13 = vmul.f32 %v2083_v35, %v2068_v38 }
0x1b03   :  { %v4442_v8 = vsel %vm400_vm9, %v2085_v13, %v4386_v37  ;;  %v4470_v13 = vsel %vm418_vm10, %v4417_v25, %v4414_v63 }
0x1b04   :  { %2155 = vrot.lane.b32.xlu1 %v4442_v8, %s3382_s25 }
0x1b40   :  { %v2220_v6 = vpop.permute.xlu0 %2219 }
0x1b41   :  { %2951 = vmatmul.msk.f32.vlgmr.msra.gmra.mxu2 %vm276_vm8, %v2220_v6 }
0x1b42   :  { %2763 = vmatpush.msra.mxu2 %v4216_v14 }
0x1b44   :  { %2764 = vmatpush.msra.mxu2 %v4231_v47 }
0x1b46   :  { %2765 = vmatpush.msra.mxu2 %v4233_v3 }
0x1b48   :  { %2766 = vmatpush.msra.mxu2 %v4238_v16 }
0x1b76   :  { %v2156_v53 = vpop.permute.xlu1 %2155 }
0x1b77   :  { %2949 = vmatmul.msk.f32.vlgmr.msra.gmra.mxu1 %vm276_vm8, %v2156_v53 }
0x1b78   :  { %2699 = vmatpush.msra.mxu1 %v4194_v1 }
0x1b7a   :  { %2700 = vmatpush.msra.mxu1 %v4198_v0 }
0x1b7c   :  { %2701 = vmatpush.msra.mxu1 %v4206_v57 }
0x1b7e   :  { %2702 = vmatpush.msra.mxu1 %v4214_v9 }
0x1bc4   :  { %v2240_v37 = vpop.f32.mrf.mxu2 }
0x1bc5   :  { %v2243_v14 = vadd.f32 %v2240_v37, %v4293_v2 }
0x1bc7   :  { %v2952_v51 = vmul.f32 -1.442695, %v2243_v14 }
0x1bc9   :  { %3160 = vpow2.f32 %v2952_v51  ;;  %v4481_v51 = vsel %vm400_vm9, %v4428_v39, %v4425_v30 }
0x1bcf   :  { %v3161_v47 = vpop.eup %3160 }
0x1bd0   :  { %v2248_v3 = vadd.f32 1.0, %v3161_v47 }
0x1bd2   :  { %3162 = vrcp.f32 %v2248_v3  ;;  %v2260_v24 = vand.u32 2147483648, %v2248_v3  ;;  %v2258_v0 = vand.u32 2147483647, %v2248_v3  ;;  %vm2254_vm13 = vweird.f32 %v2248_v3 }
0x1bd3   :  { %3164 = vtanh.f32 %v2243_v14 }
0x1bd4   :  { %v2261_v57 = vor.u32 1.1754944e-38, %v2260_v24  ;;  %vm2259_vm7 = vcmp.eq.f32.partialorder %v2258_v0, 8.507059e+37 }
0x1bd8   :  { %v3163_v16 = vpop.eup %3162 }
0x1bd9   :  { %v2250_v21 = vmul.f32 %v3163_v16, %v2248_v3  ;;  %vm2255_vm11 = vweird.f32 %v3163_v16  ;;  %v3165_v2 = vpop.eup %3164 }
0x1bda   :  { %vm2256_vm6 = vmor %vm2254_vm13, %vm2255_vm11 }
0x1bdb   :  { %v2251_v33 = vsub.f32 1.0, %v2250_v21 }
0x1bdd   :  { %v2252_v1 = vmul.f32 %v3163_v16, %v2251_v33 }
0x1bdf   :  { %v2253_v56 = vadd.f32 %v3163_v16, %v2252_v1 }
0x1be1   :  { %v2257_v9 = vsel %vm2256_vm6, %v3163_v16, %v2253_v56 }
0x1be2   :  { %v2262_v61 = vsel %vm2259_vm7, %v2261_v57, %v2257_v9 }
0x1be3   :  { %v2264_v4 = vsel %vm3668_vm12, %v3165_v2, %v2262_v61 }
0x1be4   :  { %2267 = vrot.lane.b32.xlu0 %v2264_v4, %s3381_s4  ;;  %v2265_v6 = vmul.f32 %v2264_v4, %v4470_v13 }
0x1bf4   :  { %v2176_v50 = vpop.f32.mrf.mxu1 }
0x1bf5   :  { %v2179_v42 = vadd.f32 %v2176_v50, %v4291_v45 }
0x1bf7   :  { %v2950_v11 = vmul.f32 -1.442695, %v2179_v42 }
0x1bf9   :  { %3166 = vpow2.f32 %v2950_v11 }
0x1bff   :  { %v3167_v41 = vpop.eup %3166 }
0x1c00   :  { %v2184_v43 = vadd.f32 1.0, %v3167_v41 }
0x1c02   :  { %3168 = vrcp.f32 %v2184_v43  ;;  %v2196_v55 = vand.u32 2147483648, %v2184_v43  ;;  %v2194_v7 = vand.u32 2147483647, %v2184_v43  ;;  %vm2190_vm1 = vweird.f32 %v2184_v43 }
0x1c03   :  { %3170 = vtanh.f32 %v2179_v42 }
0x1c04   :  { %v2197_v17 = vor.u32 1.1754944e-38, %v2196_v55  ;;  %vm2195_vm3 = vcmp.eq.f32.partialorder %v2194_v7, 8.507059e+37 }
0x1c08   :  { %v3169_v15 = vpop.eup %3168 }
0x1c09   :  { %v2186_v38 = vmul.f32 %v3169_v15, %v2184_v43  ;;  %vm2191_vm0 = vweird.f32 %v3169_v15  ;;  %v3171_v45 = vpop.eup %3170 }
0x1c0a   :  { %vm2192_vm2 = vmor %vm2190_vm1, %vm2191_vm0 }
0x1c0b   :  { %v2187_v32 = vsub.f32 1.0, %v2186_v38 }
0x1c0d   :  { %v2188_v40 = vmul.f32 %v3169_v15, %v2187_v32 }
0x1c0f   :  { %v2189_v59 = vadd.f32 %v3169_v15, %v2188_v40 }
0x1c11   :  { %v2193_v28 = vsel %vm2192_vm2, %v3169_v15, %v2189_v59 }
0x1c12   :  { %v2198_v62 = vsel %vm2195_vm3, %v2197_v17, %v2193_v28 }
0x1c13   :  { %v2200_v46 = vsel %vm3668_vm12, %v3171_v45, %v2198_v62 }
0x1c14   :  { %2203 = vrot.lane.b32.xlu2 %v2200_v46, %s3381_s4  ;;  %v2201_v47 = vmul.f32 %v2200_v46, %v4481_v51 }
0x1c56   :  { %v2268_v44 = vpop.permute.xlu0 %2267 }
0x1c57   :  { %v2270_v36 = vmul.f32 %v2268_v44, %v2264_v4 }
0x1c59   :  { %2272 = vrot.lane.b32.xlu2 %v2270_v36, %s3382_s25 }
0x1c6e   :  { %v2204_v5 = vpop.permute.xlu2 %2203 }
0x1c6f   :  { %v2206_v35 = vmul.f32 %v2204_v5, %v2200_v46 }
0x1c71   :  { %2208 = vrot.lane.b32.xlu1 %v2206_v35, %s3382_s25 }
0x1cb3   :  { %v2273_v53 = vpop.permute.xlu2 %2272 }
0x1cb4   :  { %v4473_v37 = vadd.f32 %v2273_v53, %v2265_v6 }
0x1cb6   :  { %3172 = vtanh.f32 %v4473_v37 }
0x1cbc   :  { %v3173_v14 = vpop.eup %3172 }
0x1cbd   :  { %2278 = vrot.lane.b32.xlu1 %v3173_v14, %s3381_s4 }
0x1ce3   :  { %v2209_v63 = vpop.permute.xlu1 %2208 }
0x1ce4   :  { %v4484_v25 = vadd.f32 %v2209_v63, %v2201_v47 }
0x1ce6   :  { %3174 = vtanh.f32 %v4484_v25 }
0x1cec   :  { %v3175_v3 = vpop.eup %3174 }
0x1ced   :  { %2214 = vrot.lane.b32.xlu0 %v3175_v3, %s3381_s4 }
0x1d2f   :  { %v2279_v16 = vpop.permute.xlu1 %2278 }
0x1d30   :  { %v2281_v21 = vmul.f32 %v2279_v16, %v2264_v4 }
0x1d32   :  { %v4491_v33 = vsel %vm412_vm14, %v2281_v21, %v4435_v60  ;;  %v4518_v21 = vsel %vm412_vm14, %v4473_v37, %v4470_v13 }
0x1d33   :  { %2351 = vrot.lane.b32.xlu0 %v4491_v33, %s3382_s25 }
0x1d5f   :  { %v2215_v30 = vpop.permute.xlu0 %2214 }
0x1d60   :  { %v2217_v39 = vmul.f32 %v2215_v30, %v2200_v46 }
0x1d62   :  { %v4498_v24 = vsel %vm406_vm15, %v2217_v39, %v4442_v8 }
0x1d63   :  { %2287 = vrot.lane.b32.xlu2 %v4498_v24, %s3382_s25 }
0x1da5   :  { %v2352_v1 = vpop.permute.xlu0 %2351 }
0x1da6   :  { %2955 = vmatmul.msk.f32.vlgmr.msra.gmra.mxu0 %vm276_vm8, %v2352_v1 }
0x1dbd   :  { %v2288_v0 = vpop.permute.xlu2 %2287 }
0x1dbe   :  { %2953 = vmatmul.msk.f32.vlgmr.msrb.gmra.mxu3 %vm276_vm8, %v2288_v0  ;;  %v4528_v0 = vsel %vm406_vm15, %v4484_v25, %v4481_v51 }
0x1e23   :  { %v2372_v60 = vpop.f32.mrf.mxu0 }
0x1e24   :  { %v2375_v56 = vadd.f32 %v2372_v60, %v4289_v52 }
0x1e26   :  { %v2956_v57 = vmul.f32 -1.442695, %v2375_v56 }
0x1e28   :  { %3176 = vpow2.f32 %v2956_v57 }
0x1e2e   :  { %v3177_v9 = vpop.eup %3176 }
0x1e2f   :  { %v2380_v2 = vadd.f32 1.0, %v3177_v9 }
0x1e31   :  { %3178 = vrcp.f32 %v2380_v2  ;;  %v2392_v50 = vand.u32 2147483648, %v2380_v2  ;;  %v2390_v11 = vand.u32 2147483647, %v2380_v2  ;;  %vm2386_vm13 = vweird.f32 %v2380_v2 }
0x1e32   :  { %3180 = vtanh.f32 %v2375_v56 }
0x1e33   :  { %v2393_v43 = vor.u32 1.1754944e-38, %v2392_v50  ;;  %vm2391_vm7 = vcmp.eq.f32.partialorder %v2390_v11, 8.507059e+37 }
0x1e37   :  { %v3179_v61 = vpop.eup %3178 }
0x1e38   :  { %v2382_v8 = vmul.f32 %v3179_v61, %v2380_v2  ;;  %vm2387_vm11 = vweird.f32 %v3179_v61  ;;  %v3181_v52 = vpop.eup %3180 }
0x1e39   :  { %vm2388_vm6 = vmor %vm2386_vm13, %vm2387_vm11 }
0x1e3a   :  { %v2383_v4 = vsub.f32 1.0, %v2382_v8 }
0x1e3c   :  { %v2384_v42 = vmul.f32 %v3179_v61, %v2383_v4 }
0x1e3e   :  { %v2385_v41 = vadd.f32 %v3179_v61, %v2384_v42 }
0x1e40   :  { %v2389_v15 = vsel %vm2388_vm6, %v3179_v61, %v2385_v41 }
0x1e41   :  { %v2308_v38 = vpop.f32.mrf.mxu3  ;;  %v2394_v32 = vsel %vm2391_vm7, %v2393_v43, %v2389_v15 }
0x1e42   :  { %v2311_v55 = vadd.f32 %v2308_v38, %v4295_v18  ;;  %v2396_v40 = vsel %vm3668_vm12, %v3181_v52, %v2394_v32 }
0x1e43   :  { %2399 = vrot.lane.b32.xlu1 %v2396_v40, %s3381_s4  ;;  %v2397_v30 = vmul.f32 %v2396_v40, %v4518_v21 }
0x1e44   :  { %v2954_v7 = vmul.f32 -1.442695, %v2311_v55 }
0x1e46   :  { %3182 = vpow2.f32 %v2954_v7 }
0x1e4c   :  { %v3183_v59 = vpop.eup %3182 }
0x1e4d   :  { %v2316_v17 = vadd.f32 1.0, %v3183_v59 }
0x1e4f   :  { %3184 = vrcp.f32 %v2316_v17  ;;  %v2328_v46 = vand.u32 2147483648, %v2316_v17  ;;  %v2326_v36 = vand.u32 2147483647, %v2316_v17  ;;  %vm2322_vm1 = vweird.f32 %v2316_v17 }
0x1e50   :  { %3186 = vtanh.f32 %v2311_v55 }
0x1e51   :  { %v2329_v18 = vor.u32 1.1754944e-38, %v2328_v46  ;;  %vm2327_vm3 = vcmp.eq.f32.partialorder %v2326_v36, 8.507059e+37 }
0x1e55   :  { %v3185_v28 = vpop.eup %3184 }
0x1e56   :  { %v2318_v45 = vmul.f32 %v3185_v28, %v2316_v17  ;;  %vm2323_vm0 = vweird.f32 %v3185_v28  ;;  %v3187_v6 = vpop.eup %3186 }
0x1e57   :  { %vm2324_vm2 = vmor %vm2322_vm1, %vm2323_vm0 }
0x1e58   :  { %v2319_v62 = vsub.f32 1.0, %v2318_v45 }
0x1e5a   :  { %v2320_v44 = vmul.f32 %v3185_v28, %v2319_v62 }
0x1e5c   :  { %v2321_v5 = vadd.f32 %v3185_v28, %v2320_v44 }
0x1e5e   :  { %v2325_v35 = vsel %vm2324_vm2, %v3185_v28, %v2321_v5 }
0x1e5f   :  { %v2330_v53 = vsel %vm2327_vm3, %v2329_v18, %v2325_v35 }
0x1e60   :  { %v2332_v14 = vsel %vm3668_vm12, %v3187_v6, %v2330_v53 }
0x1e61   :  { %2335 = vrot.lane.b32.xlu2 %v2332_v14, %s3381_s4  ;;  %v2333_v60 = vmul.f32 %v2332_v14, %v4528_v0 }
0x1eb5   :  { %v2400_v47 = vpop.permute.xlu1 %2399 }
0x1eb6   :  { %v2402_v63 = vmul.f32 %v2400_v47, %v2396_v40 }
0x1eb8   :  { %2404 = vrot.lane.b32.xlu0 %v2402_v63, %s3382_s25 }
0x1ebb   :  { %v2336_v3 = vpop.permute.xlu2 %2335 }
0x1ebc   :  { %v2338_v16 = vmul.f32 %v2336_v3, %v2332_v14 }
0x1ebe   :  { %2340 = vrot.lane.b32.xlu1 %v2338_v16, %s3382_s25 }
0x1f2a   :  { %v2405_v39 = vpop.permute.xlu0 %2404 }
0x1f2b   :  { %v4521_v1 = vadd.f32 %v2405_v39, %v2397_v30 }
0x1f2d   :  { %3188 = vtanh.f32 %v4521_v1 }
0x1f30   :  { %v2341_v56 = vpop.permute.xlu1 %2340 }
0x1f31   :  { %v4531_v57 = vadd.f32 %v2341_v56, %v2333_v60 }
0x1f33   :  { %v3189_v13 = vpop.eup %3188  ;;  %3190 = vtanh.f32 %v4531_v57 }
0x1f34   :  { %2410 = vrot.lane.b32.xlu2 %v3189_v13, %s3381_s4 }
0x1f39   :  { %v3191_v37 = vpop.eup %3190 }
0x1f3a   :  { %2346 = vrot.lane.b32.xlu0 %v3191_v37, %s3381_s4  ;;  %v4566_v37 = vsel %vm412_vm14, %v4531_v57, %v4528_v0 }
0x1f8e   :  { %v2411_v9 = vpop.permute.xlu2 %2410 }
0x1f8f   :  { %v2413_v2 = vmul.f32 %v2411_v9, %v2396_v40 }
0x1f91   :  { %v4539_v51 = vsel %vm406_vm15, %v2413_v2, %v4491_v33 }
0x1f92   :  { %2483 = vrot.lane.b32.xlu1 %v4539_v51, %s3382_s25 }
0x1fac   :  { %v2347_v25 = vpop.permute.xlu0 %2346 }
0x1fad   :  { %v2349_v61 = vmul.f32 %v2347_v25, %v2332_v14 }
0x1faf   :  { %v4546_v8 = vsel %vm412_vm14, %v2349_v61, %v4498_v24 }
0x1fb0   :  { %2419 = vrot.lane.b32.xlu2 %v4546_v8, %s3382_s25 }
0x2004   :  { %v2484_v4 = vpop.permute.xlu1 %2483 }
0x2005   :  { %2959 = vmatmul.msk.f32.vlgmr.msrb.gmra.mxu2 %vm276_vm8, %v2484_v4  ;;  %v4577_v4 = vsel %vm406_vm15, %v4521_v1, %v4518_v21 }
0x200a   :  { %v2420_v50 = vpop.permute.xlu2 %2419 }
0x200b   :  { %2957 = vmatmul.msk.f32.vlgmr.msrb.gmra.mxu1 %vm276_vm8, %v2420_v50 }
0x2088   :  { %v2440_v33 = vpop.f32.mrf.mxu1  ;;  %v2504_v42 = vpop.f32.mrf.mxu2 }
0x2089   :  { %v2443_v11 = vadd.f32 %v2440_v33, %v4299_v31  ;;  %v2507_v41 = vadd.f32 %v2504_v42, %v4285_v12 }
0x208b   :  { %v2958_v43 = vmul.f32 -1.442695, %v2443_v11  ;;  %v2960_v15 = vmul.f32 -1.442695, %v2507_v41 }
0x208d   :  { %3192 = vpow2.f32 %v2958_v43 }
0x208e   :  { %3194 = vpow2.f32 %v2960_v15 }
0x2093   :  { %v3193_v24 = vpop.eup %3192 }
0x2094   :  { %v3195_v52 = vpop.eup %3194  ;;  %v2448_v38 = vadd.f32 1.0, %v3193_v24 }
0x2095   :  { %v2512_v32 = vadd.f32 1.0, %v3195_v52 }
0x2096   :  { %3196 = vrcp.f32 %v2448_v38  ;;  %v2460_v28 = vand.u32 2147483648, %v2448_v38  ;;  %v2458_v62 = vand.u32 2147483647, %v2448_v38  ;;  %vm2454_vm6 = vweird.f32 %v2448_v38 }
0x2097   :  { %3198 = vrcp.f32 %v2512_v32  ;;  %v2524_v12 = vand.u32 2147483648, %v2512_v32  ;;  %v2522_v44 = vand.u32 2147483647, %v2512_v32  ;;  %vm2518_vm7 = vweird.f32 %v2512_v32 }
0x2098   :  { %3200 = vtanh.f32 %v2443_v11  ;;  %v2461_v18 = vor.u32 1.1754944e-38, %v2460_v28  ;;  %vm2459_vm2 = vcmp.eq.f32.partialorder %v2458_v62, 8.507059e+37 }
0x2099   :  { %3202 = vtanh.f32 %v2507_v41  ;;  %v2525_v6 = vor.u32 1.1754944e-38, %v2524_v12  ;;  %vm2523_vm3 = vcmp.eq.f32.partialorder %v2522_v44, 8.507059e+37 }
0x209c   :  { %v3197_v55 = vpop.eup %3196 }
0x209d   :  { %v3199_v40 = vpop.eup %3198  ;;  %v2450_v7 = vmul.f32 %v3197_v55, %v2448_v38  ;;  %vm2455_vm11 = vweird.f32 %v3197_v55 }
0x209e   :  { %v2514_v59 = vmul.f32 %v3199_v40, %v2512_v32  ;;  %vm2519_vm13 = vweird.f32 %v3199_v40  ;;  %vm2456_vm0 = vmor %vm2454_vm6, %vm2455_vm11  ;;  %v3201_v35 = vpop.eup %3200 }
0x209f   :  { %v2451_v17 = vsub.f32 1.0, %v2450_v7  ;;  %vm2520_vm1 = vmor %vm2518_vm7, %vm2519_vm13  ;;  %v3203_v14 = vpop.eup %3202 }
0x20a0   :  { %v2515_v31 = vsub.f32 1.0, %v2514_v59 }
0x20a1   :  { %v2452_v45 = vmul.f32 %v3197_v55, %v2451_v17 }
0x20a2   :  { %v2516_v46 = vmul.f32 %v3199_v40, %v2515_v31 }
0x20a3   :  { %v2453_v36 = vadd.f32 %v3197_v55, %v2452_v45 }
0x20a4   :  { %v2517_v5 = vadd.f32 %v3199_v40, %v2516_v46 }
0x20a5   :  { %v2457_v53 = vsel %vm2456_vm0, %v3197_v55, %v2453_v36 }
0x20a6   :  { %v2521_v47 = vsel %vm2520_vm1, %v3199_v40, %v2517_v5  ;;  %v2462_v63 = vsel %vm2459_vm2, %v2461_v18, %v2457_v53 }
0x20a7   :  { %v2526_v3 = vsel %vm2523_vm3, %v2525_v6, %v2521_v47  ;;  %v2464_v16 = vsel %vm3668_vm12, %v3201_v35, %v2462_v63 }
0x20a8   :  { %v2528_v30 = vsel %vm3668_vm12, %v3203_v14, %v2526_v3  ;;  %2467 = vrot.lane.b32.xlu0 %v2464_v16, %s3381_s4  ;;  %v2465_v9 = vmul.f32 %v2464_v16, %v4566_v37 }
0x20a9   :  { %2531 = vrot.lane.b32.xlu1 %v2528_v30, %s3381_s4  ;;  %v2529_v54 = vmul.f32 %v2528_v30, %v4577_v4 }
0x211a   :  { %v2468_v39 = vpop.permute.xlu0 %2467 }
0x211b   :  { %v2532_v60 = vpop.permute.xlu1 %2531  ;;  %v2470_v56 = vmul.f32 %v2468_v39, %v2464_v16 }
0x211c   :  { %v2534_v13 = vmul.f32 %v2532_v60, %v2528_v30 }
0x211d   :  { %2472 = vrot.lane.b32.xlu2 %v2470_v56, %s3382_s25 }
0x211e   :  { %2536 = vrot.lane.b32.xlu0 %v2534_v13, %s3382_s25 }
0x2177   :  { %v2473_v2 = vpop.permute.xlu2 %2472 }
0x2178   :  { %v4569_v25 = vadd.f32 %v2473_v2, %v2465_v9 }
0x217a   :  { %3204 = vtanh.f32 %v4569_v25 }
0x2180   :  { %v3205_v61 = vpop.eup %3204 }
0x2181   :  { %2478 = vrot.lane.b32.xlu1 %v3205_v61, %s3381_s4 }
0x2190   :  { %v2537_v0 = vpop.permute.xlu0 %2536 }
0x2191   :  { %v4580_v57 = vadd.f32 %v2537_v0, %v2529_v54 }
0x2193   :  { %3206 = vtanh.f32 %v4580_v57  ;;  %v4614_v2 = vsel %vm400_vm9, %v4580_v57, %v4577_v4 }
0x2199   :  { %v3207_v50 = vpop.eup %3206 }
0x219a   :  { %2542 = vrot.lane.b32.xlu2 %v3207_v50, %s3381_s4  ;;  %v4624_v50 = vsel %vm418_vm10, %v4569_v25, %v4566_v37 }
0x21f3   :  { %v2479_v33 = vpop.permute.xlu1 %2478 }
0x21f4   :  { %v2543_v42 = vpop.permute.xlu2 %2542  ;;  %v2481_v11 = vmul.f32 %v2479_v33, %v2464_v16 }
0x21f5   :  { %v2545_v41 = vmul.f32 %v2543_v42, %v2528_v30 }
0x21f6   :  { %v4587_v27 = vsel %vm418_vm10, %v2481_v11, %v4546_v8 }
0x21f7   :  { %v4592_v21 = vsel %vm400_vm9, %v2545_v41, %v4539_v51  ;;  %2551 = vrot.lane.b32.xlu0 %v4587_v27, %s3382_s25 }
0x21f8   :  { %2615 = vrot.lane.b32.xlu1 %v4592_v21, %s3382_s25 }
0x2269   :  { %v2552_v1 = vpop.permute.xlu0 %2551 }
0x226a   :  { %v2616_v43 = vpop.permute.xlu1 %2615  ;;  %2961 = vmatmul.msk.f32.vlgmr.msra.gmra.mxu3 %vm276_vm8, %v2552_v1 }
0x226b   :  { %2963 = vmatmul.msk.f32.vlgmr.msrb.gmra.mxu0 %vm276_vm8, %v2616_v43 }
0x22e8   :  { %v2636_v15 = vpop.f32.mrf.mxu0 }
0x22e9   :  { %v2639_v8 = vadd.f32 %v2636_v15, %v4281_v23 }
0x22eb   :  { %v2964_v24 = vmul.f32 -1.442695, %v2639_v8 }
0x22ed   :  { %3208 = vpow2.f32 %v2964_v24  ;;  %v2572_v52 = vpop.f32.mrf.mxu3 }
0x22ee   :  { %v2575_v51 = vadd.f32 %v2572_v52, %v4303_v20 }
0x22f0   :  { %v2962_v38 = vmul.f32 -1.442695, %v2575_v51 }
0x22f2   :  { %3210 = vpow2.f32 %v2962_v38 }
0x22f3   :  { %v3209_v32 = vpop.eup %3208 }
0x22f4   :  { %v2644_v55 = vadd.f32 1.0, %v3209_v32 }
0x22f6   :  { %3212 = vrcp.f32 %v2644_v55  ;;  %v2656_v28 = vand.u32 2147483648, %v2644_v55  ;;  %v2654_v45 = vand.u32 2147483647, %v2644_v55  ;;  %vm2650_vm15 = vweird.f32 %v2644_v55 }
0x22f8   :  { %v3211_v40 = vpop.eup %3210  ;;  %v2657_v20 = vor.u32 1.1754944e-38, %v2656_v28  ;;  %vm2655_vm13 = vcmp.eq.f32.partialorder %v2654_v45, 8.507059e+37 }
0x22f9   :  { %v2580_v7 = vadd.f32 1.0, %v3211_v40 }
0x22fb   :  { %3214 = vrcp.f32 %v2580_v7  ;;  %v2592_v5 = vand.u32 2147483648, %v2580_v7  ;;  %v2590_v53 = vand.u32 2147483647, %v2580_v7  ;;  %vm2586_vm7 = vweird.f32 %v2580_v7 }
0x22fc   :  { %v3213_v59 = vpop.eup %3212  ;;  %3216 = vtanh.f32 %v2639_v8 }
0x22fd   :  { %v2646_v17 = vmul.f32 %v3213_v59, %v2644_v55  ;;  %vm2651_vm14 = vweird.f32 %v3213_v59  ;;  %3218 = vtanh.f32 %v2575_v51  ;;  %v2593_v63 = vor.u32 1.1754944e-38, %v2592_v5 }
0x22fe   :  { %vm2652_vm11 = vmor %vm2650_vm15, %vm2651_vm14  ;;  %vm2591_vm1 = vcmp.eq.f32.partialorder %v2590_v53, 8.507059e+37 }
0x22ff   :  { %v2647_v31 = vsub.f32 1.0, %v2646_v17 }
0x2301   :  { %v3215_v12 = vpop.eup %3214  ;;  %v2648_v23 = vmul.f32 %v3213_v59, %v2647_v31 }
0x2302   :  { %v2582_v62 = vmul.f32 %v3215_v12, %v2580_v7  ;;  %v3217_v18 = vpop.eup %3216  ;;  %vm2587_vm6 = vweird.f32 %v3215_v12 }
0x2303   :  { %v2649_v46 = vadd.f32 %v3213_v59, %v2648_v23  ;;  %vm2588_vm0 = vmor %vm2586_vm7, %vm2587_vm6  ;;  %v3219_v16 = vpop.eup %3218 }
0x2304   :  { %v2583_v44 = vsub.f32 1.0, %v2582_v62 }
0x2305   :  { %v2653_v36 = vsel %vm2652_vm11, %v3213_v59, %v2649_v46 }
0x2306   :  { %v2658_v35 = vsel %vm2655_vm13, %v2657_v20, %v2653_v36  ;;  %v2584_v6 = vmul.f32 %v3215_v12, %v2583_v44 }
0x2307   :  { %v2660_v14 = vsel %vm3668_vm12, %v3217_v18, %v2658_v35 }
0x2308   :  { %2663 = vrot.lane.b32.xlu2 %v2660_v14, %s3381_s4  ;;  %v2585_v47 = vadd.f32 %v3215_v12, %v2584_v6  ;;  %v2661_v61 = vmul.f32 %v2660_v14, %v4614_v2 }
0x230a   :  { %v2589_v3 = vsel %vm2588_vm0, %v3215_v12, %v2585_v47 }
0x230b   :  { %v2594_v30 = vsel %vm2591_vm1, %v2593_v63, %v2589_v3 }
0x230c   :  { %v2596_v39 = vsel %vm3668_vm12, %v3219_v16, %v2594_v30 }
0x230d   :  { %2599 = vrot.lane.b32.xlu0 %v2596_v39, %s3381_s4  ;;  %v2597_v33 = vmul.f32 %v2596_v39, %v4624_v50 }
0x2362   :  { %v2664_v60 = vpop.permute.xlu2 %2663 }
0x2363   :  { %v2666_v56 = vmul.f32 %v2664_v60, %v2660_v14 }
0x2365   :  { %2668 = vrot.lane.b32.xlu1 %v2666_v56, %s3382_s25 }
0x237f   :  { %v2600_v13 = vpop.permute.xlu0 %2599 }
0x2380   :  { %v2602_v9 = vmul.f32 %v2600_v13, %v2596_v39 }
0x2382   :  { %2604 = vrot.lane.b32.xlu2 %v2602_v9, %s3382_s25 }
0x23d7   :  { %v2669_v54 = vpop.permute.xlu1 %2668 }
0x23d8   :  { %v4617_v0 = vadd.f32 %v2669_v54, %v2661_v61 }
0x23da   :  { %3220 = vtanh.f32 %v4617_v0  ;;  %v2681_v56 = vsel %vm394_vm4, %v4617_v0, %v4614_v2 }
0x23dc   :  { %v2605_v42 = vpop.permute.xlu2 %2604 }
0x23dd   :  { %v4627_v11 = vadd.f32 %v2605_v42, %v2597_v33 }
0x23df   :  { %3222 = vtanh.f32 %v4627_v11  ;;  %v2679_v54 = vsel %vm424_vm5, %v4627_v11, %v4624_v50 }
0x23e0   :  { %v3221_v10 = vpop.eup %3220 }
0x23e1   :  { %2674 = vrot.lane.b32.xlu0 %v3221_v10, %s3381_s4 }
0x23e5   :  { %v3223_v4 = vpop.eup %3222 }
0x23e6   :  { %2610 = vrot.lane.b32.xlu1 %v3223_v4, %s3381_s4 }
0x2453   :  { %v2675_v57 = vpop.permute.xlu0 %2674 }
0x2454   :  { %v2677_v41 = vmul.f32 %v2675_v57, %v2660_v14 }
0x2456   :  { %v4635_v19 = vsel %vm394_vm4, %v2677_v41, %v4592_v21  ;;  %vm4708_vm4 = vcmp.eq.s32.totalorder %v3728_v58, 1 }
0x2457   :  { %2747 = vrot.lane.b32.xlu2 %v4635_v19, %s3382_s25 }
0x2458   :  { %v2611_v37 = vpop.permute.xlu1 %2610 }
0x2459   :  { %v2613_v25 = vmul.f32 %v2611_v37, %v2596_v39 }
0x245b   :  { %v4642_v1 = vsel %vm424_vm5, %v2613_v25, %v4587_v27 }
0x245c   :  { %2683 = vrot.lane.b32.xlu0 %v4642_v1, %s3382_s25 }
0x24b1   :  { %v2748_v43 = vpop.permute.xlu2 %2747 }
0x24b2   :  { %2967 = vmatmul.msk.f32.vlgmr.msra.gmra.mxu2 %vm276_vm8, %v2748_v43 }
0x24ce   :  { %v2684_v15 = vpop.permute.xlu0 %2683 }
0x24cf   :  { %2965 = vmatmul.msk.f32.vlgmr.msra.gmra.mxu1 %vm276_vm8, %v2684_v15 }
0x2535   :  { %v2768_v21 = vpop.f32.mrf.mxu2 }
0x2536   :  { %v2771_v8 = vadd.f32 %v2768_v21, %v4279_v26 }
0x2538   :  { %v2968_v24 = vmul.f32 -1.442695, %v2771_v8 }
0x253a   :  { %3224 = vpow2.f32 %v2968_v24 }
0x2540   :  { %v3225_v52 = vpop.eup %3224 }
0x2541   :  { %v2776_v51 = vadd.f32 1.0, %v3225_v52 }
0x2543   :  { %3226 = vrcp.f32 %v2776_v51  ;;  %v2788_v7 = vand.u32 2147483648, %v2776_v51  ;;  %v2786_v17 = vand.u32 2147483647, %v2776_v51  ;;  %vm2782_vm10 = vweird.f32 %v2776_v51 }
0x2544   :  { %3228 = vtanh.f32 %v2771_v8 }
0x2545   :  { %v2789_v26 = vor.u32 1.1754944e-38, %v2788_v7  ;;  %vm2787_vm3 = vcmp.eq.f32.partialorder %v2786_v17, 8.507059e+37 }
0x2549   :  { %v3227_v38 = vpop.eup %3226 }
0x254a   :  { %v2778_v27 = vmul.f32 %v3227_v38, %v2776_v51  ;;  %vm2783_vm9 = vweird.f32 %v3227_v38  ;;  %v3229_v23 = vpop.eup %3228 }
0x254b   :  { %vm2784_vm2 = vmor %vm2782_vm10, %vm2783_vm9 }
0x254c   :  { %v2704_v32 = vpop.f32.mrf.mxu1  ;;  %v2779_v55 = vsub.f32 1.0, %v2778_v27 }
0x254d   :  { %v2707_v40 = vadd.f32 %v2704_v32, %v4306_v49 }
0x254e   :  { %v2780_v59 = vmul.f32 %v3227_v38, %v2779_v55 }
0x254f   :  { %v2966_v31 = vmul.f32 -1.442695, %v2707_v40 }
0x2550   :  { %v2781_v28 = vadd.f32 %v3227_v38, %v2780_v59 }
0x2551   :  { %3230 = vpow2.f32 %v2966_v31 }
0x2552   :  { %v2785_v12 = vsel %vm2784_vm2, %v3227_v38, %v2781_v28 }
0x2553   :  { %v2790_v45 = vsel %vm2787_vm3, %v2789_v26, %v2785_v12 }
0x2554   :  { %v2792_v62 = vsel %vm3668_vm12, %v3229_v23, %v2790_v45 }
0x2555   :  { %2795 = vrot.lane.b32.xlu2 %v2792_v62, %s3381_s4  ;;  %v2793_v13 = vmul.f32 %v2792_v62, %v2681_v56 }
0x2557   :  { %v3231_v49 = vpop.eup %3230 }
0x2558   :  { %v2712_v46 = vadd.f32 1.0, %v3231_v49 }
0x255a   :  { %3232 = vrcp.f32 %v2712_v46  ;;  %v2724_v5 = vand.u32 2147483648, %v2712_v46  ;;  %v2722_v35 = vand.u32 2147483647, %v2712_v46  ;;  %vm2718_vm15 = vweird.f32 %v2712_v46 }
0x255b   :  { %3234 = vtanh.f32 %v2707_v40 }
0x255c   :  { %v2725_v53 = vor.u32 1.1754944e-38, %v2724_v5  ;;  %vm2723_vm13 = vcmp.eq.f32.partialorder %v2722_v35, 8.507059e+37 }
0x2560   :  { %v3233_v20 = vpop.eup %3232 }
0x2561   :  { %v2714_v44 = vmul.f32 %v3233_v20, %v2712_v46  ;;  %vm2719_vm14 = vweird.f32 %v3233_v20  ;;  %v3235_v47 = vpop.eup %3234 }
0x2562   :  { %vm2720_vm11 = vmor %vm2718_vm15, %vm2719_vm14 }
0x2563   :  { %v2715_v36 = vsub.f32 1.0, %v2714_v44 }
0x2565   :  { %v2716_v18 = vmul.f32 %v3233_v20, %v2715_v36 }
0x2567   :  { %v2717_v6 = vadd.f32 %v3233_v20, %v2716_v18 }
0x2569   :  { %v2721_v14 = vsel %vm2720_vm11, %v3233_v20, %v2717_v6 }
0x256a   :  { %v2726_v63 = vsel %vm2723_vm13, %v2725_v53, %v2721_v14 }
0x256b   :  { %v2728_v3 = vsel %vm3668_vm12, %v3235_v47, %v2726_v63  ;;  %vm4707_vm12 = vcmp.eq.s32.totalorder %v3718_v48, 1 }
0x256c   :  { %2731 = vrot.lane.b32.xlu1 %v2728_v3, %s3381_s4  ;;  %v2729_v33 = vmul.f32 %v2728_v3, %v2679_v54 }
0x25af   :  { %v2796_v16 = vpop.permute.xlu2 %2795 }
0x25b0   :  { %v2798_v30 = vmul.f32 %v2796_v16, %v2792_v62 }
0x25b2   :  { %2800 = vrot.lane.b32.xlu1 %v2798_v30, %s3382_s25 }
0x25de   :  { %v2732_v39 = vpop.permute.xlu1 %2731 }
0x25df   :  { %v2734_v60 = vmul.f32 %v2732_v39, %v2728_v3 }
0x25e1   :  { %2736 = vrot.lane.b32.xlu0 %v2734_v60, %s3382_s25 }
0x2624   :  { %v2801_v9 = vpop.permute.xlu1 %2800 }
0x2625   :  { %v2803_v61 = vadd.f32 %v2801_v9, %v2793_v13 }
0x2627   :  { %3236 = vtanh.f32 %v2803_v61 }
0x262d   :  { %v3237_v34 = vpop.eup %3236 }
0x262e   :  { %2806 = vrot.lane.b32.xlu0 %v3237_v34, %s3381_s4 }
0x2653   :  { %v2737_v42 = vpop.permute.xlu0 %2736 }
0x2654   :  { %v2739_v10 = vadd.f32 %v2737_v42, %v2729_v33 }
0x2656   :  { %3238 = vtanh.f32 %v2739_v10 }
0x265c   :  { %v3239_v4 = vpop.eup %3238 }
0x265d   :  { %2742 = vrot.lane.b32.xlu2 %v3239_v4, %s3381_s4  ;;  %s2828_s4 = sshll.u32 %s3383_s9, 4  ;;  %s2829_s4 = int_to_ptr.vmem [resolvable:$true] %s2828_s4 }
0x26a0   :  { %v2807_v22 = vpop.permute.xlu0 %2806 }
0x26a1   :  { %v2809_v2 = vmul.f32 %v2807_v22, %v2792_v62 }
0x26a3   :  { %v2811_v0 = vsel %vm4707_vm12, %v2809_v2, %v4635_v19 }
0x26a4   :  { %2820 = vrot.lane.b32.xlu2 %v2811_v0, %s3382_s25 }
0x26b7   :  { %v2743_v57 = vpop.permute.xlu2 %2742 }
0x26b8   :  { %v2745_v41 = vmul.f32 %v2743_v57, %v2728_v3 }
0x26ba   :  { %v2810_v29 = vsel %vm4708_vm4, %v2745_v41, %v4642_v1 }
0x26bb   :  { %2815 = vrot.lane.b32.xlu1 %v2810_v29, %s3382_s25 }
0x26fe   :  { %v2821_v50 = vpop.permute.xlu2 %2820 }
0x26ff   :  { %2823 = vst.msk [vmem:[#allocation12 + $0x18] sm:$0xff] %vm276_vm8, %v2821_v50 }
0x272d   :  { %v2816_v48 = vpop.permute.xlu1 %2815 }
0x272e   :  { %2818 = vst.msk [vmem:[#allocation12 + $0x10] sm:$0xff] %vm276_vm8, %v2816_v48 }
0x272f   :  { %2836 = dma.vmem_to_hbm [thread:$0]  %s2829_s4, 512, %s2831_s17, [#allocation6], %s3373_s29, %s3373_s29, %s3374_s30  }
0x2730   :  { %3370 = dma.done.wait [#allocation6], 512  }
0x2731   :  { %3371 = vsyncadd [#allocation6], 4294966784 }
0x2732   :  { %2841 = vsyncpa [#allocation5], 1 }
0x2733   :  { %2842 = vsyncpa [#allocation8], 1 }
0x2734   :  { %2843 = vsyncpa [#allocation11], 1 }
0x2735   :  { %2844 = vsyncpa [#allocation6], 1 }

</bundles_post_ra>
